<compile_context>
chip_gen: v7x
topology: tpu7x:2x2x1
jax: 0.10.0
libtpu: 0.0.40
codegen_flags: <defaults>
</compile_context>

<pallas_src>
import math
import numpy as np
import jax
import jax.numpy as jnp
from jax.experimental import pallas as pl
from jax.experimental.pallas import tpu as pltpu

LANE = 128
K = 3
LRELU_ALPHA = 0.2

# bias_act activation table (fn, def_gain)
_ACT = {
    "lrelu": (lambda y: jnp.where(y >= 0.0, y, LRELU_ALPHA * y), math.sqrt(2.0)),
    "relu": (lambda y: jnp.maximum(y, 0.0), math.sqrt(2.0)),
    "linear": (lambda y: y, 1.0),
}


def _round_up(n, m):
    return ((n + m - 1) // m) * m


# ---------------------------------------------------------------- parameters

def _setup_filter():
    f1 = np.array([1.0, 3.0, 3.0, 1.0], dtype=np.float64)
    f = np.outer(f1, f1)
    return f / f.sum()


def _effective_weight0(weight):
    """Fold the [1,3,3,1] lowpass into the 3x3 stride-2 conv -> 6x6 kernel."""
    w = np.asarray(weight, dtype=np.float64)
    o, c, kh, kw = w.shape
    w = w * (1.0 / math.sqrt(c * kh * kw))          # Conv2dLayer.weight_gain
    f = _setup_filter()
    fe = f.shape[0]
    w_eff = np.zeros((o, c, kh + fe - 1, kw + fe - 1), dtype=np.float64)
    for p in range(kh):
        for q in range(kw):
            w_eff[:, :, p:p + fe, q:q + fe] += w[:, :, p:p + 1, q:q + 1] * f[None, None]
    return w_eff


def _pack_w0(w_eff, c_in_p, c_mid_p):
    """w0p[2*pr+ps, (rp*3+sp)*c_in_p + c, o] = w_eff[o, c, 2*rp+pr, 2*sp+ps]."""
    o, c = w_eff.shape[:2]
    w = np.zeros((4, 9 * c_in_p, c_mid_p), dtype=np.float32)
    for pr in range(2):
        for ps in range(2):
            p = 2 * pr + ps
            for rp in range(3):
                for sp in range(3):
                    t = rp * 3 + sp
                    w[p, t * c_in_p:t * c_in_p + c, :o] = \
                        w_eff[:, :, 2 * rp + pr, 2 * sp + ps].T
    return w


def _pack_w1(weight, c_mid_p):
    """w1p[(a*3+b)*c_mid_p + c, o] = weight[o, c, a, b] * weight_gain."""
    wk = np.asarray(weight, np.float64)
    o, c, kh, kw = wk.shape
    wk = wk * (1.0 / math.sqrt(c * kh * kw))
    w = np.zeros((9 * c_mid_p, c_mid_p), dtype=np.float32)
    for a in range(kh):
        for b in range(kw):
            t = a * 3 + b
            w[t * c_mid_p:t * c_mid_p + c, :o] = wk[:, :, a, b].T
    return w


def _parity_split(x_pad):
    """xp[b, 2*pr+ps, u, v, c] = x_pad[b, 2u+pr, 2v+ps, c]."""
    b, hp, wp, c = x_pad.shape
    x = x_pad.reshape(b, hp // 2, 2, wp // 2, 2, c)
    x = jnp.transpose(x, (0, 2, 4, 1, 3, 5))
    return x.reshape(b, 4, hp // 2, wp // 2, c)


# ------------------------------------------------------------------- kernel

def _make_kernel(tile_h, wo, c_in_p, c_mid_p, activation, conv1_direct, cdt):
    act_fn, act_gain = _ACT[activation]
    th2 = tile_h + 2     # conv0 rows per tile (1-row halo each side for conv1)
    th4 = tile_h + 4     # parity-space input rows needed per tile

    def kernel(xp_ref, w0_ref, b0_ref, w1_ref, b1_ref, o_ref,
               xwin_ref, x0s_ref, sem_ref):
        bi = pl.program_id(0)
        ti = pl.program_id(1)

        # Fetch this tile's input window (4 parities x th4 rows) straight from
        # HBM -- no XLA-side halo duplication / jnp.take pre-pass.
        cp = pltpu.make_async_copy(
            xp_ref.at[bi, :, pl.ds(ti * tile_h, th4), :, :], xwin_ref, sem_ref)
        cp.start()

        # conv1's left/right zero-padding columns (interior is fully
        # overwritten below; halo rows are handled per edge tile further down).
        zcol = jnp.zeros((th2, 1, c_mid_p), dtype=cdt)
        x0s_ref[:, 0:1, :] = zcol
        x0s_ref[:, wo + 1:wo + 2, :] = zcol

        cp.wait()

        # ------- conv0: per-parity wide-K (9*Cin_p) im2col matmuls, f32 acc --
        def conv0_scope(col0_ref):
            acc0 = None
            for pr in range(2):
                for ps in range(2):
                    p = 2 * pr + ps
                    for rp in range(3):
                        for sp in range(3):
                            t = rp * 3 + sp
                            col0_ref[:, :, t * c_in_p:(t + 1) * c_in_p] = \
                                xwin_ref[p, rp:rp + th2, sp:sp + wo, :]
                    d = jnp.dot(col0_ref[...].reshape(th2 * wo, 9 * c_in_p),
                                w0_ref[p], preferred_element_type=jnp.float32)
                    acc0 = d if acc0 is None else acc0 + d
            y0 = act_fn(acc0 + b0_ref[...]) * act_gain
            x0s_ref[:, 1:wo + 1, :] = y0.reshape(th2, wo, c_mid_p).astype(cdt)

        pl.run_scoped(conv0_scope, pltpu.VMEM((th2, wo, 9 * c_in_p), cdt))

        # Halo rows that fall outside [0, H/2) are conv1's zero padding; only
        # the first / last row tile can hit them.
        zrow = jnp.zeros((1, wo + 2, c_mid_p), dtype=cdt)

        @pl.when(ti == 0)
        def _():
            x0s_ref[0:1, :, :] = zrow

        @pl.when(ti == pl.num_programs(1) - 1)
        def _():
            x0s_ref[th2 - 1:th2, :, :] = zrow

        # ---------------------------- conv1 ---------------------------------
        if conv1_direct:
            # c_mid_p >= 256: contract directly on x0s slices (no col1 scratch,
            # no 9x VMEM->VMEM im2col pass); K = c_mid_p still fills the MXU.
            acc1 = None
            for a in range(3):
                for b2 in range(3):
                    t = a * 3 + b2
                    patch = x0s_ref[a:a + tile_h, b2:b2 + wo, :]
                    d = jnp.dot(patch.reshape(tile_h * wo, c_mid_p),
                                w1_ref[t * c_mid_p:(t + 1) * c_mid_p, :],
                                preferred_element_type=jnp.float32)
                    acc1 = d if acc1 is None else acc1 + d
            y1 = act_fn(acc1 + b1_ref[...]) * act_gain
            o_ref[...] = y1.reshape(tile_h, wo, c_mid_p).astype(o_ref.dtype)
        else:
            # c_mid_p == 128: wide-K (9*Cmid_p) im2col keeps MXU depth filled
            # on v6e/v7x.  Sequential run_scoped region -> aliases col0's VMEM.
            def conv1_scope(col1_ref):
                for a in range(3):
                    for b2 in range(3):
                        t = a * 3 + b2
                        col1_ref[:, :, t * c_mid_p:(t + 1) * c_mid_p] = \
                            x0s_ref[a:a + tile_h, b2:b2 + wo, :]
                y1 = jnp.dot(col1_ref[...].reshape(tile_h * wo, 9 * c_mid_p),
                             w1_ref[...], preferred_element_type=jnp.float32)
                y1 = act_fn(y1 + b1_ref[...]) * act_gain
                o_ref[...] = y1.reshape(tile_h, wo, c_mid_p).astype(o_ref.dtype)

            pl.run_scoped(conv1_scope,
                          pltpu.VMEM((tile_h, wo, 9 * c_mid_p), cdt))

    return kernel


# -------------------------------------------------------------- VMEM budget

def _vmem_capacity_bytes():
    try:
        info = pltpu.get_tpu_info()
        cap = getattr(info, "vmem_capacity_bytes", None)
        if cap:
            return int(cap)
    except Exception:
        pass
    return 64 * 1024 * 1024        # conservative fallback (v7x per-TensorCore)


def _step_vmem_bytes(tile_h, wo, c_in_p, c_mid_p, cbytes, obytes, conv1_direct):
    th2, th4 = tile_h + 2, tile_h + 4
    xwin = 4 * th4 * (wo + 2) * c_in_p * cbytes           # input-window scratch
    x0s = th2 * (wo + 2) * c_mid_p * cbytes                # conv0 staging
    col0 = th2 * wo * 9 * c_in_p * cbytes
    col1 = 0 if conv1_direct else tile_h * wo * 9 * c_mid_p * cbytes
    col = max(col0, col1)                      # sequential run_scoped -> alias
    out = 2 * tile_h * wo * c_mid_p * obytes   # double-buffered output block
    wts = 2 * (4 * 9 * c_in_p * c_mid_p + 9 * c_mid_p * c_mid_p) * cbytes
    wts += 2 * 2 * c_mid_p * 4                 # biases (f32)
    acc = (th2 + tile_h) * wo * c_mid_p * 4    # live f32 accumulators
    return xwin + x0s + col + out + wts + acc


# ------------------------------------------------------------------ wrapper

def conv_block_down_forward(x, weight0, bias0, weight1, bias1,
                            activation="lrelu", tile_h=None,
                            compute_dtype=jnp.bfloat16, nhwc_out=False):
    """ConvBlockDown.forward. x: (B, Cin, H, W) NCHW -> (B, Cout, H/2, W/2)."""
    b, c_in, h, w = x.shape
    assert h % 2 == 0 and w % 2 == 0
    c_mid = weight0.shape[0]
    assert weight1.shape[0] == weight1.shape[1] == c_mid
    ho, wo = h // 2, w // 2

    c_in_p = _round_up(c_in, LANE)
    c_mid_p = _round_up(c_mid, LANE)
    cdt = compute_dtype or x.dtype
    cbytes = jnp.dtype(cdt).itemsize
    obytes = jnp.dtype(x.dtype).itemsize
    conv1_direct = c_mid_p >= 2 * LANE

    # VMEM-budget-driven row-tile size (v5e/v6e ~128 MiB, v7x 64 MiB per TC).
    vmem_cap = _vmem_capacity_bytes()
    budget = int(0.75 * vmem_cap)
    if tile_h is None:
        tile_h = 1
        for d in range(ho, 0, -1):
            if ho % d == 0 and _step_vmem_bytes(
                    d, wo, c_in_p, c_mid_p, cbytes, obytes, conv1_direct) <= budget:
                tile_h = d
                break
    assert ho % tile_h == 0, "tile_h must divide H//2"
    n_t = ho // tile_h
    need = _step_vmem_bytes(tile_h, wo, c_in_p, c_mid_p, cbytes, obytes, conv1_direct)
    vmem_limit = int(min(vmem_cap, max(2 * need, 64 * 1024 * 1024)))

    # ---- parameter packing (host-side, once) ----
    w0p = jnp.asarray(_pack_w0(_effective_weight0(weight0), c_in_p, c_mid_p), cdt)
    w1p = jnp.asarray(_pack_w1(weight1, c_mid_p), cdt)
    b0p = jnp.zeros((1, c_mid_p), jnp.float32).at[0, :c_mid].set(
        jnp.asarray(bias0, jnp.float32))
    b1p = jnp.zeros((1, c_mid_p), jnp.float32).at[0, :c_mid].set(
        jnp.asarray(bias1, jnp.float32))

    # ---- activation layout prep (single XLA pass: transpose+pad+parity) ----
    # TODO(synk): fold this into in-kernel strided DMA from the raw NHWC input.
    x_nhwc = jnp.transpose(x, (0, 2, 3, 1)).astype(cdt)
    x_nhwc = jnp.pad(x_nhwc, ((0, 0), (2, 2), (2, 2), (0, c_in_p - c_in)))
    xp = _parity_split(x_nhwc)                                   # (B,4,ho+2,wo+2,Cin_p)
    xp = jnp.pad(xp, ((0, 0), (0, 0), (1, 1), (0, 0), (0, 0)))   # + conv1 row halo

    kernel = _make_kernel(tile_h, wo, c_in_p, c_mid_p, activation, conv1_direct, cdt)

    out = pl.pallas_call(
        kernel,
        out_shape=jax.ShapeDtypeStruct((b, ho, wo, c_mid_p), x.dtype),
        grid=(b, n_t),
        in_specs=[
            pl.BlockSpec(memory_space=pl.ANY),        # parity-split input, HBM
            pl.BlockSpec((4, 9 * c_in_p, c_mid_p), lambda bi, ti: (0, 0, 0)),
            pl.BlockSpec((1, c_mid_p), lambda bi, ti: (0, 0)),
            pl.BlockSpec((9 * c_mid_p, c_mid_p), lambda bi, ti: (0, 0)),
            pl.BlockSpec((1, c_mid_p), lambda bi, ti: (0, 0)),
        ],
        out_specs=pl.BlockSpec((None, tile_h, wo, c_mid_p),
                               lambda bi, ti: (bi, ti, 0, 0)),
        scratch_shapes=[
            pltpu.VMEM((4, tile_h + 4, wo + 2, c_in_p), cdt),   # input window
            pltpu.VMEM((tile_h + 2, wo + 2, c_mid_p), cdt),     # conv0 tile + W pad
            pltpu.SemaphoreType.DMA(()),
        ],
        compiler_params=pltpu.CompilerParams(
            dimension_semantics=("parallel", "parallel"),
            vmem_limit_bytes=vmem_limit),
    )(xp, w0p, b0p, w1p, b1p)

    # Drop lane padding.  Note: when c_mid << 128 the padded HBM write above is
    # inflated; callers that can consume NHWC should pass nhwc_out=True.
    out = out[:, :, :, :c_mid]
    if nhwc_out:
        return out
    return jnp.transpose(out, (0, 3, 1, 2))        # back to NCHW


# --------------------------------------------------------- pure-JAX reference

def _reference_forward(x, weight0, bias0, weight1, bias1, activation="lrelu"):
    b, c_in, h, w = x.shape
    c_mid = weight0.shape[0]
    act_fn, act_gain = _ACT[activation]
    hi = jax.lax.Precision.HIGHEST
    # conv0: pad 2, depthwise [1,3,3,1] lowpass, 3x3 stride-2, bias, act*gain
    wk0 = jnp.asarray(weight0) * (1.0 / math.sqrt(c_in * K * K))
    f = jnp.asarray(_setup_filter(), jnp.float32)
    x_pad = jnp.pad(x, ((0, 0), (0, 0), (2, 2), (2, 2)))
    fk = jnp.tile(f[None, None], (c_in, 1, 1, 1))
    u = jax.lax.conv_general_dilated(x_pad, fk, (1, 1), "VALID",
                                     feature_group_count=c_in,
                                     dimension_numbers=("NCHW", "OIHW", "NCHW"),
                                     precision=hi)
    y0 = jax.lax.conv_general_dilated(u, wk0, (2, 2), "VALID",
                                      dimension_numbers=("NCHW", "OIHW", "NCHW"),
                                      precision=hi)
    y0 = act_fn(y0 + bias0[None, :, None, None]) * act_gain
    # conv1: 3x3, stride 1, pad 1, bias, act*gain
    wk1 = jnp.asarray(weight1) * (1.0 / math.sqrt(c_mid * K * K))
    y1 = jax.lax.conv_general_dilated(y0, wk1, (1, 1), ((1, 1), (1, 1)),
                                      dimension_numbers=("NCHW", "OIHW", "NCHW"),
                                      precision=hi)
    y1 = act_fn(y1 + bias1[None, :, None, None]) * act_gain
    return y1


if __name__ == "__main__":
    key = jax.random.PRNGKey(0)
    k_x, k_w0, k_b0, k_w1, k_b1 = jax.random.split(key, 5)

    # ---- case 1: f32 compute, forced row tiling (n_t=2): exercises halo
    # zeroing, per-tile DMA offsets and the wide-K conv1 path (c_mid_p=128).
    B, C_IN, C_OUT, H, W = 2, 4, 8, 16, 16
    x = jax.random.normal(k_x, (B, C_IN, H, W), dtype=jnp.float32)
    w0 = jax.random.normal(k_w0, (C_OUT, C_IN, K, K), dtype=jnp.float32)
    b0 = 0.1 * jax.random.normal(k_b0, (C_OUT,), dtype=jnp.float32)
    w1 = jax.random.normal(k_w1, (C_OUT, C_OUT, K, K), dtype=jnp.float32)
    b1 = 0.1 * jax.random.normal(k_b1, (C_OUT,), dtype=jnp.float32)

    y_ref = _reference_forward(x, w0, b0, w1, b1, "lrelu")

    y = jax.block_until_ready(conv_block_down_forward(
        x, w0, b0, w1, b1, activation="lrelu", tile_h=4,
        compute_dtype=jnp.float32))
    assert y.shape == (B, C_OUT, H // 2, W // 2)
    # tolerance kept robust to MXU f32 precision modes; real bugs are O(1) off.
    np.testing.assert_allclose(np.asarray(y), np.asarray(y_ref),
                               rtol=3e-2, atol=3e-2)

    # ---- case 2: default bf16 compute path, auto (VMEM-driven) tile_h.
    y_bf = jax.block_until_ready(conv_block_down_forward(
        x, w0, b0, w1, b1, activation="lrelu"))
    np.testing.assert_allclose(np.asarray(y_bf), np.asarray(y_ref),
                               rtol=1e-1, atol=1e-1)

    # ---- case 3: c_mid_p >= 256 -> direct-slice conv1 (no col1 scratch).
    C_MID = 256
    k_w0b, k_w1b = jax.random.split(k_w0, 2)
    xb = jax.random.normal(k_x, (1, C_IN, H, W), dtype=jnp.float32)
    w0b = jax.random.normal(k_w0b, (C_MID, C_IN, K, K), dtype=jnp.float32)
    b0b = jnp.zeros((C_MID,), jnp.float32)
    w1b = jax.random.normal(k_w1b, (C_MID, C_MID, K, K), dtype=jnp.float32)
    b1b = jnp.zeros((C_MID,), jnp.float32)
    yb = jax.block_until_ready(conv_block_down_forward(
        xb, w0b, b0b, w1b, b1b, activation="lrelu", compute_dtype=jnp.float32))
    yb_ref = _reference_forward(xb, w0b, b0b, w1b, b1b, "lrelu")
    np.testing.assert_allclose(np.asarray(yb), np.asarray(yb_ref),
                               rtol=3e-2, atol=3e-2)

    print("KERNEL_OK")
</pallas_src>

<mosaic_0001>
module attributes {stable_mosaic.version = 11 : i64} {
  func.func @kernel(%arg0: i32, %arg1: i32, %arg2: memref<2x4x12x10x128xf32, #tpu.memory_space<any>>, %arg3: memref<4x1152x128xf32, #tpu.memory_space<vmem>>, %arg4: memref<1x128xf32, #tpu.memory_space<vmem>>, %arg5: memref<1152x128xf32, #tpu.memory_space<vmem>>, %arg6: memref<1x128xf32, #tpu.memory_space<vmem>>, %arg7: memref<1x4x8x128xf32, #tpu.memory_space<vmem>>, %arg8: memref<4x8x10x128xf32, #tpu.memory_space<vmem>>, %arg9: memref<6x10x128xf32, #tpu.memory_space<vmem>>, %arg10: memref<!tpu.dma_semaphore, #tpu.memory_space<semaphore_mem>>) attributes {dimension_semantics = [#tpu.dimension_semantics<parallel>, #tpu.dimension_semantics<parallel>], iteration_bounds = array<i64: 2, 2>, scalar_prefetch = 0 : i64, scratch_operands = 3 : i64, tpu.core_type = #tpu.core_type<tc>, window_params = [{}, {pipeline_mode = #tpu.pipeline_mode<synchronous>, transform_indices = @transform_1, window_bounds = array<i64: 4, 1152, 128>}, {pipeline_mode = #tpu.pipeline_mode<synchronous>, transform_indices = @transform_2, window_bounds = array<i64: 1, 128>}, {pipeline_mode = #tpu.pipeline_mode<synchronous>, transform_indices = @transform_3, window_bounds = array<i64: 1152, 128>}, {pipeline_mode = #tpu.pipeline_mode<synchronous>, transform_indices = @transform_4, window_bounds = array<i64: 1, 128>}, {transform_indices = @transform_5, window_bounds = array<i64: 1, 4, 8, 128>}]} {
    %c4_i32 = arith.constant 4 : i32
    %0 = arith.muli %arg1, %c4_i32 : i32
    %c0_i32 = arith.constant 0 : i32
    %c0_i32_0 = arith.constant 0 : i32
    %c0_i32_1 = arith.constant 0 : i32
    %1 = tpu.memref_slice %arg2[%arg0, %c0_i32, %0, %c0_i32_0, %c0_i32_1] : memref<2x4x12x10x128xf32, #tpu.memory_space<any>> -> memref<1x4x8x10x128xf32, #tpu.memory_space<any>>
    %2 = tpu.memref_squeeze %1 : memref<1x4x8x10x128xf32, #tpu.memory_space<any>> -> memref<4x8x10x128xf32, #tpu.memory_space<any>>
    tpu.enqueue_dma source(%2 : memref<4x8x10x128xf32, #tpu.memory_space<any>>) target(%arg8 : memref<4x8x10x128xf32, #tpu.memory_space<vmem>>) target_semaphore(%arg10 : memref<!tpu.dma_semaphore, #tpu.memory_space<semaphore_mem>>)
    %cst = arith.constant 0.000000e+00 : f32
    %3 = vector.broadcast %cst : f32 to vector<6x1x128xf32>
    %c0 = arith.constant 0 : index
    %c0_2 = arith.constant 0 : index
    %c0_3 = arith.constant 0 : index
    %4 = vector.load %arg9[%c0, %c0_2, %c0_3] : memref<6x10x128xf32, #tpu.memory_space<vmem>>, vector<6x1x128xf32>
    tpu.vector_store %arg9[%c0, %c0_2, %c0_3], %3 {strides = array<i32>} : memref<6x10x128xf32, #tpu.memory_space<vmem>>, vector<6x1x128xf32>,
    %c0_4 = arith.constant 0 : index
    %c9 = arith.constant 9 : index
    %c0_5 = arith.constant 0 : index
    %5 = vector.load %arg9[%c0_4, %c9, %c0_5] : memref<6x10x128xf32, #tpu.memory_space<vmem>>, vector<6x1x128xf32>
    tpu.vector_store %arg9[%c0_4, %c9, %c0_5], %3 {strides = array<i32>} : memref<6x10x128xf32, #tpu.memory_space<vmem>>, vector<6x1x128xf32>,
    %c0_i32_6 = arith.constant 0 : i32
    %c0_i32_7 = arith.constant 0 : i32
    %c0_i32_8 = arith.constant 0 : i32
    %6 = tpu.memref_slice %arg2[%arg0, %c0_i32_6, %0, %c0_i32_7, %c0_i32_8] : memref<2x4x12x10x128xf32, #tpu.memory_space<any>> -> memref<1x4x8x10x128xf32, #tpu.memory_space<any>>
    %7 = tpu.memref_squeeze %6 : memref<1x4x8x10x128xf32, #tpu.memory_space<any>> -> memref<4x8x10x128xf32, #tpu.memory_space<any>>
    tpu.wait_dma2 semaphore(%arg10 : memref<!tpu.dma_semaphore, #tpu.memory_space<semaphore_mem>>) src(%7 : memref<4x8x10x128xf32, #tpu.memory_space<any>>) dst(%arg8 : memref<4x8x10x128xf32, #tpu.memory_space<vmem>>)
    "tpu.region"() ({
      %alloca = memref.alloca() : memref<6x8x1152xf32, #tpu.memory_space<vmem>>
      %c0_13 = arith.constant 0 : index
      %c0_14 = arith.constant 0 : index
      %c0_15 = arith.constant 0 : index
      %c0_16 = arith.constant 0 : index
      %15 = vector.load %arg8[%c0_13, %c0_14, %c0_15, %c0_16] : memref<4x8x10x128xf32, #tpu.memory_space<vmem>>, vector<1x6x8x128xf32>
      %16 = vector.shape_cast %15 : vector<1x6x8x128xf32> to vector<6x8x128xf32>
      %c0_17 = arith.constant 0 : index
      %c0_18 = arith.constant 0 : index
      %c0_19 = arith.constant 0 : index
      %17 = vector.load %alloca[%c0_17, %c0_18, %c0_19] : memref<6x8x1152xf32, #tpu.memory_space<vmem>>, vector<6x8x128xf32>
      tpu.vector_store %alloca[%c0_17, %c0_18, %c0_19], %16 {strides = array<i32>} : memref<6x8x1152xf32, #tpu.memory_space<vmem>>, vector<6x8x128xf32>,
      %c0_20 = arith.constant 0 : index
      %c0_21 = arith.constant 0 : index
      %c1 = arith.constant 1 : index
      %c0_22 = arith.constant 0 : index
      %18 = vector.load %arg8[%c0_20, %c0_21, %c1, %c0_22] : memref<4x8x10x128xf32, #tpu.memory_space<vmem>>, vector<1x6x8x128xf32>
      %19 = vector.shape_cast %18 : vector<1x6x8x128xf32> to vector<6x8x128xf32>
      %c0_23 = arith.constant 0 : index
      %c0_24 = arith.constant 0 : index
      %c128 = arith.constant 128 : index
      %20 = vector.load %alloca[%c0_23, %c0_24, %c128] : memref<6x8x1152xf32, #tpu.memory_space<vmem>>, vector<6x8x128xf32>
      tpu.vector_store %alloca[%c0_23, %c0_24, %c128], %19 {strides = array<i32>} : memref<6x8x1152xf32, #tpu.memory_space<vmem>>, vector<6x8x128xf32>,
      %c0_25 = arith.constant 0 : index
      %c0_26 = arith.constant 0 : index
      %c2 = arith.constant 2 : index
      %c0_27 = arith.constant 0 : index
      %21 = vector.load %arg8[%c0_25, %c0_26, %c2, %c0_27] : memref<4x8x10x128xf32, #tpu.memory_space<vmem>>, vector<1x6x8x128xf32>
      %22 = vector.shape_cast %21 : vector<1x6x8x128xf32> to vector<6x8x128xf32>
      %c0_28 = arith.constant 0 : index
      %c0_29 = arith.constant 0 : index
      %c256 = arith.constant 256 : index
      %23 = vector.load %alloca[%c0_28, %c0_29, %c256] : memref<6x8x1152xf32, #tpu.memory_space<vmem>>, vector<6x8x128xf32>
      tpu.vector_store %alloca[%c0_28, %c0_29, %c256], %22 {strides = array<i32>} : memref<6x8x1152xf32, #tpu.memory_space<vmem>>, vector<6x8x128xf32>,
      %c0_30 = arith.constant 0 : index
      %c1_31 = arith.constant 1 : index
      %c0_32 = arith.constant 0 : index
      %c0_33 = arith.constant 0 : index
      %24 = vector.load %arg8[%c0_30, %c1_31, %c0_32, %c0_33] : memref<4x8x10x128xf32, #tpu.memory_space<vmem>>, vector<1x6x8x128xf32>
      %25 = vector.shape_cast %24 : vector<1x6x8x128xf32> to vector<6x8x128xf32>
      %c0_34 = arith.constant 0 : index
      %c0_35 = arith.constant 0 : index
      %c384 = arith.constant 384 : index
      %26 = vector.load %alloca[%c0_34, %c0_35, %c384] : memref<6x8x1152xf32, #tpu.memory_space<vmem>>, vector<6x8x128xf32>
      tpu.vector_store %alloca[%c0_34, %c0_35, %c384], %25 {strides = array<i32>} : memref<6x8x1152xf32, #tpu.memory_space<vmem>>, vector<6x8x128xf32>,
      %c0_36 = arith.constant 0 : index
      %c1_37 = arith.constant 1 : index
      %c1_38 = arith.constant 1 : index
      %c0_39 = arith.constant 0 : index
      %27 = vector.load %arg8[%c0_36, %c1_37, %c1_38, %c0_39] : memref<4x8x10x128xf32, #tpu.memory_space<vmem>>, vector<1x6x8x128xf32>
      %28 = vector.shape_cast %27 : vector<1x6x8x128xf32> to vector<6x8x128xf32>
      %c0_40 = arith.constant 0 : index
      %c0_41 = arith.constant 0 : index
      %c512 = arith.constant 512 : index
      %29 = vector.load %alloca[%c0_40, %c0_41, %c512] : memref<6x8x1152xf32, #tpu.memory_space<vmem>>, vector<6x8x128xf32>
      tpu.vector_store %alloca[%c0_40, %c0_41, %c512], %28 {strides = array<i32>} : memref<6x8x1152xf32, #tpu.memory_space<vmem>>, vector<6x8x128xf32>,
      %c0_42 = arith.constant 0 : index
      %c1_43 = arith.constant 1 : index
      %c2_44 = arith.constant 2 : index
      %c0_45 = arith.constant 0 : index
      %30 = vector.load %arg8[%c0_42, %c1_43, %c2_44, %c0_45] : memref<4x8x10x128xf32, #tpu.memory_space<vmem>>, vector<1x6x8x128xf32>
      %31 = vector.shape_cast %30 : vector<1x6x8x128xf32> to vector<6x8x128xf32>
      %c0_46 = arith.constant 0 : index
      %c0_47 = arith.constant 0 : index
      %c640 = arith.constant 640 : index
      %32 = vector.load %alloca[%c0_46, %c0_47, %c640] : memref<6x8x1152xf32, #tpu.memory_space<vmem>>, vector<6x8x128xf32>
      tpu.vector_store %alloca[%c0_46, %c0_47, %c640], %31 {strides = array<i32>} : memref<6x8x1152xf32, #tpu.memory_space<vmem>>, vector<6x8x128xf32>,
      %c0_48 = arith.constant 0 : index
      %c2_49 = arith.constant 2 : index
      %c0_50 = arith.constant 0 : index
      %c0_51 = arith.constant 0 : index
      %33 = vector.load %arg8[%c0_48, %c2_49, %c0_50, %c0_51] : memref<4x8x10x128xf32, #tpu.memory_space<vmem>>, vector<1x6x8x128xf32>
      %34 = vector.shape_cast %33 : vector<1x6x8x128xf32> to vector<6x8x128xf32>
      %c0_52 = arith.constant 0 : index
      %c0_53 = arith.constant 0 : index
      %c768 = arith.constant 768 : index
      %35 = vector.load %alloca[%c0_52, %c0_53, %c768] : memref<6x8x1152xf32, #tpu.memory_space<vmem>>, vector<6x8x128xf32>
      tpu.vector_store %alloca[%c0_52, %c0_53, %c768], %34 {strides = array<i32>} : memref<6x8x1152xf32, #tpu.memory_space<vmem>>, vector<6x8x128xf32>,
      %c0_54 = arith.constant 0 : index
      %c2_55 = arith.constant 2 : index
      %c1_56 = arith.constant 1 : index
      %c0_57 = arith.constant 0 : index
      %36 = vector.load %arg8[%c0_54, %c2_55, %c1_56, %c0_57] : memref<4x8x10x128xf32, #tpu.memory_space<vmem>>, vector<1x6x8x128xf32>
      %37 = vector.shape_cast %36 : vector<1x6x8x128xf32> to vector<6x8x128xf32>
      %c0_58 = arith.constant 0 : index
      %c0_59 = arith.constant 0 : index
      %c896 = arith.constant 896 : index
      %38 = vector.load %alloca[%c0_58, %c0_59, %c896] : memref<6x8x1152xf32, #tpu.memory_space<vmem>>, vector<6x8x128xf32>
      tpu.vector_store %alloca[%c0_58, %c0_59, %c896], %37 {strides = array<i32>} : memref<6x8x1152xf32, #tpu.memory_space<vmem>>, vector<6x8x128xf32>,
      %c0_60 = arith.constant 0 : index
      %c2_61 = arith.constant 2 : index
      %c2_62 = arith.constant 2 : index
      %c0_63 = arith.constant 0 : index
      %39 = vector.load %arg8[%c0_60, %c2_61, %c2_62, %c0_63] : memref<4x8x10x128xf32, #tpu.memory_space<vmem>>, vector<1x6x8x128xf32>
      %40 = vector.shape_cast %39 : vector<1x6x8x128xf32> to vector<6x8x128xf32>
      %c0_64 = arith.constant 0 : index
      %c0_65 = arith.constant 0 : index
      %c1024 = arith.constant 1024 : index
      %41 = vector.load %alloca[%c0_64, %c0_65, %c1024] : memref<6x8x1152xf32, #tpu.memory_space<vmem>>, vector<6x8x128xf32>
      tpu.vector_store %alloca[%c0_64, %c0_65, %c1024], %40 {strides = array<i32>} : memref<6x8x1152xf32, #tpu.memory_space<vmem>>, vector<6x8x128xf32>,
      %c0_66 = arith.constant 0 : index
      %c0_67 = arith.constant 0 : index
      %c0_68 = arith.constant 0 : index
      %42 = vector.load %alloca[%c0_66, %c0_67, %c0_68] : memref<6x8x1152xf32, #tpu.memory_space<vmem>>, vector<6x8x1152xf32>
      %43 = vector.shape_cast %42 : vector<6x8x1152xf32> to vector<48x1152xf32>
      %c0_69 = arith.constant 0 : index
      %c0_70 = arith.constant 0 : index
      %c0_71 = arith.constant 0 : index
      %44 = vector.load %arg3[%c0_69, %c0_70, %c0_71] : memref<4x1152x128xf32, #tpu.memory_space<vmem>>, vector<1x1152x128xf32>
      %45 = vector.shape_cast %44 : vector<1x1152x128xf32> to vector<1152x128xf32>
      %cst_72 = arith.constant dense<0.000000e+00> : vector<48x128xf32>
      %46 = tpu.matmul %43, %45, %cst_72 {dimension_numbers = #tpu.dot_dimension_numbers<[1], [0], [0], [1], [0, 0, 1, 1], [], []>} : vector<48x1152xf32>, vector<1152x128xf32>, vector<48x128xf32> -> vector<48x128xf32>
      %c1_73 = arith.constant 1 : index
      %c0_74 = arith.constant 0 : index
      %c0_75 = arith.constant 0 : index
      %c0_76 = arith.constant 0 : index
      %47 = vector.load %arg8[%c1_73, %c0_74, %c0_75, %c0_76] : memref<4x8x10x128xf32, #tpu.memory_space<vmem>>, vector<1x6x8x128xf32>
      %48 = vector.shape_cast %47 : vector<1x6x8x128xf32> to vector<6x8x128xf32>
      %c0_77 = arith.constant 0 : index
      %c0_78 = arith.constant 0 : index
      %c0_79 = arith.constant 0 : index
      %49 = vector.load %alloca[%c0_77, %c0_78, %c0_79] : memref<6x8x1152xf32, #tpu.memory_space<vmem>>, vector<6x8x128xf32>
      tpu.vector_store %alloca[%c0_77, %c0_78, %c0_79], %48 {strides = array<i32>} : memref<6x8x1152xf32, #tpu.memory_space<vmem>>, vector<6x8x128xf32>,
      %c1_80 = arith.constant 1 : index
      %c0_81 = arith.constant 0 : index
      %c1_82 = arith.constant 1 : index
      %c0_83 = arith.constant 0 : index
      %50 = vector.load %arg8[%c1_80, %c0_81, %c1_82, %c0_83] : memref<4x8x10x128xf32, #tpu.memory_space<vmem>>, vector<1x6x8x128xf32>
      %51 = vector.shape_cast %50 : vector<1x6x8x128xf32> to vector<6x8x128xf32>
      %c0_84 = arith.constant 0 : index
      %c0_85 = arith.constant 0 : index
      %c128_86 = arith.constant 128 : index
      %52 = vector.load %alloca[%c0_84, %c0_85, %c128_86] : memref<6x8x1152xf32, #tpu.memory_space<vmem>>, vector<6x8x128xf32>
      tpu.vector_store %alloca[%c0_84, %c0_85, %c128_86], %51 {strides = array<i32>} : memref<6x8x1152xf32, #tpu.memory_space<vmem>>, vector<6x8x128xf32>,
      %c1_87 = arith.constant 1 : index
      %c0_88 = arith.constant 0 : index
      %c2_89 = arith.constant 2 : index
      %c0_90 = arith.constant 0 : index
      %53 = vector.load %arg8[%c1_87, %c0_88, %c2_89, %c0_90] : memref<4x8x10x128xf32, #tpu.memory_space<vmem>>, vector<1x6x8x128xf32>
      %54 = vector.shape_cast %53 : vector<1x6x8x128xf32> to vector<6x8x128xf32>
      %c0_91 = arith.constant 0 : index
      %c0_92 = arith.constant 0 : index
      %c256_93 = arith.constant 256 : index
      %55 = vector.load %alloca[%c0_91, %c0_92, %c256_93] : memref<6x8x1152xf32, #tpu.memory_space<vmem>>, vector<6x8x128xf32>
      tpu.vector_store %alloca[%c0_91, %c0_92, %c256_93], %54 {strides = array<i32>} : memref<6x8x1152xf32, #tpu.memory_space<vmem>>, vector<6x8x128xf32>,
      %c1_94 = arith.constant 1 : index
      %c1_95 = arith.constant 1 : index
      %c0_96 = arith.constant 0 : index
      %c0_97 = arith.constant 0 : index
      %56 = vector.load %arg8[%c1_94, %c1_95, %c0_96, %c0_97] : memref<4x8x10x128xf32, #tpu.memory_space<vmem>>, vector<1x6x8x128xf32>
      %57 = vector.shape_cast %56 : vector<1x6x8x128xf32> to vector<6x8x128xf32>
      %c0_98 = arith.constant 0 : index
      %c0_99 = arith.constant 0 : index
      %c384_100 = arith.constant 384 : index
      %58 = vector.load %alloca[%c0_98, %c0_99, %c384_100] : memref<6x8x1152xf32, #tpu.memory_space<vmem>>, vector<6x8x128xf32>
      tpu.vector_store %alloca[%c0_98, %c0_99, %c384_100], %57 {strides = array<i32>} : memref<6x8x1152xf32, #tpu.memory_space<vmem>>, vector<6x8x128xf32>,
      %c1_101 = arith.constant 1 : index
      %c1_102 = arith.constant 1 : index
      %c1_103 = arith.constant 1 : index
      %c0_104 = arith.constant 0 : index
      %59 = vector.load %arg8[%c1_101, %c1_102, %c1_103, %c0_104] : memref<4x8x10x128xf32, #tpu.memory_space<vmem>>, vector<1x6x8x128xf32>
      %60 = vector.shape_cast %59 : vector<1x6x8x128xf32> to vector<6x8x128xf32>
      %c0_105 = arith.constant 0 : index
      %c0_106 = arith.constant 0 : index
      %c512_107 = arith.constant 512 : index
      %61 = vector.load %alloca[%c0_105, %c0_106, %c512_107] : memref<6x8x1152xf32, #tpu.memory_space<vmem>>, vector<6x8x128xf32>
      tpu.vector_store %alloca[%c0_105, %c0_106, %c512_107], %60 {strides = array<i32>} : memref<6x8x1152xf32, #tpu.memory_space<vmem>>, vector<6x8x128xf32>,
      %c1_108 = arith.constant 1 : index
      %c1_109 = arith.constant 1 : index
      %c2_110 = arith.constant 2 : index
      %c0_111 = arith.constant 0 : index
      %62 = vector.load %arg8[%c1_108, %c1_109, %c2_110, %c0_111] : memref<4x8x10x128xf32, #tpu.memory_space<vmem>>, vector<1x6x8x128xf32>
      %63 = vector.shape_cast %62 : vector<1x6x8x128xf32> to vector<6x8x128xf32>
      %c0_112 = arith.constant 0 : index
      %c0_113 = arith.constant 0 : index
      %c640_114 = arith.constant 640 : index
      %64 = vector.load %alloca[%c0_112, %c0_113, %c640_114] : memref<6x8x1152xf32, #tpu.memory_space<vmem>>, vector<6x8x128xf32>
      tpu.vector_store %alloca[%c0_112, %c0_113, %c640_114], %63 {strides = array<i32>} : memref<6x8x1152xf32, #tpu.memory_space<vmem>>, vector<6x8x128xf32>,
      %c1_115 = arith.constant 1 : index
      %c2_116 = arith.constant 2 : index
      %c0_117 = arith.constant 0 : index
      %c0_118 = arith.constant 0 : index
      %65 = vector.load %arg8[%c1_115, %c2_116, %c0_117, %c0_118] : memref<4x8x10x128xf32, #tpu.memory_space<vmem>>, vector<1x6x8x128xf32>
      %66 = vector.shape_cast %65 : vector<1x6x8x128xf32> to vector<6x8x128xf32>
      %c0_119 = arith.constant 0 : index
      %c0_120 = arith.constant 0 : index
      %c768_121 = arith.constant 768 : index
      %67 = vector.load %alloca[%c0_119, %c0_120, %c768_121] : memref<6x8x1152xf32, #tpu.memory_space<vmem>>, vector<6x8x128xf32>
      tpu.vector_store %alloca[%c0_119, %c0_120, %c768_121], %66 {strides = array<i32>} : memref<6x8x1152xf32, #tpu.memory_space<vmem>>, vector<6x8x128xf32>,
      %c1_122 = arith.constant 1 : index
      %c2_123 = arith.constant 2 : index
      %c1_124 = arith.constant 1 : index
      %c0_125 = arith.constant 0 : index
      %68 = vector.load %arg8[%c1_122, %c2_123, %c1_124, %c0_125] : memref<4x8x10x128xf32, #tpu.memory_space<vmem>>, vector<1x6x8x128xf32>
      %69 = vector.shape_cast %68 : vector<1x6x8x128xf32> to vector<6x8x128xf32>
      %c0_126 = arith.constant 0 : index
      %c0_127 = arith.constant 0 : index
      %c896_128 = arith.constant 896 : index
      %70 = vector.load %alloca[%c0_126, %c0_127, %c896_128] : memref<6x8x1152xf32, #tpu.memory_space<vmem>>, vector<6x8x128xf32>
      tpu.vector_store %alloca[%c0_126, %c0_127, %c896_128], %69 {strides = array<i32>} : memref<6x8x1152xf32, #tpu.memory_space<vmem>>, vector<6x8x128xf32>,
      %c1_129 = arith.constant 1 : index
      %c2_130 = arith.constant 2 : index
      %c2_131 = arith.constant 2 : index
      %c0_132 = arith.constant 0 : index
      %71 = vector.load %arg8[%c1_129, %c2_130, %c2_131, %c0_132] : memref<4x8x10x128xf32, #tpu.memory_space<vmem>>, vector<1x6x8x128xf32>
      %72 = vector.shape_cast %71 : vector<1x6x8x128xf32> to vector<6x8x128xf32>
      %c0_133 = arith.constant 0 : index
      %c0_134 = arith.constant 0 : index
      %c1024_135 = arith.constant 1024 : index
      %73 = vector.load %alloca[%c0_133, %c0_134, %c1024_135] : memref<6x8x1152xf32, #tpu.memory_space<vmem>>, vector<6x8x128xf32>
      tpu.vector_store %alloca[%c0_133, %c0_134, %c1024_135], %72 {strides = array<i32>} : memref<6x8x1152xf32, #tpu.memory_space<vmem>>, vector<6x8x128xf32>,
      %c0_136 = arith.constant 0 : index
      %c0_137 = arith.constant 0 : index
      %c0_138 = arith.constant 0 : index
      %74 = vector.load %alloca[%c0_136, %c0_137, %c0_138] : memref<6x8x1152xf32, #tpu.memory_space<vmem>>, vector<6x8x1152xf32>
      %75 = vector.shape_cast %74 : vector<6x8x1152xf32> to vector<48x1152xf32>
      %c1_139 = arith.constant 1 : index
      %c0_140 = arith.constant 0 : index
      %c0_141 = arith.constant 0 : index
      %76 = vector.load %arg3[%c1_139, %c0_140, %c0_141] : memref<4x1152x128xf32, #tpu.memory_space<vmem>>, vector<1x1152x128xf32>
      %77 = vector.shape_cast %76 : vector<1x1152x128xf32> to vector<1152x128xf32>
      %cst_142 = arith.constant dense<0.000000e+00> : vector<48x128xf32>
      %78 = tpu.matmul %75, %77, %cst_142 {dimension_numbers = #tpu.dot_dimension_numbers<[1], [0], [0], [1], [0, 0, 1, 1], [], []>} : vector<48x1152xf32>, vector<1152x128xf32>, vector<48x128xf32> -> vector<48x128xf32>
      %79 = arith.addf %46, %78 : vector<48x128xf32>
      %c2_143 = arith.constant 2 : index
      %c0_144 = arith.constant 0 : index
      %c0_145 = arith.constant 0 : index
      %c0_146 = arith.constant 0 : index
      %80 = vector.load %arg8[%c2_143, %c0_144, %c0_145, %c0_146] : memref<4x8x10x128xf32, #tpu.memory_space<vmem>>, vector<1x6x8x128xf32>
      %81 = vector.shape_cast %80 : vector<1x6x8x128xf32> to vector<6x8x128xf32>
      %c0_147 = arith.constant 0 : index
      %c0_148 = arith.constant 0 : index
      %c0_149 = arith.constant 0 : index
      %82 = vector.load %alloca[%c0_147, %c0_148, %c0_149] : memref<6x8x1152xf32, #tpu.memory_space<vmem>>, vector<6x8x128xf32>
      tpu.vector_store %alloca[%c0_147, %c0_148, %c0_149], %81 {strides = array<i32>} : memref<6x8x1152xf32, #tpu.memory_space<vmem>>, vector<6x8x128xf32>,
      %c2_150 = arith.constant 2 : index
      %c0_151 = arith.constant 0 : index
      %c1_152 = arith.constant 1 : index
      %c0_153 = arith.constant 0 : index
      %83 = vector.load %arg8[%c2_150, %c0_151, %c1_152, %c0_153] : memref<4x8x10x128xf32, #tpu.memory_space<vmem>>, vector<1x6x8x128xf32>
      %84 = vector.shape_cast %83 : vector<1x6x8x128xf32> to vector<6x8x128xf32>
      %c0_154 = arith.constant 0 : index
      %c0_155 = arith.constant 0 : index
      %c128_156 = arith.constant 128 : index
      %85 = vector.load %alloca[%c0_154, %c0_155, %c128_156] : memref<6x8x1152xf32, #tpu.memory_space<vmem>>, vector<6x8x128xf32>
      tpu.vector_store %alloca[%c0_154, %c0_155, %c128_156], %84 {strides = array<i32>} : memref<6x8x1152xf32, #tpu.memory_space<vmem>>, vector<6x8x128xf32>,
      %c2_157 = arith.constant 2 : index
      %c0_158 = arith.constant 0 : index
      %c2_159 = arith.constant 2 : index
      %c0_160 = arith.constant 0 : index
      %86 = vector.load %arg8[%c2_157, %c0_158, %c2_159, %c0_160] : memref<4x8x10x128xf32, #tpu.memory_space<vmem>>, vector<1x6x8x128xf32>
      %87 = vector.shape_cast %86 : vector<1x6x8x128xf32> to vector<6x8x128xf32>
      %c0_161 = arith.constant 0 : index
      %c0_162 = arith.constant 0 : index
      %c256_163 = arith.constant 256 : index
      %88 = vector.load %alloca[%c0_161, %c0_162, %c256_163] : memref<6x8x1152xf32, #tpu.memory_space<vmem>>, vector<6x8x128xf32>
      tpu.vector_store %alloca[%c0_161, %c0_162, %c256_163], %87 {strides = array<i32>} : memref<6x8x1152xf32, #tpu.memory_space<vmem>>, vector<6x8x128xf32>,
      %c2_164 = arith.constant 2 : index
      %c1_165 = arith.constant 1 : index
      %c0_166 = arith.constant 0 : index
      %c0_167 = arith.constant 0 : index
      %89 = vector.load %arg8[%c2_164, %c1_165, %c0_166, %c0_167] : memref<4x8x10x128xf32, #tpu.memory_space<vmem>>, vector<1x6x8x128xf32>
      %90 = vector.shape_cast %89 : vector<1x6x8x128xf32> to vector<6x8x128xf32>
      %c0_168 = arith.constant 0 : index
      %c0_169 = arith.constant 0 : index
      %c384_170 = arith.constant 384 : index
      %91 = vector.load %alloca[%c0_168, %c0_169, %c384_170] : memref<6x8x1152xf32, #tpu.memory_space<vmem>>, vector<6x8x128xf32>
      tpu.vector_store %alloca[%c0_168, %c0_169, %c384_170], %90 {strides = array<i32>} : memref<6x8x1152xf32, #tpu.memory_space<vmem>>, vector<6x8x128xf32>,
      %c2_171 = arith.constant 2 : index
      %c1_172 = arith.constant 1 : index
      %c1_173 = arith.constant 1 : index
      %c0_174 = arith.constant 0 : index
      %92 = vector.load %arg8[%c2_171, %c1_172, %c1_173, %c0_174] : memref<4x8x10x128xf32, #tpu.memory_space<vmem>>, vector<1x6x8x128xf32>
      %93 = vector.shape_cast %92 : vector<1x6x8x128xf32> to vector<6x8x128xf32>
      %c0_175 = arith.constant 0 : index
      %c0_176 = arith.constant 0 : index
      %c512_177 = arith.constant 512 : index
      %94 = vector.load %alloca[%c0_175, %c0_176, %c512_177] : memref<6x8x1152xf32, #tpu.memory_space<vmem>>, vector<6x8x128xf32>
      tpu.vector_store %alloca[%c0_175, %c0_176, %c512_177], %93 {strides = array<i32>} : memref<6x8x1152xf32, #tpu.memory_space<vmem>>, vector<6x8x128xf32>,
      %c2_178 = arith.constant 2 : index
      %c1_179 = arith.constant 1 : index
      %c2_180 = arith.constant 2 : index
      %c0_181 = arith.constant 0 : index
      %95 = vector.load %arg8[%c2_178, %c1_179, %c2_180, %c0_181] : memref<4x8x10x128xf32, #tpu.memory_space<vmem>>, vector<1x6x8x128xf32>
      %96 = vector.shape_cast %95 : vector<1x6x8x128xf32> to vector<6x8x128xf32>
      %c0_182 = arith.constant 0 : index
      %c0_183 = arith.constant 0 : index
      %c640_184 = arith.constant 640 : index
      %97 = vector.load %alloca[%c0_182, %c0_183, %c640_184] : memref<6x8x1152xf32, #tpu.memory_space<vmem>>, vector<6x8x128xf32>
      tpu.vector_store %alloca[%c0_182, %c0_183, %c640_184], %96 {strides = array<i32>} : memref<6x8x1152xf32, #tpu.memory_space<vmem>>, vector<6x8x128xf32>,
      %c2_185 = arith.constant 2 : index
      %c2_186 = arith.constant 2 : index
      %c0_187 = arith.constant 0 : index
      %c0_188 = arith.constant 0 : index
      %98 = vector.load %arg8[%c2_185, %c2_186, %c0_187, %c0_188] : memref<4x8x10x128xf32, #tpu.memory_space<vmem>>, vector<1x6x8x128xf32>
      %99 = vector.shape_cast %98 : vector<1x6x8x128xf32> to vector<6x8x128xf32>
      %c0_189 = arith.constant 0 : index
      %c0_190 = arith.constant 0 : index
      %c768_191 = arith.constant 768 : index
      %100 = vector.load %alloca[%c0_189, %c0_190, %c768_191] : memref<6x8x1152xf32, #tpu.memory_space<vmem>>, vector<6x8x128xf32>
      tpu.vector_store %alloca[%c0_189, %c0_190, %c768_191], %99 {strides = array<i32>} : memref<6x8x1152xf32, #tpu.memory_space<vmem>>, vector<6x8x128xf32>,
      %c2_192 = arith.constant 2 : index
      %c2_193 = arith.constant 2 : index
      %c1_194 = arith.constant 1 : index
      %c0_195 = arith.constant 0 : index
      %101 = vector.load %arg8[%c2_192, %c2_193, %c1_194, %c0_195] : memref<4x8x10x128xf32, #tpu.memory_space<vmem>>, vector<1x6x8x128xf32>
      %102 = vector.shape_cast %101 : vector<1x6x8x128xf32> to vector<6x8x128xf32>
      %c0_196 = arith.constant 0 : index
      %c0_197 = arith.constant 0 : index
      %c896_198 = arith.constant 896 : index
      %103 = vector.load %alloca[%c0_196, %c0_197, %c896_198] : memref<6x8x1152xf32, #tpu.memory_space<vmem>>, vector<6x8x128xf32>
      tpu.vector_store %alloca[%c0_196, %c0_197, %c896_198], %102 {strides = array<i32>} : memref<6x8x1152xf32, #tpu.memory_space<vmem>>, vector<6x8x128xf32>,
      %c2_199 = arith.constant 2 : index
      %c2_200 = arith.constant 2 : index
      %c2_201 = arith.constant 2 : index
      %c0_202 = arith.constant 0 : index
      %104 = vector.load %arg8[%c2_199, %c2_200, %c2_201, %c0_202] : memref<4x8x10x128xf32, #tpu.memory_space<vmem>>, vector<1x6x8x128xf32>
      %105 = vector.shape_cast %104 : vector<1x6x8x128xf32> to vector<6x8x128xf32>
      %c0_203 = arith.constant 0 : index
      %c0_204 = arith.constant 0 : index
      %c1024_205 = arith.constant 1024 : index
      %106 = vector.load %alloca[%c0_203, %c0_204, %c1024_205] : memref<6x8x1152xf32, #tpu.memory_space<vmem>>, vector<6x8x128xf32>
      tpu.vector_store %alloca[%c0_203, %c0_204, %c1024_205], %105 {strides = array<i32>} : memref<6x8x1152xf32, #tpu.memory_space<vmem>>, vector<6x8x128xf32>,
      %c0_206 = arith.constant 0 : index
      %c0_207 = arith.constant 0 : index
      %c0_208 = arith.constant 0 : index
      %107 = vector.load %alloca[%c0_206, %c0_207, %c0_208] : memref<6x8x1152xf32, #tpu.memory_space<vmem>>, vector<6x8x1152xf32>
      %108 = vector.shape_cast %107 : vector<6x8x1152xf32> to vector<48x1152xf32>
      %c2_209 = arith.constant 2 : index
      %c0_210 = arith.constant 0 : index
      %c0_211 = arith.constant 0 : index
      %109 = vector.load %arg3[%c2_209, %c0_210, %c0_211] : memref<4x1152x128xf32, #tpu.memory_space<vmem>>, vector<1x1152x128xf32>
      %110 = vector.shape_cast %109 : vector<1x1152x128xf32> to vector<1152x128xf32>
      %cst_212 = arith.constant dense<0.000000e+00> : vector<48x128xf32>
      %111 = tpu.matmul %108, %110, %cst_212 {dimension_numbers = #tpu.dot_dimension_numbers<[1], [0], [0], [1], [0, 0, 1, 1], [], []>} : vector<48x1152xf32>, vector<1152x128xf32>, vector<48x128xf32> -> vector<48x128xf32>
      %112 = arith.addf %79, %111 : vector<48x128xf32>
      %c3 = arith.constant 3 : index
      %c0_213 = arith.constant 0 : index
      %c0_214 = arith.constant 0 : index
      %c0_215 = arith.constant 0 : index
      %113 = vector.load %arg8[%c3, %c0_213, %c0_214, %c0_215] : memref<4x8x10x128xf32, #tpu.memory_space<vmem>>, vector<1x6x8x128xf32>
      %114 = vector.shape_cast %113 : vector<1x6x8x128xf32> to vector<6x8x128xf32>
      %c0_216 = arith.constant 0 : index
      %c0_217 = arith.constant 0 : index
      %c0_218 = arith.constant 0 : index
      %115 = vector.load %alloca[%c0_216, %c0_217, %c0_218] : memref<6x8x1152xf32, #tpu.memory_space<vmem>>, vector<6x8x128xf32>
      tpu.vector_store %alloca[%c0_216, %c0_217, %c0_218], %114 {strides = array<i32>} : memref<6x8x1152xf32, #tpu.memory_space<vmem>>, vector<6x8x128xf32>,
      %c3_219 = arith.constant 3 : index
      %c0_220 = arith.constant 0 : index
      %c1_221 = arith.constant 1 : index
      %c0_222 = arith.constant 0 : index
      %116 = vector.load %arg8[%c3_219, %c0_220, %c1_221, %c0_222] : memref<4x8x10x128xf32, #tpu.memory_space<vmem>>, vector<1x6x8x128xf32>
      %117 = vector.shape_cast %116 : vector<1x6x8x128xf32> to vector<6x8x128xf32>
      %c0_223 = arith.constant 0 : index
      %c0_224 = arith.constant 0 : index
      %c128_225 = arith.constant 128 : index
      %118 = vector.load %alloca[%c0_223, %c0_224, %c128_225] : memref<6x8x1152xf32, #tpu.memory_space<vmem>>, vector<6x8x128xf32>
      tpu.vector_store %alloca[%c0_223, %c0_224, %c128_225], %117 {strides = array<i32>} : memref<6x8x1152xf32, #tpu.memory_space<vmem>>, vector<6x8x128xf32>,
      %c3_226 = arith.constant 3 : index
      %c0_227 = arith.constant 0 : index
      %c2_228 = arith.constant 2 : index
      %c0_229 = arith.constant 0 : index
      %119 = vector.load %arg8[%c3_226, %c0_227, %c2_228, %c0_229] : memref<4x8x10x128xf32, #tpu.memory_space<vmem>>, vector<1x6x8x128xf32>
      %120 = vector.shape_cast %119 : vector<1x6x8x128xf32> to vector<6x8x128xf32>
      %c0_230 = arith.constant 0 : index
      %c0_231 = arith.constant 0 : index
      %c256_232 = arith.constant 256 : index
      %121 = vector.load %alloca[%c0_230, %c0_231, %c256_232] : memref<6x8x1152xf32, #tpu.memory_space<vmem>>, vector<6x8x128xf32>
      tpu.vector_store %alloca[%c0_230, %c0_231, %c256_232], %120 {strides = array<i32>} : memref<6x8x1152xf32, #tpu.memory_space<vmem>>, vector<6x8x128xf32>,
      %c3_233 = arith.constant 3 : index
      %c1_234 = arith.constant 1 : index
      %c0_235 = arith.constant 0 : index
      %c0_236 = arith.constant 0 : index
      %122 = vector.load %arg8[%c3_233, %c1_234, %c0_235, %c0_236] : memref<4x8x10x128xf32, #tpu.memory_space<vmem>>, vector<1x6x8x128xf32>
      %123 = vector.shape_cast %122 : vector<1x6x8x128xf32> to vector<6x8x128xf32>
      %c0_237 = arith.constant 0 : index
      %c0_238 = arith.constant 0 : index
      %c384_239 = arith.constant 384 : index
      %124 = vector.load %alloca[%c0_237, %c0_238, %c384_239] : memref<6x8x1152xf32, #tpu.memory_space<vmem>>, vector<6x8x128xf32>
      tpu.vector_store %alloca[%c0_237, %c0_238, %c384_239], %123 {strides = array<i32>} : memref<6x8x1152xf32, #tpu.memory_space<vmem>>, vector<6x8x128xf32>,
      %c3_240 = arith.constant 3 : index
      %c1_241 = arith.constant 1 : index
      %c1_242 = arith.constant 1 : index
      %c0_243 = arith.constant 0 : index
      %125 = vector.load %arg8[%c3_240, %c1_241, %c1_242, %c0_243] : memref<4x8x10x128xf32, #tpu.memory_space<vmem>>, vector<1x6x8x128xf32>
      %126 = vector.shape_cast %125 : vector<1x6x8x128xf32> to vector<6x8x128xf32>
      %c0_244 = arith.constant 0 : index
      %c0_245 = arith.constant 0 : index
      %c512_246 = arith.constant 512 : index
      %127 = vector.load %alloca[%c0_244, %c0_245, %c512_246] : memref<6x8x1152xf32, #tpu.memory_space<vmem>>, vector<6x8x128xf32>
      tpu.vector_store %alloca[%c0_244, %c0_245, %c512_246], %126 {strides = array<i32>} : memref<6x8x1152xf32, #tpu.memory_space<vmem>>, vector<6x8x128xf32>,
      %c3_247 = arith.constant 3 : index
      %c1_248 = arith.constant 1 : index
      %c2_249 = arith.constant 2 : index
      %c0_250 = arith.constant 0 : index
      %128 = vector.load %arg8[%c3_247, %c1_248, %c2_249, %c0_250] : memref<4x8x10x128xf32, #tpu.memory_space<vmem>>, vector<1x6x8x128xf32>
      %129 = vector.shape_cast %128 : vector<1x6x8x128xf32> to vector<6x8x128xf32>
      %c0_251 = arith.constant 0 : index
      %c0_252 = arith.constant 0 : index
      %c640_253 = arith.constant 640 : index
      %130 = vector.load %alloca[%c0_251, %c0_252, %c640_253] : memref<6x8x1152xf32, #tpu.memory_space<vmem>>, vector<6x8x128xf32>
      tpu.vector_store %alloca[%c0_251, %c0_252, %c640_253], %129 {strides = array<i32>} : memref<6x8x1152xf32, #tpu.memory_space<vmem>>, vector<6x8x128xf32>,
      %c3_254 = arith.constant 3 : index
      %c2_255 = arith.constant 2 : index
      %c0_256 = arith.constant 0 : index
      %c0_257 = arith.constant 0 : index
      %131 = vector.load %arg8[%c3_254, %c2_255, %c0_256, %c0_257] : memref<4x8x10x128xf32, #tpu.memory_space<vmem>>, vector<1x6x8x128xf32>
      %132 = vector.shape_cast %131 : vector<1x6x8x128xf32> to vector<6x8x128xf32>
      %c0_258 = arith.constant 0 : index
      %c0_259 = arith.constant 0 : index
      %c768_260 = arith.constant 768 : index
      %133 = vector.load %alloca[%c0_258, %c0_259, %c768_260] : memref<6x8x1152xf32, #tpu.memory_space<vmem>>, vector<6x8x128xf32>
      tpu.vector_store %alloca[%c0_258, %c0_259, %c768_260], %132 {strides = array<i32>} : memref<6x8x1152xf32, #tpu.memory_space<vmem>>, vector<6x8x128xf32>,
      %c3_261 = arith.constant 3 : index
      %c2_262 = arith.constant 2 : index
      %c1_263 = arith.constant 1 : index
      %c0_264 = arith.constant 0 : index
      %134 = vector.load %arg8[%c3_261, %c2_262, %c1_263, %c0_264] : memref<4x8x10x128xf32, #tpu.memory_space<vmem>>, vector<1x6x8x128xf32>
      %135 = vector.shape_cast %134 : vector<1x6x8x128xf32> to vector<6x8x128xf32>
      %c0_265 = arith.constant 0 : index
      %c0_266 = arith.constant 0 : index
      %c896_267 = arith.constant 896 : index
      %136 = vector.load %alloca[%c0_265, %c0_266, %c896_267] : memref<6x8x1152xf32, #tpu.memory_space<vmem>>, vector<6x8x128xf32>
      tpu.vector_store %alloca[%c0_265, %c0_266, %c896_267], %135 {strides = array<i32>} : memref<6x8x1152xf32, #tpu.memory_space<vmem>>, vector<6x8x128xf32>,
      %c3_268 = arith.constant 3 : index
      %c2_269 = arith.constant 2 : index
      %c2_270 = arith.constant 2 : index
      %c0_271 = arith.constant 0 : index
      %137 = vector.load %arg8[%c3_268, %c2_269, %c2_270, %c0_271] : memref<4x8x10x128xf32, #tpu.memory_space<vmem>>, vector<1x6x8x128xf32>
      %138 = vector.shape_cast %137 : vector<1x6x8x128xf32> to vector<6x8x128xf32>
      %c0_272 = arith.constant 0 : index
      %c0_273 = arith.constant 0 : index
      %c1024_274 = arith.constant 1024 : index
      %139 = vector.load %alloca[%c0_272, %c0_273, %c1024_274] : memref<6x8x1152xf32, #tpu.memory_space<vmem>>, vector<6x8x128xf32>
      tpu.vector_store %alloca[%c0_272, %c0_273, %c1024_274], %138 {strides = array<i32>} : memref<6x8x1152xf32, #tpu.memory_space<vmem>>, vector<6x8x128xf32>,
      %c0_275 = arith.constant 0 : index
      %c0_276 = arith.constant 0 : index
      %c0_277 = arith.constant 0 : index
      %140 = vector.load %alloca[%c0_275, %c0_276, %c0_277] : memref<6x8x1152xf32, #tpu.memory_space<vmem>>, vector<6x8x1152xf32>
      %141 = vector.shape_cast %140 : vector<6x8x1152xf32> to vector<48x1152xf32>
      %c3_278 = arith.constant 3 : index
      %c0_279 = arith.constant 0 : index
      %c0_280 = arith.constant 0 : index
      %142 = vector.load %arg3[%c3_278, %c0_279, %c0_280] : memref<4x1152x128xf32, #tpu.memory_space<vmem>>, vector<1x1152x128xf32>
      %143 = vector.shape_cast %142 : vector<1x1152x128xf32> to vector<1152x128xf32>
      %cst_281 = arith.constant dense<0.000000e+00> : vector<48x128xf32>
      %144 = tpu.matmul %141, %143, %cst_281 {dimension_numbers = #tpu.dot_dimension_numbers<[1], [0], [0], [1], [0, 0, 1, 1], [], []>} : vector<48x1152xf32>, vector<1152x128xf32>, vector<48x128xf32> -> vector<48x128xf32>
      %145 = arith.addf %112, %144 : vector<48x128xf32>
      %c0_282 = arith.constant 0 : index
      %c0_283 = arith.constant 0 : index
      %146 = vector.load %arg4[%c0_282, %c0_283] : memref<1x128xf32, #tpu.memory_space<vmem>>, vector<1x128xf32>
      %147 = vector.broadcast %146 : vector<1x128xf32> to vector<48x128xf32>
      %148 = arith.addf %145, %147 : vector<48x128xf32>
      %cst_284 = arith.constant 0.000000e+00 : f32
      %149 = vector.broadcast %cst_284 : f32 to vector<48x128xf32>
      %150 = arith.cmpf oge, %148, %149 : vector<48x128xf32>
      %cst_285 = arith.constant 2.000000e-01 : f32
      %151 = vector.broadcast %cst_285 : f32 to vector<48x128xf32>
      %152 = arith.mulf %151, %148 : vector<48x128xf32>
      %153 = arith.select %150, %148, %152 : vector<48x128xi1>, vector<48x128xf32>
      %cst_286 = arith.constant 1.41421354 : f32
      %154 = vector.broadcast %cst_286 : f32 to vector<48x128xf32>
      %155 = arith.mulf %153, %154 : vector<48x128xf32>
      %156 = vector.shape_cast %155 : vector<48x128xf32> to vector<6x8x128xf32>
      %c0_287 = arith.constant 0 : index
      %c1_288 = arith.constant 1 : index
      %c0_289 = arith.constant 0 : index
      %157 = vector.load %arg9[%c0_287, %c1_288, %c0_289] : memref<6x10x128xf32, #tpu.memory_space<vmem>>, vector<6x8x128xf32>
      tpu.vector_store %arg9[%c0_287, %c1_288, %c0_289], %156 {strides = array<i32>} : memref<6x10x128xf32, #tpu.memory_space<vmem>>, vector<6x8x128xf32>,
      tpu.yield
    }) : () -> ()
    %cst_9 = arith.constant 0.000000e+00 : f32
    %8 = vector.broadcast %cst_9 : f32 to vector<1x10x128xf32>
    %c0_i32_10 = arith.constant 0 : i32
    %9 = arith.cmpi eq, %arg1, %c0_i32_10 : i32
    %10 = arith.extui %9 : i1 to i32
    %c0_i32_11 = arith.constant 0 : i32
    %11 = arith.cmpi ne, %10, %c0_i32_11 : i32
    scf.if %11 {
      %c0_13 = arith.constant 0 : index
      %c0_14 = arith.constant 0 : index
      %c0_15 = arith.constant 0 : index
      %15 = vector.load %arg9[%c0_13, %c0_14, %c0_15] : memref<6x10x128xf32, #tpu.memory_space<vmem>>, vector<1x10x128xf32>
      tpu.vector_store %arg9[%c0_13, %c0_14, %c0_15], %8 {strides = array<i32>} : memref<6x10x128xf32, #tpu.memory_space<vmem>>, vector<1x10x128xf32>,
    } else {
    }
    %c1_i32 = arith.constant 1 : i32
    %12 = arith.cmpi eq, %arg1, %c1_i32 : i32
    %13 = arith.extui %12 : i1 to i32
    %c0_i32_12 = arith.constant 0 : i32
    %14 = arith.cmpi ne, %13, %c0_i32_12 : i32
    scf.if %14 {
      %c5 = arith.constant 5 : index
      %c0_13 = arith.constant 0 : index
      %c0_14 = arith.constant 0 : index
      %15 = vector.load %arg9[%c5, %c0_13, %c0_14] : memref<6x10x128xf32, #tpu.memory_space<vmem>>, vector<1x10x128xf32>
      tpu.vector_store %arg9[%c5, %c0_13, %c0_14], %8 {strides = array<i32>} : memref<6x10x128xf32, #tpu.memory_space<vmem>>, vector<1x10x128xf32>,
    } else {
    }
    "tpu.region"() ({
      %alloca = memref.alloca() : memref<4x8x1152xf32, #tpu.memory_space<vmem>>
      %c0_13 = arith.constant 0 : index
      %c0_14 = arith.constant 0 : index
      %c0_15 = arith.constant 0 : index
      %15 = vector.load %arg9[%c0_13, %c0_14, %c0_15] : memref<6x10x128xf32, #tpu.memory_space<vmem>>, vector<4x8x128xf32>
      %c0_16 = arith.constant 0 : index
      %c0_17 = arith.constant 0 : index
      %c0_18 = arith.constant 0 : index
      %16 = vector.load %alloca[%c0_16, %c0_17, %c0_18] : memref<4x8x1152xf32, #tpu.memory_space<vmem>>, vector<4x8x128xf32>
      tpu.vector_store %alloca[%c0_16, %c0_17, %c0_18], %15 {strides = array<i32>} : memref<4x8x1152xf32, #tpu.memory_space<vmem>>, vector<4x8x128xf32>,
      %c0_19 = arith.constant 0 : index
      %c1 = arith.constant 1 : index
      %c0_20 = arith.constant 0 : index
      %17 = vector.load %arg9[%c0_19, %c1, %c0_20] : memref<6x10x128xf32, #tpu.memory_space<vmem>>, vector<4x8x128xf32>
      %c0_21 = arith.constant 0 : index
      %c0_22 = arith.constant 0 : index
      %c128 = arith.constant 128 : index
      %18 = vector.load %alloca[%c0_21, %c0_22, %c128] : memref<4x8x1152xf32, #tpu.memory_space<vmem>>, vector<4x8x128xf32>
      tpu.vector_store %alloca[%c0_21, %c0_22, %c128], %17 {strides = array<i32>} : memref<4x8x1152xf32, #tpu.memory_space<vmem>>, vector<4x8x128xf32>,
      %c0_23 = arith.constant 0 : index
      %c2 = arith.constant 2 : index
      %c0_24 = arith.constant 0 : index
      %19 = vector.load %arg9[%c0_23, %c2, %c0_24] : memref<6x10x128xf32, #tpu.memory_space<vmem>>, vector<4x8x128xf32>
      %c0_25 = arith.constant 0 : index
      %c0_26 = arith.constant 0 : index
      %c256 = arith.constant 256 : index
      %20 = vector.load %alloca[%c0_25, %c0_26, %c256] : memref<4x8x1152xf32, #tpu.memory_space<vmem>>, vector<4x8x128xf32>
      tpu.vector_store %alloca[%c0_25, %c0_26, %c256], %19 {strides = array<i32>} : memref<4x8x1152xf32, #tpu.memory_space<vmem>>, vector<4x8x128xf32>,
      %c1_27 = arith.constant 1 : index
      %c0_28 = arith.constant 0 : index
      %c0_29 = arith.constant 0 : index
      %21 = vector.load %arg9[%c1_27, %c0_28, %c0_29] : memref<6x10x128xf32, #tpu.memory_space<vmem>>, vector<4x8x128xf32>
      %c0_30 = arith.constant 0 : index
      %c0_31 = arith.constant 0 : index
      %c384 = arith.constant 384 : index
      %22 = vector.load %alloca[%c0_30, %c0_31, %c384] : memref<4x8x1152xf32, #tpu.memory_space<vmem>>, vector<4x8x128xf32>
      tpu.vector_store %alloca[%c0_30, %c0_31, %c384], %21 {strides = array<i32>} : memref<4x8x1152xf32, #tpu.memory_space<vmem>>, vector<4x8x128xf32>,
      %c1_32 = arith.constant 1 : index
      %c1_33 = arith.constant 1 : index
      %c0_34 = arith.constant 0 : index
      %23 = vector.load %arg9[%c1_32, %c1_33, %c0_34] : memref<6x10x128xf32, #tpu.memory_space<vmem>>, vector<4x8x128xf32>
      %c0_35 = arith.constant 0 : index
      %c0_36 = arith.constant 0 : index
      %c512 = arith.constant 512 : index
      %24 = vector.load %alloca[%c0_35, %c0_36, %c512] : memref<4x8x1152xf32, #tpu.memory_space<vmem>>, vector<4x8x128xf32>
      tpu.vector_store %alloca[%c0_35, %c0_36, %c512], %23 {strides = array<i32>} : memref<4x8x1152xf32, #tpu.memory_space<vmem>>, vector<4x8x128xf32>,
      %c1_37 = arith.constant 1 : index
      %c2_38 = arith.constant 2 : index
      %c0_39 = arith.constant 0 : index
      %25 = vector.load %arg9[%c1_37, %c2_38, %c0_39] : memref<6x10x128xf32, #tpu.memory_space<vmem>>, vector<4x8x128xf32>
      %c0_40 = arith.constant 0 : index
      %c0_41 = arith.constant 0 : index
      %c640 = arith.constant 640 : index
      %26 = vector.load %alloca[%c0_40, %c0_41, %c640] : memref<4x8x1152xf32, #tpu.memory_space<vmem>>, vector<4x8x128xf32>
      tpu.vector_store %alloca[%c0_40, %c0_41, %c640], %25 {strides = array<i32>} : memref<4x8x1152xf32, #tpu.memory_space<vmem>>, vector<4x8x128xf32>,
      %c2_42 = arith.constant 2 : index
      %c0_43 = arith.constant 0 : index
      %c0_44 = arith.constant 0 : index
      %27 = vector.load %arg9[%c2_42, %c0_43, %c0_44] : memref<6x10x128xf32, #tpu.memory_space<vmem>>, vector<4x8x128xf32>
      %c0_45 = arith.constant 0 : index
      %c0_46 = arith.constant 0 : index
      %c768 = arith.constant 768 : index
      %28 = vector.load %alloca[%c0_45, %c0_46, %c768] : memref<4x8x1152xf32, #tpu.memory_space<vmem>>, vector<4x8x128xf32>
      tpu.vector_store %alloca[%c0_45, %c0_46, %c768], %27 {strides = array<i32>} : memref<4x8x1152xf32, #tpu.memory_space<vmem>>, vector<4x8x128xf32>,
      %c2_47 = arith.constant 2 : index
      %c1_48 = arith.constant 1 : index
      %c0_49 = arith.constant 0 : index
      %29 = vector.load %arg9[%c2_47, %c1_48, %c0_49] : memref<6x10x128xf32, #tpu.memory_space<vmem>>, vector<4x8x128xf32>
      %c0_50 = arith.constant 0 : index
      %c0_51 = arith.constant 0 : index
      %c896 = arith.constant 896 : index
      %30 = vector.load %alloca[%c0_50, %c0_51, %c896] : memref<4x8x1152xf32, #tpu.memory_space<vmem>>, vector<4x8x128xf32>
      tpu.vector_store %alloca[%c0_50, %c0_51, %c896], %29 {strides = array<i32>} : memref<4x8x1152xf32, #tpu.memory_space<vmem>>, vector<4x8x128xf32>,
      %c2_52 = arith.constant 2 : index
      %c2_53 = arith.constant 2 : index
      %c0_54 = arith.constant 0 : index
      %31 = vector.load %arg9[%c2_52, %c2_53, %c0_54] : memref<6x10x128xf32, #tpu.memory_space<vmem>>, vector<4x8x128xf32>
      %c0_55 = arith.constant 0 : index
      %c0_56 = arith.constant 0 : index
      %c1024 = arith.constant 1024 : index
      %32 = vector.load %alloca[%c0_55, %c0_56, %c1024] : memref<4x8x1152xf32, #tpu.memory_space<vmem>>, vector<4x8x128xf32>
      tpu.vector_store %alloca[%c0_55, %c0_56, %c1024], %31 {strides = array<i32>} : memref<4x8x1152xf32, #tpu.memory_space<vmem>>, vector<4x8x128xf32>,
      %c0_57 = arith.constant 0 : index
      %c0_58 = arith.constant 0 : index
      %c0_59 = arith.constant 0 : index
      %33 = vector.load %alloca[%c0_57, %c0_58, %c0_59] : memref<4x8x1152xf32, #tpu.memory_space<vmem>>, vector<4x8x1152xf32>
      %34 = vector.shape_cast %33 : vector<4x8x1152xf32> to vector<32x1152xf32>
      %c0_60 = arith.constant 0 : index
      %c0_61 = arith.constant 0 : index
      %35 = vector.load %arg5[%c0_60, %c0_61] : memref<1152x128xf32, #tpu.memory_space<vmem>>, vector<1152x128xf32>
      %cst_62 = arith.constant dense<0.000000e+00> : vector<32x128xf32>
      %36 = tpu.matmul %34, %35, %cst_62 {dimension_numbers = #tpu.dot_dimension_numbers<[1], [0], [0], [1], [0, 0, 1, 1], [], []>} : vector<32x1152xf32>, vector<1152x128xf32>, vector<32x128xf32> -> vector<32x128xf32>
      %c0_63 = arith.constant 0 : index
      %c0_64 = arith.constant 0 : index
      %37 = vector.load %arg6[%c0_63, %c0_64] : memref<1x128xf32, #tpu.memory_space<vmem>>, vector<1x128xf32>
      %38 = vector.broadcast %37 : vector<1x128xf32> to vector<32x128xf32>
      %39 = arith.addf %36, %38 : vector<32x128xf32>
      %cst_65 = arith.constant 0.000000e+00 : f32
      %40 = vector.broadcast %cst_65 : f32 to vector<32x128xf32>
      %41 = arith.cmpf oge, %39, %40 : vector<32x128xf32>
      %cst_66 = arith.constant 2.000000e-01 : f32
      %42 = vector.broadcast %cst_66 : f32 to vector<32x128xf32>
      %43 = arith.mulf %42, %39 : vector<32x128xf32>
      %44 = arith.select %41, %39, %43 : vector<32x128xi1>, vector<32x128xf32>
      %cst_67 = arith.constant 1.41421354 : f32
      %45 = vector.broadcast %cst_67 : f32 to vector<32x128xf32>
      %46 = arith.mulf %44, %45 : vector<32x128xf32>
      %47 = vector.shape_cast %46 : vector<32x128xf32> to vector<4x8x128xf32>
      %c0_68 = arith.constant 0 : index
      %c0_69 = arith.constant 0 : index
      %c0_70 = arith.constant 0 : index
      %c0_71 = arith.constant 0 : index
      %48 = vector.load %arg7[%c0_68, %c0_69, %c0_70, %c0_71] : memref<1x4x8x128xf32, #tpu.memory_space<vmem>>, vector<1x4x8x128xf32>
      %49 = vector.shape_cast %48 : vector<1x4x8x128xf32> to vector<4x8x128xf32>
      %50 = vector.shape_cast %47 : vector<4x8x128xf32> to vector<1x4x8x128xf32>
      tpu.vector_store %arg7[%c0_68, %c0_69, %c0_70, %c0_71], %50 {strides = array<i32>} : memref<1x4x8x128xf32, #tpu.memory_space<vmem>>, vector<1x4x8x128xf32>,
      tpu.yield
    }) : () -> ()
    return
  }
  func.func @transform_1(%arg0: i32, %arg1: i32) -> (i32, i32, i32) {
    %c0_i32 = arith.constant 0 : i32
    %c0_i32_0 = arith.constant 0 : i32
    %c0_i32_1 = arith.constant 0 : i32
    %c0_i32_2 = arith.constant 0 : i32
    return %c0_i32, %c0_i32_0, %c0_i32_1 : i32, i32, i32
  }
  func.func @transform_2(%arg0: i32, %arg1: i32) -> (i32, i32) {
    %c0_i32 = arith.constant 0 : i32
    %c0_i32_0 = arith.constant 0 : i32
    %c0_i32_1 = arith.constant 0 : i32
    return %c0_i32, %c0_i32_0 : i32, i32
  }
  func.func @transform_3(%arg0: i32, %arg1: i32) -> (i32, i32) {
    %c0_i32 = arith.constant 0 : i32
    %c0_i32_0 = arith.constant 0 : i32
    %c0_i32_1 = arith.constant 0 : i32
    return %c0_i32, %c0_i32_0 : i32, i32
  }
  func.func @transform_4(%arg0: i32, %arg1: i32) -> (i32, i32) {
    %c0_i32 = arith.constant 0 : i32
    %c0_i32_0 = arith.constant 0 : i32
    %c0_i32_1 = arith.constant 0 : i32
    return %c0_i32, %c0_i32_0 : i32, i32
  }
  func.func @transform_5(%arg0: i32, %arg1: i32) -> (i32, i32, i32, i32) {
    %c0_i32 = arith.constant 0 : i32
    %c0_i32_0 = arith.constant 0 : i32
    %c0_i32_1 = arith.constant 0 : i32
    return %arg0, %arg1, %c0_i32, %c0_i32_0 : i32, i32, i32, i32
  }
}

</mosaic_0001>

<bundles_post_ra>
// kernel: tpu_custom_call.1
= control target key start
LH: loop header
LB: loop body
LE: loop exit
PB: predicated region body
PF: predicated region fallthrough
CT: control target
= control target key end

     0   :  { %s7697_s0 = inlined_call_operand.hbm [shape: f32[2,4,12,10,128], index: 0, kind: input, shape index: {}]   ;;  %s7698_s1 = inlined_call_operand.hbm [shape: f32[4,1152,128], index: 1, kind: input, shape index: {}]   ;;  %s7699_s2 = inlined_call_operand.hbm [shape: f32[1,128], index: 2, kind: input, shape index: {}]   ;;  %s7700_s3 = inlined_call_operand.hbm [shape: f32[1152,128], index: 3, kind: input, shape index: {}]   ;;  %s7701_s4 = inlined_call_operand.hbm [shape: f32[1,128], index: 4, kind: input, shape index: {}]   ;;  %s7702_s5 = inlined_call_operand.hbm [shape: f32[2,8,8,128], index: 5, kind: output, shape index: {}]  }
   0x1   :  { %7713 = sst [smem:[#allocation30_spill]] %s7699_s2 }
   0x2   :  { %10 = vsyncpa [#allocation6], 0 }
   0x3   :  { %11 = vsyncpa [#allocation9], 0 }
   0x4   :  { %12 = vsyncpa [#allocation12], 0 }
   0x5   :  { %13 = vsyncpa [#allocation7], 0 }
   0x6   :  { %15 = vsyncpa [#allocation7 + $0x1], 0  ;;  %s6932_s18 = smov 0   ;;  %s6934_s19 = smov 0  }
   0x7   :  { %s6936_s20 = smov 0   ;;  %s6938_s21 = smov 0  }
   0x8   :  { %s6940_s22 = smov 0   ;;  %s6942_s23 = smov 0  }
   0x9   :  { %s6944_s24 = smov 0   ;;  %s6946_s25 = smov 0  }
   0xa LB: > { %7714 = sst [smem:[#allocation23_spill]] %s6861_s20  ;;  %s4343_s26 = sadd.s32 4294967295, %s6881_s25   ;;  %s6881_s25 = sphi %s6946_s25, %s21_s25   ;;  %s6877_s24 = sphi %s6944_s24, %s7738_s24   ;;  %s6873_s23 = sphi %s6942_s23, %s7737_s23   ;;  %s6869_s22 = sphi %s6940_s22, %s7736_s22   ;;  %s6865_s21 = sphi %s6938_s21, %s7735_s21   ;;  %s6861_s20 = sphi %s6936_s20, %s7734_s20   ;;  %s6857_s19 = sphi %s6934_s19, %s7740_s19   ;;  %s6853_s18 = sphi %s6932_s18, %s7739_s18  }
   0xb   : > { %7715 = sst [smem:[#allocation24_spill]] %s6873_s23  ;;  %s4344_s27 = sadd.s32 4294967294, %s6881_s25  }
   0xc   : > { %7716 = sst [smem:[#allocation25_spill]] %s6877_s24  ;;  %s30_s28 = sadd.s32 1, %s6873_s23 }
   0xd   : > { %s33_s29 = sadd.s32 1, %s6877_s24  ;;  %p31_p0 = scmp.ge.s32.totalorder %s30_s28, 2 }
   0xe   : > { %s126_s30 = sadd.s32 1, %s6861_s20  ;;  %p136_p1 = scmp.ne.s32.totalorder %s6861_s20, %s6857_s19 }
   0xf   : > { %p137_p2 = scmp.eq.s32.totalorder %s4343_s26, 3  ;;  %s7742_s28 = smov (%p31_p0, %s30_s28), 0 }
  0x10   : > { %7717 = sst [smem:[#allocation26_spill]] %s7742_s28  ;;  %s7744_s29 = smov (!%p31_p0, %s33_s29), %s6877_s24 }
  0x11   : > { %s122_s6 = ssub.s32 %s6873_s23, %s7742_s28  ;;  %p6984_p3 = por %p137_p2, %p136_p1 }
  0x12   : > { %p35_p4 = scmp.ge.s32.totalorder %s7744_s29, 2  ;;  %p142_p5 = scmp.ne.s32.totalorder %s6857_s19, %s6853_s18 }
  0x13   : > { %s7718_s7 = scalar_select %p6984_p3, 1, 0 }
  0x14   : > { %p143_p6 = scmp.eq.s32.totalorder %s4344_s27, 3  ;;  %p4345_p7 = scmp.ge.s32.totalorder %s6881_s25, 1 }
  0x15   : > { %s7746_s29 = smov (%p35_p4, %s7744_s29), 0  ;;  %p150_p9 = scmp.lt.s32.totalorder %s6881_s25, 5 }
  0x16   : > { %7719 = sst [smem:[#allocation27_spill]] %s7746_s29  ;;  %p6993_p8 = por %p143_p6, %p142_p5 }
  0x17   : > { %s121_s9 = ssub.s32 %s6877_s24, %s7746_s29  ;;  %p7000_p10 = pnand %p4345_p7, %p150_p9 }
  0x18   : > { %s7720_s8 = scalar_select %p6993_p8, 1, 0 }
  0x19   : > { %s123_s10 = sor.u32 %s122_s6, %s121_s9  ;;  %p7004_p12 = scmp.eq.s32.totalorder %s4343_s26, 0 }
  0x1a   : > { %7721 = sst [smem:[#allocation28_spill]] %s7720_s8  ;;  %p124_p11 = scmp.eq.s32.totalorder %s123_s10, 0 }
  0x1b   : > { %s7722_s11 = scalar_select %p7000_p10, 1, 0 }
  0x1c   : > { %s7723_s12 = scalar_select %p7004_p12, 1, 0 }
  0x1d   : > { %p6553_p13 = pneg %p7000_p10  ;;  %s6883_s15 = smov [#allocation8]  }
  0x1e   : > { %s7011_s13 = scalar_select %p124_p11, %s6861_s20, %s126_s30  }
  0x1f   : > { %p7015_p0 = pnand %p7004_p12, %p6553_p13  ;;  %s176_s16 = sshll.u32 %s6883_s15, 4  ;;  %s177_s16 = int_to_ptr.vmem [resolvable:$true] %s176_s16 }
  0x20   : > { %7724 = sst [smem:[#allocation29_spill]] %s7011_s13  ;;  %s7726_s2 = sld [smem:[#allocation30_spill]] }
  0x21   : > { %p7027_p2 = pneg %p7015_p0 }
  0x26   : > { %s6661_s26 = scalar_lea.hbm %s7726_s2, 16 }
  0x27   : > { %p6662_p1 = scmp.ne.s32.totalorder %s7726_s2, %s6661_s26  ;;  %p6668_p6 = scmp.lt.u32.totalorder %s6661_s26, %s7726_s2 }
  0x29   : > { %p6664_p4 = pnand %p7027_p2, %p6662_p1 }
  0x2b   : > { %p6665_p5 = pneg %p6664_p4 }
  0x2d   : > { %p6670_p7 = pnand %p6668_p6, %p6665_p5 }
  0x2f   : > { %6673 = shalt.err (!%p6670_p7)
}
  0x30   : > { %s6674_s17 = scalar_lea.vmem %s177_s16, 16  ;;  %s6681_s27 = scalar_lea.vmem %s177_s16, 32 }
  0x31   : > { %p6675_p9 = scmp.ne.s32.totalorder %s177_s16, %s6674_s17  ;;  %p6682_p8 = scmp.lt.s32.totalorder %s177_s16, %s177_s16 }
  0x32   : > { %p6683_p3 = scmp.lt.s32.totalorder %s6681_s27, %s6674_s17 }
  0x33   : > { %p6677_p11 = pnand %p6675_p9, %p7027_p2 }
  0x34   : > { %p6684_p12 = por %p6683_p3, %p6682_p8 }
  0x35   : > { %p6678_p13 = pneg %p6677_p11 }
  0x37   : > { %p6685_p10 = pnand %p6684_p12, %p6678_p13 }
  0x39   : > { %6688 = shalt.err (!%p6685_p10)
}
  0x3a   : > { %6559 = dma.hbm_to_vmem [thread:$0]  (!%p7015_p0), %s7726_s2, 16, %s177_s16, [#allocation9]  }
  0x3b   : > { %s6884_s26 = smov [#allocation5]   ;;  %s6689_s28 = scalar_lea.hbm %s7698_s1, 73728 }
  0x3c   : > { %s162_s10 = sshll.u32 %s6884_s26, 4  ;;  %p6690_p3 = scmp.ne.s32.totalorder %s7698_s1, %s6689_s28  ;;  %s163_s10 = int_to_ptr.vmem [resolvable:$true] %s162_s10 }
  0x3d   : > { %p6696_p12 = scmp.lt.u32.totalorder %s6689_s28, %s7698_s1 }
  0x3e   : > { %p6692_p8 = pnand %p6690_p3, %p7027_p2 }
  0x40   : > { %p6693_p10 = pneg %p6692_p8 }
  0x42   : > { %p6698_p1 = pnand %p6696_p12, %p6693_p10 }
  0x44   : > { %6701 = shalt.err (!%p6698_p1)
}
  0x45   : > { %s6702_s16 = scalar_lea.vmem %s163_s10, 73728  ;;  %p6710_p7 = scmp.lt.s32.totalorder %s163_s10, %s163_s10 }
  0x46   : > { %p6703_p4 = scmp.ne.s32.totalorder %s163_s10, %s6702_s16  ;;  %p6711_p9 = scmp.lt.s32.totalorder %s6702_s16, %s6702_s16 }
  0x48   : > { %p6705_p5 = pnand %p6703_p4, %p7027_p2  ;;  %p6712_p11 = por %p6711_p9, %p6710_p7 }
  0x4a   : > { %p6706_p6 = pneg %p6705_p5 }
  0x4c   : > { %p6713_p13 = pnand %p6712_p11, %p6706_p6 }
  0x4e   : > { %6716 = shalt.err (!%p6713_p13)
}
  0x4f   : > { %s6885_s23 = smov 128   ;;  %s6886_s24 = smov 8  }
  0x50   : > { %6556 = dma.hbm_to_vmem [thread:$0]  (!%p7015_p0), %s7698_s1, 73728, %s163_s10, [#allocation6], %s6885_s23, %s6885_s23, %s6886_s24  }
  0x51   : > { %s6887_s6 = smov [#allocation10]   ;;  %s6888_s26 = smov [#allocation11]  }
  0x52   : > { %s186_s9 = sshll.u32 %s6887_s6, 4  ;;  %s200_s15 = sshll.u32 %s6888_s26, 4  ;;  %s187_s9 = int_to_ptr.vmem [resolvable:$true] %s186_s9  ;;  %s201_s15 = int_to_ptr.vmem [resolvable:$true] %s200_s15 }
  0x53   : > { %s6717_s16 = scalar_lea.hbm %s7700_s3, 18432 }
  0x54   : > { %p6718_p3 = scmp.ne.s32.totalorder %s7700_s3, %s6717_s16  ;;  %p6724_p12 = scmp.lt.u32.totalorder %s6717_s16, %s7700_s3 }
  0x56   : > { %p6720_p8 = pnand %p6718_p3, %p7027_p2 }
  0x58   : > { %p6721_p10 = pneg %p6720_p8 }
  0x5a   : > { %p6726_p1 = pnand %p6724_p12, %p6721_p10 }
  0x5c   : > { %6729 = shalt.err (!%p6726_p1)
}
  0x5d   : > { %s6730_s10 = scalar_lea.vmem %s187_s9, 18432  ;;  %p6738_p7 = scmp.lt.s32.totalorder %s187_s9, %s187_s9 }
  0x5e   : > { %p6731_p4 = scmp.ne.s32.totalorder %s187_s9, %s6730_s10  ;;  %p6739_p9 = scmp.lt.s32.totalorder %s6730_s10, %s6730_s10 }
  0x60   : > { %p6733_p5 = pnand %p6731_p4, %p7027_p2  ;;  %p6740_p11 = por %p6739_p9, %p6738_p7 }
  0x62   : > { %p6734_p6 = pneg %p6733_p5 }
  0x64   : > { %p6741_p13 = pnand %p6740_p11, %p6734_p6 }
  0x66   : > { %6744 = shalt.err (!%p6741_p13)
}
  0x67   : > { %6562 = dma.hbm_to_vmem [thread:$0]  (!%p7015_p0), %s7700_s3, 18432, %s187_s9, [#allocation9], %s6885_s23, %s6885_s23, %s6886_s24  }
  0x68   : > { %s6745_s29 = scalar_lea.hbm %s7701_s4, 16 }
  0x69   : > { %p6746_p3 = scmp.ne.s32.totalorder %s7701_s4, %s6745_s29  ;;  %p6752_p12 = scmp.lt.u32.totalorder %s6745_s29, %s7701_s4 }
  0x6b   : > { %p6748_p8 = pnand %p6746_p3, %p7027_p2 }
  0x6d   : > { %p6749_p10 = pneg %p6748_p8 }
  0x6f   : > { %p6754_p1 = pnand %p6752_p12, %p6749_p10 }
  0x71   : > { %6757 = shalt.err (!%p6754_p1)
}
  0x72   : > { %s6758_s27 = scalar_lea.vmem %s201_s15, 16  ;;  %s6765_s23 = scalar_lea.vmem %s201_s15, 32 }
  0x73   : > { %p6759_p4 = scmp.ne.s32.totalorder %s201_s15, %s6758_s27  ;;  %p6766_p7 = scmp.lt.s32.totalorder %s201_s15, %s201_s15 }
  0x74   : > { %p6767_p9 = scmp.lt.s32.totalorder %s6765_s23, %s6758_s27 }
  0x75   : > { %p6761_p5 = pnand %p6759_p4, %p7027_p2 }
  0x76   : > { %p6768_p11 = por %p6767_p9, %p6766_p7 }
  0x77   : > { %p6762_p6 = pneg %p6761_p5 }
  0x79   : > { %p6769_p13 = pnand %p6768_p11, %p6762_p6 }
  0x7b   : > { %6772 = shalt.err (!%p6769_p13)
}
  0x7c   : > { %6565 = dma.hbm_to_vmem [thread:$0]  (!%p7015_p0), %s7701_s4, 16, %s201_s15, [#allocation12]  }
  0x7d   : > { %p7728_p3 = scmp.ne.s32.totalorder %s7722_s11, 0 }
  0x7f   : > { %213 = sbr.rel (%p7728_p3) target bundleno = 1124 (0x464), region = 36 }
  0x86   : > { %p7729_p8 = scmp.ne.s32.totalorder %s7723_s12, 0 }
  0x88   : > { %6834 = dma.done.wait (%p7729_p8), [#allocation6], 73728  }
  0x89   : > { %6836 = vsyncadd (%p7729_p8), [#allocation6], 4294893568 }
  0x8a   : > { %6838 = dma.done.wait (%p7729_p8), [#allocation9], 18448  }
  0x8b   : > { %6840 = vsyncadd (%p7729_p8), [#allocation9], 4294948848 }
  0x8c   : > { %6842 = dma.done.wait (%p7729_p8), [#allocation12], 16  }
  0x8d   : > { %6844 = vsyncadd (%p7729_p8), [#allocation12], 4294967280  ;;  %s257_s11 = sld [smem:[#allocation0]]   ;;  %s6889_s14 = smov 3072   ;;  %v6897_v0 = vmov 0.0  }
  0x8e   : > { %269 = sst [smem:[#allocation15]] %s6889_s14  ;;  %s6890_s30 = smov 2048  }
  0x8f   : > { %271 = sst [smem:[#allocation15 + $0x1]] %s6890_s30  ;;  %s6891_s15 = smov 8  }
  0x90   : > { %273 = sst [smem:[#allocation15 + $0x2]] %s6891_s15  ;;  %s6892_s16 = smov 256  }
  0x91   : > { %275 = sst [smem:[#allocation15 + $0x3]] %s6892_s16  ;;  %s243_s10 = sand.u32 1, %s6857_s19  }
  0x92   : > { %277 = sst [smem:[#allocation15 + $0x4]] %s6892_s16  ;;  %s6893_s2 = smov 10  }
  0x93   : > { %279 = sst [smem:[#allocation15 + $0x5]] %s6893_s2  ;;  %s4355_s12 = sshll.u32 %s243_s10, 5 }
  0x94   : > { %s4359_s13 = sshll.u32 %s257_s11, 26  ;;  %s4372_s8 = sshll.u32 %s6865_s21, 6 }
  0x95   : > { %s4360_s20 = sadd.s32 134217728, %s4359_s13  ;;  %s249_s29 = smul.u32 768, %s6869_s22 }
  0x96   : > { %s6894_s28 = smov [#allocation2]   ;;  %s6895_s9 = smov [#allocation4]  }
  0x97   : > { %s265_s6 = sshll.u32 %s6894_s28, 4  ;;  %s250_s26 = sadd.s32 %s4372_s8, %s249_s29  ;;  %s266_s6 = int_to_ptr.vmem [resolvable:$true] %s265_s6 }
  0x98   : > { %s4358_s17 = sshll.u32 %s250_s26, 4  ;;  %s6896_s14 = smov [#allocation14]  }
  0x99   : > { %s252_s24 = scalar_lea.hbm %s7697_s0, %s4358_s17  ;;  %s7120_s11 = scalar_lea.vmem [#allocation13], %s4355_s12 }
  0x9a   : > { %281 = dma.general %s252_s24, 5120, %s266_s6, %s6895_s9, %s6896_s14, [#allocation15], %s4360_s20, 0  }
  0x9b   : > { %282 = vst [vmem:[#allocation3] sm:$0x1] %v6897_v0  ;;  %283 = vst [vmem:[#allocation3 + $0x10] sm:$0x1] %v6897_v0 }
  0x9c   : > { %284 = vst [vmem:[#allocation3 + $0x20] sm:$0x1] %v6897_v0  ;;  %285 = vst [vmem:[#allocation3 + $0x30] sm:$0x1] %v6897_v0 }
  0x9d   : > { %286 = vst [vmem:[#allocation3 + $0x40] sm:$0x1] %v6897_v0  ;;  %287 = vst [vmem:[#allocation3 + $0x50] sm:$0x1] %v6897_v0 }
  0x9e   : > { %288 = vst [vmem:[#allocation3 + $0x9] sm:$0x1] %v6897_v0  ;;  %289 = vst [vmem:[#allocation3 + $0x19] sm:$0x1] %v6897_v0 }
  0x9f   : > { %290 = vst [vmem:[#allocation3 + $0x29] sm:$0x1] %v6897_v0  ;;  %291 = vst [vmem:[#allocation3 + $0x39] sm:$0x1] %v6897_v0 }
  0xa0   : > { %292 = vst [vmem:[#allocation3 + $0x49] sm:$0x1] %v6897_v0  ;;  %293 = vst [vmem:[#allocation3 + $0x59] sm:$0x1] %v6897_v0 }
  0xa1   : > { %6845 = dma.done.wait [#allocation4], 5120 }
  0xa2   : > { %6846 = vsyncadd [#allocation4], 4294962176  ;;  %v789_v1 = vld [vmem:[#allocation5 + $0x500] sm:$0xff]  ;;  %v790_v2 = vld [vmem:[#allocation5 + $0x508] sm:$0xff]  ;;  %p4362_p0 = scmp.ne.s32.totalorder %s6865_s21, 0 }
  0xa3   : > { %v821_v3 = vld [vmem:[#allocation5 + $0x600] sm:$0xff]  ;;  %v5659_v4 = vpack.c.bf16 %v790_v2, %v789_v1  ;;  %v822_v5 = vld [vmem:[#allocation5 + $0x608] sm:$0xff]  ;;  %v791_v12 = vld [vmem:[#allocation5 + $0x510] sm:$0xff] }
  0xa4   : > { %v773_v6 = vld [vmem:[#allocation5 + $0x480] sm:$0xff]  ;;  %v774_v7 = vld [vmem:[#allocation5 + $0x488] sm:$0xff]  ;;  %v5691_v8 = vpack.c.bf16 %v822_v5, %v821_v3  ;;  %v792_v14 = vld [vmem:[#allocation5 + $0x518] sm:$0xff] }
  0xa5   : > { %v5661_v9 = vpack.c.bf16 %v774_v7, %v773_v6  ;;  %v805_v10 = vld [vmem:[#allocation5 + $0x580] sm:$0xff]  ;;  %v806_v11 = vld [vmem:[#allocation5 + $0x588] sm:$0xff]  ;;  %5660 = vmatprep.subr.bf16.mxu0 %v5659_v4  ;;  %v823_v15 = vld [vmem:[#allocation5 + $0x610] sm:$0xff]  ;;  %v5663_v17 = vpack.c.bf16 %v792_v14, %v791_v12 }
  0xa6   : > { %v5693_v13 = vpack.c.bf16 %v806_v11, %v805_v10  ;;  %v824_v16 = vld [vmem:[#allocation5 + $0x618] sm:$0xff]  ;;  %5692 = vmatprep.subr.bf16.mxu1 %v5691_v8  ;;  %v775_v19 = vld [vmem:[#allocation5 + $0x490] sm:$0xff]  ;;  %v793_v24 = vld [vmem:[#allocation5 + $0x520] sm:$0xff] }
  0xa7   : > { %5662 = vmatpush3.bf16.msra.mxu0 %v5661_v9  ;;  %v5695_v18 = vpack.c.bf16 %v824_v16, %v823_v15  ;;  %v776_v20 = vld [vmem:[#allocation5 + $0x498] sm:$0xff]  ;;  %v807_v21 = vld [vmem:[#allocation5 + $0x590] sm:$0xff]  ;;  %v794_v25 = vld [vmem:[#allocation5 + $0x528] sm:$0xff] }
  0xa8   : > { %5694 = vmatpush3.bf16.msra.mxu1 %v5693_v13  ;;  %v5665_v22 = vpack.c.bf16 %v776_v20, %v775_v19  ;;  %v808_v23 = vld [vmem:[#allocation5 + $0x598] sm:$0xff]  ;;  %5664 = vmatprep.subr.bf16.mxu0 %v5663_v17  ;;  %v5667_v27 = vpack.c.bf16 %v794_v25, %v793_v24  ;;  %v825_v28 = vld [vmem:[#allocation5 + $0x620] sm:$0xff]  ;;  %v826_v29 = vld [vmem:[#allocation5 + $0x628] sm:$0xff] }
  0xa9   : > { %5696 = vmatprep.subr.bf16.mxu1 %v5695_v18  ;;  %v5697_v26 = vpack.c.bf16 %v808_v23, %v807_v21  ;;  %v777_v30 = vld [vmem:[#allocation5 + $0x4a0] sm:$0xff]  ;;  %v5699_v31 = vpack.c.bf16 %v826_v29, %v825_v28  ;;  %v778_v32 = vld [vmem:[#allocation5 + $0x4a8] sm:$0xff]  ;;  %v795_v36 = vld [vmem:[#allocation5 + $0x530] sm:$0xff] }
  0xaa   : > { %v809_v33 = vld [vmem:[#allocation5 + $0x5a0] sm:$0xff]  ;;  %v810_v34 = vld [vmem:[#allocation5 + $0x5a8] sm:$0xff]  ;;  %v5669_v35 = vpack.c.bf16 %v778_v32, %v777_v30  ;;  %v796_v37 = vld [vmem:[#allocation5 + $0x538] sm:$0xff] }
  0xab   : > { %5666 = vmatpush3.bf16.msra.mxu0 %v5665_v22  ;;  %v827_v38 = vld [vmem:[#allocation5 + $0x630] sm:$0xff]  ;;  %v5701_v39 = vpack.c.bf16 %v810_v34, %v809_v33  ;;  %v5671_v40 = vpack.c.bf16 %v796_v37, %v795_v36  ;;  %v828_v41 = vld [vmem:[#allocation5 + $0x638] sm:$0xff]  ;;  %v797_v47 = vld [vmem:[#allocation5 + $0x540] sm:$0xff] }
  0xac   : > { %5698 = vmatpush3.bf16.msra.mxu1 %v5697_v26  ;;  %5668 = vmatprep.subr.bf16.mxu0 %v5667_v27  ;;  %v779_v42 = vld [vmem:[#allocation5 + $0x4b0] sm:$0xff]  ;;  %v780_v43 = vld [vmem:[#allocation5 + $0x4b8] sm:$0xff]  ;;  %v5703_v44 = vpack.c.bf16 %v828_v41, %v827_v38  ;;  %v798_v48 = vld [vmem:[#allocation5 + $0x548] sm:$0xff] }
  0xad   : > { %5700 = vmatprep.subr.bf16.mxu1 %v5699_v31  ;;  %v811_v45 = vld [vmem:[#allocation5 + $0x5b0] sm:$0xff]  ;;  %v812_v46 = vld [vmem:[#allocation5 + $0x5b8] sm:$0xff]  ;;  %v829_v49 = vld [vmem:[#allocation5 + $0x640] sm:$0xff]  ;;  %v5673_v51 = vpack.c.bf16 %v780_v43, %v779_v42  ;;  %v5675_v53 = vpack.c.bf16 %v798_v48, %v797_v47 }
  0xae   : > { %v830_v50 = vld [vmem:[#allocation5 + $0x648] sm:$0xff]  ;;  %v5705_v52 = vpack.c.bf16 %v812_v46, %v811_v45  ;;  %v781_v54 = vld [vmem:[#allocation5 + $0x4c0] sm:$0xff]  ;;  %v799_v59 = vld [vmem:[#allocation5 + $0x550] sm:$0xff] }
  0xaf   : > { %5670 = vmatpush3.bf16.msra.mxu0 %v5669_v35  ;;  %v782_v55 = vld [vmem:[#allocation5 + $0x4c8] sm:$0xff]  ;;  %v813_v56 = vld [vmem:[#allocation5 + $0x5c0] sm:$0xff]  ;;  %v5707_v57 = vpack.c.bf16 %v830_v50, %v829_v49  ;;  %v800_v60 = vld [vmem:[#allocation5 + $0x558] sm:$0xff] }
  0xb0   : > { %5702 = vmatpush3.bf16.msra.mxu1 %v5701_v39  ;;  %5672 = vmatprep.subr.bf16.mxu0 %v5671_v40  ;;  %v814_v58 = vld [vmem:[#allocation5 + $0x5c8] sm:$0xff]  ;;  %v831_v61 = vld [vmem:[#allocation5 + $0x650] sm:$0xff]  ;;  %v832_v62 = vld [vmem:[#allocation5 + $0x658] sm:$0xff]  ;;  %v5677_v63 = vpack.c.bf16 %v782_v55, %v781_v54  ;;  %v5679_v1 = vpack.c.bf16 %v800_v60, %v799_v59 }
  0xb1   : > { %5704 = vmatprep.subr.bf16.mxu1 %v5703_v44  ;;  %v5709_v0 = vpack.c.bf16 %v814_v58, %v813_v56  ;;  %v783_v2 = vld [vmem:[#allocation5 + $0x4d0] sm:$0xff]  ;;  %v784_v3 = vld [vmem:[#allocation5 + $0x4d8] sm:$0xff]  ;;  %v5711_v5 = vpack.c.bf16 %v832_v62, %v831_v61  ;;  %v801_v7 = vld [vmem:[#allocation5 + $0x560] sm:$0xff] }
  0xb2   : > { %v815_v4 = vld [vmem:[#allocation5 + $0x5d0] sm:$0xff]  ;;  %v816_v6 = vld [vmem:[#allocation5 + $0x5d8] sm:$0xff]  ;;  %v802_v8 = vld [vmem:[#allocation5 + $0x568] sm:$0xff]  ;;  %v5681_v11 = vpack.c.bf16 %v784_v3, %v783_v2 }
  0xb3   : > { %5674 = vmatpush3.bf16.msra.mxu0 %v5673_v51  ;;  %v833_v9 = vld [vmem:[#allocation5 + $0x660] sm:$0xff]  ;;  %v834_v10 = vld [vmem:[#allocation5 + $0x668] sm:$0xff]  ;;  %v5713_v14 = vpack.c.bf16 %v816_v6, %v815_v4  ;;  %v5683_v15 = vpack.c.bf16 %v802_v8, %v801_v7  ;;  %v7122_v18 = vld [vmem:[#allocation2 + $0x90] sm:$0xff] }
  0xb4   : > { %5706 = vmatpush3.bf16.msra.mxu1 %v5705_v52  ;;  %5676 = vmatprep.subr.bf16.mxu0 %v5675_v53  ;;  %v785_v12 = vld [vmem:[#allocation5 + $0x4e0] sm:$0xff]  ;;  %v786_v13 = vld [vmem:[#allocation5 + $0x4e8] sm:$0xff]  ;;  %v5715_v19 = vpack.c.bf16 %v834_v10, %v833_v9  ;;  %v803_v21 = vld [vmem:[#allocation5 + $0x570] sm:$0xff] }
  0xb5   : > { %5708 = vmatprep.subr.bf16.mxu1 %v5707_v57  ;;  %v817_v16 = vld [vmem:[#allocation5 + $0x5e0] sm:$0xff]  ;;  %v818_v20 = vld [vmem:[#allocation5 + $0x5e8] sm:$0xff]  ;;  %v804_v22 = vld [vmem:[#allocation5 + $0x578] sm:$0xff]  ;;  %1076 = vmatprep.mubr.f32.mxu1 %v7122_v18  ;;  %v5685_v25 = vpack.c.bf16 %v786_v13, %v785_v12 }
  0xb6   : > { %v620_v17 = vld [vmem:[#allocation2 + $0x81] sm:$0xff]  ;;  %v835_v23 = vld [vmem:[#allocation5 + $0x670] sm:$0xff]  ;;  %v836_v24 = vld [vmem:[#allocation5 + $0x678] sm:$0xff]  ;;  %v5717_v26 = vpack.c.bf16 %v818_v20, %v817_v16  ;;  %v5687_v27 = vpack.c.bf16 %v804_v22, %v803_v21 }
  0xb7   : > { %5678 = vmatpush3.bf16.msra.mxu0 %v5677_v63  ;;  %981 = vmatprep.mubr.f32.mxu0 %v620_v17  ;;  %v787_v28 = vld [vmem:[#allocation5 + $0x4f0] sm:$0xff]  ;;  %v788_v29 = vld [vmem:[#allocation5 + $0x4f8] sm:$0xff]  ;;  %v5719_v31 = vpack.c.bf16 %v836_v24, %v835_v23  ;;  %v853_v33 = vld [vmem:[#allocation5 + $0x700] sm:$0xff] }
  0xb8   : > { %5710 = vmatpush3.bf16.msra.mxu1 %v5709_v0  ;;  %5680 = vmatprep.subr.bf16.mxu0 %v5679_v1  ;;  %v819_v30 = vld [vmem:[#allocation5 + $0x5f0] sm:$0xff]  ;;  %v820_v32 = vld [vmem:[#allocation5 + $0x5f8] sm:$0xff]  ;;  %v854_v34 = vld [vmem:[#allocation5 + $0x708] sm:$0xff]  ;;  %v5689_v37 = vpack.c.bf16 %v788_v29, %v787_v28 }
  0xb9   : > { %5712 = vmatprep.subr.bf16.mxu1 %v5711_v5  ;;  %v885_v35 = vld [vmem:[#allocation5 + $0x800] sm:$0xff]  ;;  %v886_v36 = vld [vmem:[#allocation5 + $0x808] sm:$0xff]  ;;  %v5721_v38 = vpack.c.bf16 %v820_v32, %v819_v30  ;;  %v5723_v39 = vpack.c.bf16 %v854_v34, %v853_v33  ;;  %v855_v45 = vld [vmem:[#allocation5 + $0x710] sm:$0xff] }
  0xba   : > { %v837_v40 = vld [vmem:[#allocation5 + $0x680] sm:$0xff]  ;;  %v838_v41 = vld [vmem:[#allocation5 + $0x688] sm:$0xff]  ;;  %v5755_v43 = vpack.c.bf16 %v886_v36, %v885_v35  ;;  %v856_v46 = vld [vmem:[#allocation5 + $0x718] sm:$0xff] }
  0xbb   : > { %5682 = vmatpush3.bf16.msra.mxu0 %v5681_v11  ;;  %v869_v42 = vld [vmem:[#allocation5 + $0x780] sm:$0xff]  ;;  %v870_v44 = vld [vmem:[#allocation5 + $0x788] sm:$0xff]  ;;  %v887_v47 = vld [vmem:[#allocation5 + $0x810] sm:$0xff]  ;;  %v5725_v51 = vpack.c.bf16 %v838_v41, %v837_v40  ;;  %v5727_v53 = vpack.c.bf16 %v856_v46, %v855_v45 }
  0xbc   : > { %5714 = vmatpush3.bf16.msra.mxu1 %v5713_v14  ;;  %5684 = vmatprep.subr.bf16.mxu0 %v5683_v15  ;;  %v888_v48 = vld [vmem:[#allocation5 + $0x818] sm:$0xff]  ;;  %v608_v49 = vld [vmem:[#allocation2 + $0x80] sm:$0xff]  ;;  %v5757_v52 = vpack.c.bf16 %v870_v44, %v869_v42  ;;  %v839_v54 = vld [vmem:[#allocation5 + $0x690] sm:$0xff] }
  0xbd   : > { %5716 = vmatprep.subr.bf16.mxu1 %v5715_v19  ;;  %v632_v50 = vld [vmem:[#allocation2 + $0x82] sm:$0xff]  ;;  %v840_v55 = vld [vmem:[#allocation5 + $0x698] sm:$0xff]  ;;  %v871_v56 = vld [vmem:[#allocation5 + $0x790] sm:$0xff]  ;;  %v5759_v57 = vpack.c.bf16 %v888_v48, %v887_v47 }
  0xbe   : > { %v872_v58 = vld [vmem:[#allocation5 + $0x798] sm:$0xff]  ;;  %v857_v59 = vld [vmem:[#allocation5 + $0x720] sm:$0xff]  ;;  %v858_v60 = vld [vmem:[#allocation5 + $0x728] sm:$0xff]  ;;  %v5729_v0 = vpack.c.bf16 %v840_v55, %v839_v54 }
  0xbf   : > { %5686 = vmatpush3.bf16.msra.mxu0 %v5685_v25  ;;  %v889_v61 = vld [vmem:[#allocation5 + $0x820] sm:$0xff]  ;;  %v890_v62 = vld [vmem:[#allocation5 + $0x828] sm:$0xff]  ;;  %v7125_v63 = vld [vmem:[#allocation2 + $0x91] sm:$0xff]  ;;  %v5761_v3 = vpack.c.bf16 %v872_v58, %v871_v56  ;;  %v5731_v4 = vpack.c.bf16 %v858_v60, %v857_v59 }
  0xc0   : > { %5718 = vmatpush3.bf16.msra.mxu1 %v5717_v26  ;;  %5688 = vmatprep.subr.bf16.mxu0 %v5687_v27  ;;  %v841_v1 = vld [vmem:[#allocation5 + $0x6a0] sm:$0xff]  ;;  %v842_v5 = vld [vmem:[#allocation5 + $0x6a8] sm:$0xff]  ;;  %v7129_v7 = vld [vmem:[#allocation2 + $0x92] sm:$0xff]  ;;  %v5763_v8 = vpack.c.bf16 %v890_v62, %v889_v61 }
  0xc1   : > { %5720 = vmatprep.subr.bf16.mxu1 %v5719_v31  ;;  %v7127_v2 = vld [vmem:[#allocation2 + $0xa0] sm:$0xff]  ;;  %v874_v9 = vld [vmem:[#allocation5 + $0x7a8] sm:$0xff]  ;;  %v859_v10 = vld [vmem:[#allocation5 + $0x730] sm:$0xff]  ;;  %v5733_v15 = vpack.c.bf16 %v842_v5, %v841_v1 }
  0xc2   : > { %v873_v6 = vld [vmem:[#allocation5 + $0x7a0] sm:$0xff]  ;;  %v860_v11 = vld [vmem:[#allocation5 + $0x738] sm:$0xff]  ;;  %v891_v12 = vld [vmem:[#allocation5 + $0x830] sm:$0xff] }
  0xc3   : > { %5690 = vmatpush3.bf16.msra.mxu0 %v5689_v37  ;;  %v892_v13 = vld [vmem:[#allocation5 + $0x838] sm:$0xff]  ;;  %v7134_v14 = vld [vmem:[#allocation2 + $0xa1] sm:$0xff]  ;;  %v843_v16 = vld [vmem:[#allocation5 + $0x6b0] sm:$0xff]  ;;  %v5765_v19 = vpack.c.bf16 %v874_v9, %v873_v6  ;;  %v5735_v20 = vpack.c.bf16 %v860_v11, %v859_v10 }
  0xc4   : > { %5722 = vmatpush3.bf16.msra.mxu1 %v5721_v38  ;;  %5724 = vmatprep.subr.bf16.mxu0 %v5723_v39  ;;  %v7137_v17 = vld [vmem:[#allocation2 + $0xb0] sm:$0xff]  ;;  %v844_v21 = vld [vmem:[#allocation5 + $0x6b8] sm:$0xff]  ;;  %v7139_v23 = vld [vmem:[#allocation2 + $0xa2] sm:$0xff] }
  0xc5   : > { %5756 = vmatprep.subr.bf16.mxu1 %v5755_v43  ;;  %v875_v22 = vld [vmem:[#allocation5 + $0x7b0] sm:$0xff]  ;;  %v876_v24 = vld [vmem:[#allocation5 + $0x7b8] sm:$0xff]  ;;  %v861_v25 = vld [vmem:[#allocation5 + $0x740] sm:$0xff]  ;;  %v5737_v30 = vpack.c.bf16 %v844_v21, %v843_v16 }
  0xc6   : > { %982 = vmatmul.mubr.f32.vlgmr.msra.gmra.mrb[0].mxu0 %v608_v49  ;;  %v862_v26 = vld [vmem:[#allocation5 + $0x748] sm:$0xff]  ;;  %v893_v27 = vld [vmem:[#allocation5 + $0x840] sm:$0xff]  ;;  %v7144_v29 = vld [vmem:[#allocation2 + $0xb1] sm:$0xff]  ;;  %v5769_v33 = vpack.c.bf16 %v876_v24, %v875_v22 }
  0xc7   : > { %1077 = vmatmul.mubr.f32.vlgmr.msra.gmra.mrb[0].mxu1 %v632_v50  ;;  %5726 = vmatpush3.bf16.msra.mxu0 %v5725_v51  ;;  %v894_v28 = vld [vmem:[#allocation5 + $0x848] sm:$0xff]  ;;  %v845_v31 = vld [vmem:[#allocation5 + $0x6c0] sm:$0xff]  ;;  %v5739_v34 = vpack.c.bf16 %v862_v26, %v861_v25  ;;  %v7149_v37 = vld [vmem:[#allocation2 + $0xb2] sm:$0xff] }
  0xc8   : > { %5758 = vmatpush3.bf16.msra.mxu1 %v5757_v52  ;;  %5728 = vmatprep.subr.bf16.mxu0 %v5727_v53  ;;  %v7147_v32 = vld [vmem:[#allocation2 + $0xc0] sm:$0xff]  ;;  %v846_v35 = vld [vmem:[#allocation5 + $0x6c8] sm:$0xff]  ;;  %v5771_v38 = vpack.c.bf16 %v894_v28, %v893_v27  ;;  %v863_v40 = vld [vmem:[#allocation5 + $0x750] sm:$0xff] }
  0xc9   : > { %5760 = vmatprep.subr.bf16.mxu1 %v5759_v57  ;;  %986 = vmatprep.mubr.f32.mxu0 %v7125_v63  ;;  %v877_v36 = vld [vmem:[#allocation5 + $0x7c0] sm:$0xff]  ;;  %v878_v39 = vld [vmem:[#allocation5 + $0x7c8] sm:$0xff]  ;;  %v864_v41 = vld [vmem:[#allocation5 + $0x758] sm:$0xff]  ;;  %v5741_v45 = vpack.c.bf16 %v846_v35, %v845_v31 }
  0xca   : > { %1081 = vmatprep.mubr.f32.mxu1 %v7127_v2  ;;  %987 = vmatmul.mubr.f32.gmra.mrb[2].mxu0 %v7122_v18  ;;  %v5767_v18 = vpack.c.bf16 %v892_v13, %v891_v12  ;;  %v895_v42 = vld [vmem:[#allocation5 + $0x850] sm:$0xff]  ;;  %v896_v43 = vld [vmem:[#allocation5 + $0x858] sm:$0xff]  ;;  %v7154_v44 = vld [vmem:[#allocation2 + $0xc1] sm:$0xff]  ;;  %v5773_v48 = vpack.c.bf16 %v878_v39, %v877_v36  ;;  %v5743_v49 = vpack.c.bf16 %v864_v41, %v863_v40 }
  0xcb   : > { %5730 = vmatpush3.bf16.msra.mxu0 %v5729_v0  ;;  %1082 = vmatmul.mubr.f32.gmra.mrb[2].mxu1 %v7129_v7  ;;  %v847_v46 = vld [vmem:[#allocation5 + $0x6d0] sm:$0xff]  ;;  %v848_v50 = vld [vmem:[#allocation5 + $0x6d8] sm:$0xff]  ;;  %v7159_v52 = vld [vmem:[#allocation2 + $0xc2] sm:$0xff]  ;;  %v5775_v53 = vpack.c.bf16 %v896_v43, %v895_v42 }
  0xcc   : > { %5762 = vmatpush3.bf16.msra.mxu1 %v5761_v3  ;;  %5732 = vmatprep.subr.bf16.mxu0 %v5731_v4  ;;  %v7157_v47 = vld [vmem:[#allocation2 + $0xd0] sm:$0xff]  ;;  %v880_v54 = vld [vmem:[#allocation5 + $0x7d8] sm:$0xff]  ;;  %v865_v55 = vld [vmem:[#allocation5 + $0x760] sm:$0xff]  ;;  %v5745_v60 = vpack.c.bf16 %v848_v50, %v847_v46 }
  0xcd   : > { %5764 = vmatprep.subr.bf16.mxu1 %v5763_v8  ;;  %991 = vmatprep.mubr.f32.mxu0 %v7134_v14  ;;  %v879_v51 = vld [vmem:[#allocation5 + $0x7d0] sm:$0xff]  ;;  %v866_v56 = vld [vmem:[#allocation5 + $0x768] sm:$0xff]  ;;  %v897_v57 = vld [vmem:[#allocation5 + $0x860] sm:$0xff] }
  0xce   : > { %1086 = vmatprep.mubr.f32.mxu1 %v7137_v17  ;;  %992 = vmatmul.mubr.f32.gmra.mrb[4].mxu0 %v7127_v2  ;;  %v898_v58 = vld [vmem:[#allocation5 + $0x868] sm:$0xff]  ;;  %v7164_v59 = vld [vmem:[#allocation2 + $0xd1] sm:$0xff]  ;;  %v849_v61 = vld [vmem:[#allocation5 + $0x6e0] sm:$0xff]  ;;  %v5777_v0 = vpack.c.bf16 %v880_v54, %v879_v51  ;;  %v5747_v1 = vpack.c.bf16 %v866_v56, %v865_v55 }
  0xcf   : > { %5734 = vmatpush3.bf16.msra.mxu0 %v5733_v15  ;;  %1087 = vmatmul.mubr.f32.gmra.mrb[4].mxu1 %v7139_v23  ;;  %v7167_v62 = vld [vmem:[#allocation2 + $0xe0] sm:$0xff]  ;;  %v850_v3 = vld [vmem:[#allocation5 + $0x6e8] sm:$0xff]  ;;  %v7169_v5 = vld [vmem:[#allocation2 + $0xd2] sm:$0xff]  ;;  %v5779_v6 = vpack.c.bf16 %v898_v58, %v897_v57 }
  0xd0   : > { %5766 = vmatpush3.bf16.msra.mxu1 %v5765_v19  ;;  %5736 = vmatprep.subr.bf16.mxu0 %v5735_v20  ;;  %v881_v4 = vld [vmem:[#allocation5 + $0x7e0] sm:$0xff]  ;;  %v882_v8 = vld [vmem:[#allocation5 + $0x7e8] sm:$0xff]  ;;  %v867_v9 = vld [vmem:[#allocation5 + $0x770] sm:$0xff]  ;;  %v5749_v13 = vpack.c.bf16 %v850_v3, %v849_v61 }
  0xd1   : > { %5768 = vmatprep.subr.bf16.mxu1 %v5767_v18  ;;  %996 = vmatprep.mubr.f32.mxu0 %v7144_v29  ;;  %v868_v10 = vld [vmem:[#allocation5 + $0x778] sm:$0xff]  ;;  %v899_v11 = vld [vmem:[#allocation5 + $0x870] sm:$0xff]  ;;  %v5781_v15 = vpack.c.bf16 %v882_v8, %v881_v4  ;;  %v901_v24 = vld [vmem:[#allocation5 + $0x880] sm:$0xff] }
  0xd2   : > { %1091 = vmatprep.mubr.f32.mxu1 %v7147_v32  ;;  %997 = vmatmul.mubr.f32.gmra.mrb[6].mxu0 %v7137_v17  ;;  %v900_v12 = vld [vmem:[#allocation5 + $0x878] sm:$0xff]  ;;  %v5751_v16 = vpack.c.bf16 %v868_v10, %v867_v9  ;;  %v851_v19 = vld [vmem:[#allocation5 + $0x6f0] sm:$0xff]  ;;  %v902_v25 = vld [vmem:[#allocation5 + $0x888] sm:$0xff] }
  0xd3   : > { %5738 = vmatpush3.bf16.msra.mxu0 %v5737_v30  ;;  %1092 = vmatmul.mubr.f32.gmra.mrb[6].mxu1 %v7149_v37  ;;  %v852_v20 = vld [vmem:[#allocation5 + $0x6f8] sm:$0xff]  ;;  %v883_v21 = vld [vmem:[#allocation5 + $0x7f0] sm:$0xff]  ;;  %v5783_v22 = vpack.c.bf16 %v900_v12, %v899_v11  ;;  %v479_v26 = vld [vmem:[#allocation5 + $0x80] sm:$0xff]  ;;  %v5787_v31 = vpack.c.bf16 %v902_v25, %v901_v24 }
  0xd4   : > { %5770 = vmatpush3.bf16.msra.mxu1 %v5769_v33  ;;  %5740 = vmatprep.subr.bf16.mxu0 %v5739_v34  ;;  %v884_v18 = vld [vmem:[#allocation5 + $0x7f8] sm:$0xff]  ;;  %v480_v27 = vld [vmem:[#allocation5 + $0x88] sm:$0xff]  ;;  %v5753_v28 = vpack.c.bf16 %v852_v20, %v851_v19  ;;  %v463_v34 = vld [vmem:[#allocation5] sm:$0xff] }
  0xd5   : > { %5772 = vmatprep.subr.bf16.mxu1 %v5771_v38  ;;  %1001 = vmatprep.mubr.f32.mxu0 %v7154_v44  ;;  %v5785_v30 = vpack.c.bf16 %v884_v18, %v883_v21  ;;  %v5819_v33 = vpack.c.bf16 %v480_v27, %v479_v26  ;;  %v464_v35 = vld [vmem:[#allocation5 + $0x8] sm:$0xff]  ;;  %v903_v36 = vld [vmem:[#allocation5 + $0x890] sm:$0xff]  ;;  %v904_v38 = vld [vmem:[#allocation5 + $0x898] sm:$0xff] }
  0xd6   : > { %1096 = vmatprep.mubr.f32.mxu1 %v7157_v47  ;;  %1002 = vmatmul.mubr.f32.gmra.mrb[8].mxu0 %v7147_v32  ;;  %v481_v39 = vld [vmem:[#allocation5 + $0x90] sm:$0xff]  ;;  %v5821_v40 = vpack.c.bf16 %v464_v35, %v463_v34  ;;  %v5791_v41 = vpack.c.bf16 %v904_v38, %v903_v36  ;;  %v905_v46 = vld [vmem:[#allocation5 + $0x8a0] sm:$0xff]  ;;  %v484_v50 = vld [vmem:[#allocation5 + $0xa8] sm:$0xff] }
  0xd7   : > { %5742 = vmatpush3.bf16.msra.mxu0 %v5741_v45  ;;  %1097 = vmatmul.mubr.f32.gmra.mrb[8].mxu1 %v7159_v52  ;;  %v465_v43 = vld [vmem:[#allocation5 + $0x10] sm:$0xff]  ;;  %v466_v45 = vld [vmem:[#allocation5 + $0x18] sm:$0xff]  ;;  %v467_v55 = vld [vmem:[#allocation5 + $0x20] sm:$0xff] }
  0xd8   : > { %5774 = vmatpush3.bf16.msra.mxu1 %v5773_v48  ;;  %5744 = vmatprep.subr.bf16.mxu0 %v5743_v49  ;;  %v906_v48 = vld [vmem:[#allocation5 + $0x8a8] sm:$0xff]  ;;  %v483_v49 = vld [vmem:[#allocation5 + $0xa0] sm:$0xff]  ;;  %v5825_v51 = vpack.c.bf16 %v466_v45, %v465_v43  ;;  %v907_v57 = vld [vmem:[#allocation5 + $0x8b0] sm:$0xff] }
  0xd9   : > { %5776 = vmatprep.subr.bf16.mxu1 %v5775_v53  ;;  %1006 = vmatprep.mubr.f32.mxu0 %v7164_v59  ;;  %v5795_v53 = vpack.c.bf16 %v906_v48, %v905_v46  ;;  %v5827_v54 = vpack.c.bf16 %v484_v50, %v483_v49  ;;  %v468_v56 = vld [vmem:[#allocation5 + $0x28] sm:$0xff]  ;;  %v485_v58 = vld [vmem:[#allocation5 + $0xb0] sm:$0xff]  ;;  %v470_v3 = vld [vmem:[#allocation5 + $0x38] sm:$0xff] }
  0xda   : > { %1101 = vmatprep.mubr.f32.mxu1 %v7167_v62  ;;  %1007 = vmatmul.mubr.f32.gmra.mrb[10].mxu0 %v7157_v47  ;;  %v909_v4 = vld [vmem:[#allocation5 + $0x8c0] sm:$0xff]  ;;  %v488_v8 = vld [vmem:[#allocation5 + $0xc8] sm:$0xff]  ;;  %v473_v21 = vld [vmem:[#allocation5 + $0x50] sm:$0xff] }
  0xdb   : > { %5746 = vmatpush3.bf16.msra.mxu0 %v5745_v60  ;;  %1102 = vmatmul.mubr.f32.gmra.mrb[10].mxu1 %v7169_v5  ;;  %v486_v60 = vld [vmem:[#allocation5 + $0xb8] sm:$0xff]  ;;  %v471_v11 = vld [vmem:[#allocation5 + $0x40] sm:$0xff]  ;;  %v472_v12 = vld [vmem:[#allocation5 + $0x48] sm:$0xff] }
  0xdc   : > { %5778 = vmatpush3.bf16.msra.mxu1 %v5777_v0  ;;  %5748 = vmatprep.subr.bf16.mxu0 %v5747_v1  ;;  %v5831_v0 = vpack.c.bf16 %v486_v60, %v485_v58  ;;  %v469_v1 = vld [vmem:[#allocation5 + $0x30] sm:$0xff]  ;;  %v5837_v19 = vpack.c.bf16 %v472_v12, %v471_v11  ;;  %v7192_v20 = vld [vmem:[#allocation2 + $0xe2] sm:$0xff]  ;;  %v474_v18 = vld [vmem:[#allocation5 + $0x58] sm:$0xff] }
  0xdd   : > { %5780 = vmatprep.subr.bf16.mxu1 %v5779_v6  ;;  %1171 = vmatprep.mubr.f32.mxu0 %v7129_v7  ;;  %v482_v7 = vld [vmem:[#allocation5 + $0x98] sm:$0xff]  ;;  %v487_v6 = vld [vmem:[#allocation5 + $0xc0] sm:$0xff]  ;;  %v914_v25 = vld [vmem:[#allocation5 + $0x8e8] sm:$0xff] }
  0xde   : > { %1266 = vmatprep.mubr.f32.mxu1 %v7134_v14  ;;  %v5823_v42 = vpack.c.bf16 %v482_v7, %v481_v39  ;;  %v5835_v10 = vpack.c.bf16 %v488_v8, %v487_v6  ;;  %v913_v24 = vld [vmem:[#allocation5 + $0x8e0] sm:$0xff]  ;;  %v699_v27 = vld [vmem:[#allocation2 + $0xf1] sm:$0xff]  ;;  %v476_v35 = vld [vmem:[#allocation5 + $0x68] sm:$0xff] }
  0xdf   : > { %5750 = vmatpush3.bf16.msra.mxu0 %v5749_v13  ;;  %v911_v13 = vld [vmem:[#allocation5 + $0x8d0] sm:$0xff]  ;;  %v491_v26 = vld [vmem:[#allocation5 + $0xe0] sm:$0xff]  ;;  %v494_v39 = vld [vmem:[#allocation5 + $0xf8] sm:$0xff] }
  0xe0   : > { %5782 = vmatpush3.bf16.msra.mxu1 %v5781_v15  ;;  %5752 = vmatprep.subr.bf16.mxu0 %v5751_v16  ;;  %v489_v15 = vld [vmem:[#allocation5 + $0xd0] sm:$0xff]  ;;  %v490_v16 = vld [vmem:[#allocation5 + $0xd8] sm:$0xff]  ;;  %v311_v7 = vld [vmem:[#allocation2 + $0x1] sm:$0xff] }
  0xe1   : > { %5784 = vmatprep.subr.bf16.mxu1 %v5783_v22  ;;  %v915_v36 = vld [vmem:[#allocation5 + $0x8f0] sm:$0xff]  ;;  %v478_v43 = vld [vmem:[#allocation5 + $0x78] sm:$0xff]  ;;  %v511_v45 = vld [vmem:[#allocation5 + $0x180] sm:$0xff] }
  0xe2   : > { %v493_v38 = vld [vmem:[#allocation5 + $0xf0] sm:$0xff]  ;;  %v512_v46 = vld [vmem:[#allocation5 + $0x188] sm:$0xff]  ;;  %v543_v48 = vld [vmem:[#allocation5 + $0x280] sm:$0xff] }
  0xe3   : > { %5754 = vmatpush3.bf16.msra.mxu0 %v5753_v28  ;;  %v5841_v28 = vpack.c.bf16 %v474_v18, %v473_v21  ;;  %v544_v49 = vld [vmem:[#allocation5 + $0x288] sm:$0xff]  ;;  %v514_v58 = vld [vmem:[#allocation5 + $0x198] sm:$0xff]  ;;  %v545_v60 = vld [vmem:[#allocation5 + $0x290] sm:$0xff] }
  0xe4   : > { %5786 = vmatpush3.bf16.msra.mxu1 %v5785_v30  ;;  %5788 = vmatprep.subr.bf16.mxu0 %v5787_v31  ;;  %v687_v30 = vld [vmem:[#allocation2 + $0xf0] sm:$0xff]  ;;  %v547_v11 = vld [vmem:[#allocation5 + $0x2a0] sm:$0xff]  ;;  %v548_v12 = vld [vmem:[#allocation5 + $0x2a8] sm:$0xff] }
  0xe5   : > { %5820 = vmatprep.subr.bf16.mxu1 %v5819_v33  ;;  %v475_v33 = vld [vmem:[#allocation5 + $0x60] sm:$0xff]  ;;  %v529_v8 = vld [vmem:[#allocation5 + $0x210] sm:$0xff] }
  0xe6   : > { %1172 = vmatmul.mubr.f32.vlgmr.msra.gmra.mrb[12].mxu0 %v7125_v63  ;;  %v908_v63 = vld [vmem:[#allocation5 + $0x8b8] sm:$0xff]  ;;  %v517_v18 = vld [vmem:[#allocation5 + $0x1b0] sm:$0xff] }
  0xe7   : > { %1267 = vmatmul.mubr.f32.vlgmr.msra.gmra.mrb[12].mxu1 %v7127_v2  ;;  %5790 = vmatpush3.bf16.msra.mxu0 %v5787_v31  ;;  %v5829_v2 = vpack.c.bf16 %v468_v56, %v467_v55  ;;  %v5799_v61 = vpack.c.bf16 %v908_v63, %v907_v57  ;;  %v5811_v31 = vpack.c.bf16 %v914_v25, %v913_v24  ;;  %v527_v56 = vld [vmem:[#allocation5 + $0x200] sm:$0xff]  ;;  %v528_v57 = vld [vmem:[#allocation5 + $0x208] sm:$0xff]  ;;  %v513_v63 = vld [vmem:[#allocation5 + $0x190] sm:$0xff] }
  0xe8   : > { %5822 = vmatpush3.bf16.msra.mxu1 %v5821_v40  ;;  %1176 = vmatprep.mubr.f32.mxu0 %v7139_v23  ;;  %v5883_v55 = vpack.c.bf16 %v544_v49, %v543_v48  ;;  %v518_v24 = vld [vmem:[#allocation5 + $0x1b8] sm:$0xff]  ;;  %v549_v25 = vld [vmem:[#allocation5 + $0x2b0] sm:$0xff]  ;;  %v535_v49 = vld [vmem:[#allocation5 + $0x240] sm:$0xff] }
  0xe9   : > { %5792 = vmatprep.subr.bf16.mxu0 %v5791_v41  ;;  %5824 = vmatprep.subr.bf16.mxu1 %v5823_v42  ;;  %v5847_v42 = vpack.c.bf16 %v494_v39, %v493_v38  ;;  %v520_v38 = vld [vmem:[#allocation5 + $0x1c8] sm:$0xff]  ;;  %v551_v39 = vld [vmem:[#allocation5 + $0x2c0] sm:$0xff] }
  0xea   : > { %1177 = vmatmul.mubr.f32.gmra.mrb[14].mxu0 %v7134_v14  ;;  %1271 = vmatprep.mubr.f32.mxu1 %v7144_v29  ;;  %v910_v14 = vld [vmem:[#allocation5 + $0x8c8] sm:$0xff] }
  0xeb   : > { %5794 = vmatpush3.bf16.msra.mxu0 %v5791_v41  ;;  %1272 = vmatmul.mubr.f32.gmra.mrb[14].mxu1 %v7137_v17  ;;  %v5833_v17 = vpack.c.bf16 %v470_v3, %v469_v1  ;;  %v5803_v9 = vpack.c.bf16 %v910_v14, %v909_v4  ;;  %v477_v41 = vld [vmem:[#allocation5 + $0x70] sm:$0xff]  ;;  %v5885_v1 = vpack.c.bf16 %v528_v57, %v527_v56  ;;  %v498_v4 = vld [vmem:[#allocation5 + $0x118] sm:$0xff] }
  0xec   : > { %5826 = vmatpush3.bf16.msra.mxu1 %v5825_v51  ;;  %1181 = vmatprep.mubr.f32.mxu0 %v7149_v37  ;;  %v5849_v50 = vpack.c.bf16 %v478_v43, %v477_v41  ;;  %v5851_v51 = vpack.c.bf16 %v512_v46, %v511_v45  ;;  %v497_v3 = vld [vmem:[#allocation5 + $0x110] sm:$0xff]  ;;  %v5855_v14 = vpack.c.bf16 %v514_v58, %v513_v63  ;;  %v7218_v41 = vld [vmem:[#allocation2 + $0x41] sm:$0xff] }
  0xed   : > { %5796 = vmatprep.subr.bf16.mxu0 %v5795_v53  ;;  %5828 = vmatprep.subr.bf16.mxu1 %v5827_v54  ;;  %v496_v54 = vld [vmem:[#allocation5 + $0x108] sm:$0xff]  ;;  %v503_v43 = vld [vmem:[#allocation5 + $0x140] sm:$0xff]  ;;  %v7224_v57 = vld [vmem:[#allocation2 + $0x51] sm:$0xff] }
  0xee   : > { %1182 = vmatmul.mubr.f32.gmra.mrb[16].mxu0 %v7144_v29  ;;  %1276 = vmatprep.mubr.f32.mxu1 %v7154_v44  ;;  %v912_v29 = vld [vmem:[#allocation5 + $0x8d8] sm:$0xff]  ;;  %v504_v45 = vld [vmem:[#allocation5 + $0x148] sm:$0xff] }
  0xef   : > { %5798 = vmatpush3.bf16.msra.mxu0 %v5795_v53  ;;  %1277 = vmatmul.mubr.f32.gmra.mrb[16].mxu1 %v7147_v32  ;;  %v698_v32 = vld [vmem:[#allocation2 + $0xe1] sm:$0xff]  ;;  %v5807_v22 = vpack.c.bf16 %v912_v29, %v911_v13  ;;  %v7201_v13 = vld [vmem:[#allocation2 + $0x10] sm:$0xff]  ;;  %v5857_v29 = vpack.c.bf16 %v498_v4, %v497_v3  ;;  %v5869_v56 = vpack.c.bf16 %v504_v45, %v503_v43 }
  0xf0   : > { %5830 = vmatpush3.bf16.msra.mxu1 %v5829_v2  ;;  %1186 = vmatprep.mubr.f32.mxu0 %v7159_v52  ;;  %v495_v53 = vld [vmem:[#allocation5 + $0x100] sm:$0xff]  ;;  %v546_v2 = vld [vmem:[#allocation5 + $0x298] sm:$0xff]  ;;  %v524_v4 = vld [vmem:[#allocation5 + $0x1e8] sm:$0xff] }
  0xf1   : > { %5800 = vmatprep.subr.bf16.mxu0 %v5799_v61  ;;  %5832 = vmatprep.subr.bf16.mxu1 %v5831_v0  ;;  %v7198_v0 = vld [vmem:[#allocation2 + $0x11] sm:$0xff]  ;;  %v5887_v6 = vpack.c.bf16 %v546_v2, %v545_v60  ;;  %v523_v3 = vld [vmem:[#allocation5 + $0x1e0] sm:$0xff]  ;;  %v2034_v43 = vld [vmem:[#allocation5 + $0x908] sm:$0xff] }
  0xf2   : > { %1187 = vmatmul.mubr.f32.gmra.mrb[18].mxu0 %v7154_v44  ;;  %1281 = vmatprep.mubr.f32.mxu1 %v7164_v59  ;;  %v5839_v44 = vpack.c.bf16 %v490_v16, %v489_v15  ;;  %v7204_v15 = vld [vmem:[#allocation2 + $0x21] sm:$0xff]  ;;  %v711_v63 = vld [vmem:[#allocation2 + $0xf2] sm:$0xff] }
  0xf3   : > { %5802 = vmatpush3.bf16.msra.mxu0 %v5799_v61  ;;  %1282 = vmatmul.mubr.f32.gmra.mrb[18].mxu1 %v7157_v47  ;;  %v492_v47 = vld [vmem:[#allocation5 + $0xe8] sm:$0xff]  ;;  %v299_v61 = vld [vmem:[#allocation2] sm:$0xff]  ;;  %v505_v60 = vld [vmem:[#allocation5 + $0x150] sm:$0xff] }
  0xf4   : > { %5834 = vmatpush3.bf16.msra.mxu1 %v5833_v17  ;;  %1191 = vmatprep.mubr.f32.mxu0 %v7169_v5  ;;  %v5843_v34 = vpack.c.bf16 %v492_v47, %v491_v26  ;;  %v530_v17 = vld [vmem:[#allocation5 + $0x218] sm:$0xff]  ;;  %v7208_v47 = vld [vmem:[#allocation2 + $0x20] sm:$0xff]  ;;  %v577_v45 = vld [vmem:[#allocation5 + $0x390] sm:$0xff] }
  0xf5   : > { %5804 = vmatprep.subr.bf16.mxu0 %v5803_v9  ;;  %5836 = vmatprep.subr.bf16.mxu1 %v5835_v10  ;;  %v516_v10 = vld [vmem:[#allocation5 + $0x1a8] sm:$0xff]  ;;  %v5889_v16 = vpack.c.bf16 %v530_v17, %v529_v8  ;;  %v550_v26 = vld [vmem:[#allocation5 + $0x2b8] sm:$0xff]  ;;  %v7228_v8 = vld [vmem:[#allocation2 + $0x50] sm:$0xff] }
  0xf6   : > { %1192 = vmatmul.mubr.f32.gmra.mrb[20].mxu0 %v7164_v59  ;;  %1286 = vmatprep.mubr.f32.mxu1 %v698_v32  ;;  %v916_v59 = vld [vmem:[#allocation5 + $0x8f8] sm:$0xff] }
  0xf7   : > { %5806 = vmatpush3.bf16.msra.mxu0 %v5803_v9  ;;  %1287 = vmatmul.mubr.f32.gmra.mrb[20].mxu1 %v7167_v62  ;;  %v5845_v62 = vpack.c.bf16 %v476_v35, %v475_v33  ;;  %v5815_v40 = vpack.c.bf16 %v916_v59, %v915_v36  ;;  %v515_v9 = vld [vmem:[#allocation5 + $0x1a0] sm:$0xff]  ;;  %v502_v33 = vld [vmem:[#allocation5 + $0x138] sm:$0xff]  ;;  %v5895_v35 = vpack.c.bf16 %v550_v26, %v549_v25  ;;  %v533_v36 = vld [vmem:[#allocation5 + $0x230] sm:$0xff] }
  0xf8   : > { %5838 = vmatpush3.bf16.msra.mxu1 %v5837_v19  ;;  %1196 = vmatprep.mubr.f32.mxu0 %v7192_v20  ;;  %v500_v19 = vld [vmem:[#allocation5 + $0x128] sm:$0xff]  ;;  %v5859_v21 = vpack.c.bf16 %v516_v10, %v515_v9  ;;  %v519_v59 = vld [vmem:[#allocation5 + $0x1c0] sm:$0xff]  ;;  %v506_v2 = vld [vmem:[#allocation5 + $0x158] sm:$0xff]  ;;  %v5875_v10 = vpack.c.bf16 %v524_v4, %v523_v3 }
  0xf9   : > { %5808 = vmatprep.subr.bf16.mxu0 %v5807_v22  ;;  %5840 = vmatprep.subr.bf16.mxu1 %v5839_v44  ;;  %v532_v44 = vld [vmem:[#allocation5 + $0x228] sm:$0xff]  ;;  %v5867_v46 = vpack.c.bf16 %v520_v38, %v519_v59  ;;  %v5873_v17 = vpack.c.bf16 %v506_v2, %v505_v60  ;;  %v509_v26 = vld [vmem:[#allocation5 + $0x170] sm:$0xff] }
  0xfa   : > { %1197 = vmatmul.mubr.f32.gmra.mrb[22].mxu0 %v698_v32  ;;  %1291 = vmatprep.mubr.f32.mxu1 %v699_v27  ;;  %v499_v32 = vld [vmem:[#allocation5 + $0x120] sm:$0xff]  ;;  %v2054_v3 = vld [vmem:[#allocation5 + $0x9a8] sm:$0xff] }
  0xfb   : > { %5810 = vmatpush3.bf16.msra.mxu0 %v5807_v22  ;;  %1292 = vmatmul.mubr.f32.gmra.mrb[22].mxu1 %v687_v30  ;;  %v531_v22 = vld [vmem:[#allocation5 + $0x220] sm:$0xff]  ;;  %v5861_v27 = vpack.c.bf16 %v500_v19, %v499_v32  ;;  %v540_v32 = vld [vmem:[#allocation5 + $0x268] sm:$0xff]  ;;  %v525_v19 = vld [vmem:[#allocation5 + $0x1f0] sm:$0xff] }
  0xfc   : > { %5842 = vmatpush3.bf16.msra.mxu1 %v5841_v28  ;;  %5812 = vmatprep.subr.bf16.mxu0 %v5811_v31  ;;  %v7211_v28 = vld [vmem:[#allocation2 + $0x31] sm:$0xff]  ;;  %v5893_v30 = vpack.c.bf16 %v532_v44, %v531_v22  ;;  %v7236_v60 = vld [vmem:[#allocation2 + $0x22] sm:$0xff] }
  0xfd   : > { %5844 = vmatprep.subr.bf16.mxu1 %v5843_v34  ;;  %1456 = vmatprep.mubr.f32.mxu1 %v311_v7  ;;  %v5863_v34 = vpack.c.bf16 %v518_v24, %v517_v18  ;;  %v552_v7 = vld [vmem:[#allocation5 + $0x2c8] sm:$0xff]  ;;  %v558_v22 = vld [vmem:[#allocation5 + $0x2f8] sm:$0xff] }
  0xfe   : > { %5489 = vmatprep.mubr.f32.mxu0 %v7139_v23  ;;  %v5853_v23 = vpack.c.bf16 %v496_v54, %v495_v53  ;;  %v5899_v48 = vpack.c.bf16 %v552_v7, %v551_v39  ;;  %v553_v53 = vld [vmem:[#allocation5 + $0x2d0] sm:$0xff]  ;;  %v554_v54 = vld [vmem:[#allocation5 + $0x2d8] sm:$0xff]  ;;  %v559_v39 = vld [vmem:[#allocation5 + $0x300] sm:$0xff] }
  0xff   : > { %5814 = vmatpush3.bf16.msra.mxu0 %v5811_v31  ;;  %v501_v31 = vld [vmem:[#allocation5 + $0x130] sm:$0xff]  ;;  %v560_v7 = vld [vmem:[#allocation5 + $0x308] sm:$0xff] }
 0x100   : > { %5846 = vmatpush3.bf16.msra.mxu1 %v5845_v62  ;;  %5816 = vmatprep.subr.bf16.mxu0 %v5815_v40  ;;  %v7215_v62 = vld [vmem:[#allocation2 + $0x30] sm:$0xff] }
 0x101   : > { %5848 = vmatprep.subr.bf16.mxu1 %v5847_v42  ;;  %v7232_v44 = vld [vmem:[#allocation2 + $0x12] sm:$0xff] }
 0x103   : > { %5818 = vmatpush3.bf16.msra.mxu0 %v5815_v40  ;;  %v5865_v40 = vpack.c.bf16 %v502_v33, %v501_v31  ;;  %v542_v33 = vld [vmem:[#allocation5 + $0x278] sm:$0xff] }
 0x104   : > { %5850 = vmatpush3.bf16.msra.mxu1 %v5849_v50  ;;  %5852 = vmatprep.subr.bf16.mxu0 %v5851_v51  ;;  %v521_v50 = vld [vmem:[#allocation5 + $0x1d0] sm:$0xff]  ;;  %v522_v51 = vld [vmem:[#allocation5 + $0x1d8] sm:$0xff] }
 0x105   : > { %5884 = vmatprep.subr.bf16.mxu1 %v5883_v55  ;;  %v7222_v55 = vld [vmem:[#allocation2 + $0x40] sm:$0xff] }
 0x106   : > { %5490 = vmatmul.mubr.f32.vlgmr.msra.gmra.mrb[24].mxu0 %v7149_v37  ;;  %v5891_v37 = vpack.c.bf16 %v548_v12, %v547_v11  ;;  %v507_v11 = vld [vmem:[#allocation5 + $0x160] sm:$0xff]  ;;  %v508_v12 = vld [vmem:[#allocation5 + $0x168] sm:$0xff] }
 0x107   : > { %1457 = vmatmul.mubr.f32.vlgmr.msra.gmra.mrb[24].mxu1 %v299_v61  ;;  %5854 = vmatpush3.bf16.msra.mxu0 %v5853_v23  ;;  %v537_v61 = vld [vmem:[#allocation5 + $0x250] sm:$0xff]  ;;  %v5871_v23 = vpack.c.bf16 %v522_v51, %v521_v50  ;;  %v5877_v18 = vpack.c.bf16 %v508_v12, %v507_v11  ;;  %v2052_v50 = vld [vmem:[#allocation5 + $0x998] sm:$0xff] }
 0x108   : > { %1461 = vmatprep.mubr.f32.mxu1 %v7198_v0  ;;  %5886 = vmatpush3.bf16.msra.mxu1 %v5885_v1  ;;  %v538_v1 = vld [vmem:[#allocation5 + $0x258] sm:$0xff]  ;;  %v581_v12 = vld [vmem:[#allocation5 + $0x3b0] sm:$0xff] }
 0x109   : > { %5856 = vmatprep.subr.bf16.mxu0 %v5855_v14  ;;  %5888 = vmatprep.subr.bf16.mxu1 %v5887_v6  ;;  %v555_v14 = vld [vmem:[#allocation5 + $0x2e0] sm:$0xff]  ;;  %v556_v6 = vld [vmem:[#allocation5 + $0x2e8] sm:$0xff]  ;;  %v5905_v9 = vpack.c.bf16 %v538_v1, %v537_v61  ;;  %v7242_v11 = vld [vmem:[#allocation2 + $0x32] sm:$0xff] }
 0x10a   : > { %5492 = vmatprep.mubr.f32.mxu0 %v7159_v52  ;;  %v534_v52 = vld [vmem:[#allocation5 + $0x238] sm:$0xff]  ;;  %v579_v61 = vld [vmem:[#allocation5 + $0x3a0] sm:$0xff] }
 0x10b   : > { %1462 = vmatmul.mubr.f32.gmra.mrb[26].mxu1 %v7201_v13  ;;  %5858 = vmatpush3.bf16.msra.mxu0 %v5857_v29  ;;  %v5897_v42 = vpack.c.bf16 %v534_v52, %v533_v36  ;;  %v539_v29 = vld [vmem:[#allocation5 + $0x260] sm:$0xff]  ;;  %v2050_v36 = vld [vmem:[#allocation5 + $0x988] sm:$0xff] }
 0x10c   : > { %1466 = vmatprep.mubr.f32.mxu1 %v7204_v15  ;;  %5890 = vmatpush3.bf16.msra.mxu1 %v5889_v16  ;;  %v5907_v16 = vpack.c.bf16 %v556_v6, %v555_v14  ;;  %v5909_v24 = vpack.c.bf16 %v540_v32, %v539_v29  ;;  %v2053_v1 = vld [vmem:[#allocation5 + $0x9a0] sm:$0xff]  ;;  %v564_v6 = vld [vmem:[#allocation5 + $0x328] sm:$0xff]  ;;  %v582_v29 = vld [vmem:[#allocation5 + $0x3b8] sm:$0xff] }
 0x10d   : > { %5860 = vmatprep.subr.bf16.mxu0 %v5859_v21  ;;  %5892 = vmatprep.subr.bf16.mxu1 %v5891_v37  ;;  %v526_v21 = vld [vmem:[#allocation5 + $0x1f8] sm:$0xff]  ;;  %v557_v37 = vld [vmem:[#allocation5 + $0x2f0] sm:$0xff]  ;;  %v563_v14 = vld [vmem:[#allocation5 + $0x320] sm:$0xff] }
 0x10e   : > { %5493 = vmatmul.mubr.f32.gmra.mrb[26].mxu0 %v7169_v5  ;;  %v536_v5 = vld [vmem:[#allocation5 + $0x248] sm:$0xff]  ;;  %v5879_v25 = vpack.c.bf16 %v526_v21, %v525_v19  ;;  %v5911_v31 = vpack.c.bf16 %v558_v22, %v557_v37  ;;  %v2055_v32 = vld [vmem:[#allocation5 + $0x9b0] sm:$0xff]  ;;  %v2056_v19 = vld [vmem:[#allocation5 + $0x9b8] sm:$0xff] }
 0x10f   : > { %1467 = vmatmul.mubr.f32.gmra.mrb[28].mxu1 %v7208_v47  ;;  %5862 = vmatpush3.bf16.msra.mxu0 %v5861_v27  ;;  %v5901_v58 = vpack.c.bf16 %v536_v5, %v535_v49  ;;  %v510_v27 = vld [vmem:[#allocation5 + $0x178] sm:$0xff]  ;;  %v5917_v49 = vpack.c.bf16 %v560_v7, %v559_v39  ;;  %v2051_v5 = vld [vmem:[#allocation5 + $0x990] sm:$0xff] }
 0x110   : > { %1471 = vmatprep.mubr.f32.mxu1 %v7211_v28  ;;  %5894 = vmatpush3.bf16.msra.mxu1 %v5893_v30  ;;  %v541_v30 = vld [vmem:[#allocation5 + $0x270] sm:$0xff]  ;;  %v5881_v52 = vpack.c.bf16 %v510_v27, %v509_v26  ;;  %v5983_v2 = vpack.c.bf16 %v2052_v50, %v2051_v5  ;;  %v566_v22 = vld [vmem:[#allocation5 + $0x338] sm:$0xff]  ;;  %v5991_v26 = vpack.c.bf16 %v2056_v19, %v2055_v32  ;;  %v583_v27 = vld [vmem:[#allocation5 + $0x3c0] sm:$0xff] }
 0x111   : > { %5864 = vmatprep.subr.bf16.mxu0 %v5863_v34  ;;  %5896 = vmatprep.subr.bf16.mxu1 %v5895_v35  ;;  %v575_v34 = vld [vmem:[#allocation5 + $0x380] sm:$0xff]  ;;  %v576_v35 = vld [vmem:[#allocation5 + $0x388] sm:$0xff]  ;;  %v5913_v59 = vpack.c.bf16 %v542_v33, %v541_v30  ;;  %v565_v37 = vld [vmem:[#allocation5 + $0x330] sm:$0xff] }
 0x112   : > { %5495 = vmatprep.mubr.f32.mxu0 %v7192_v20  ;;  %v5903_v20 = vpack.c.bf16 %v554_v54, %v553_v53  ;;  %v5915_v38 = vpack.c.bf16 %v576_v35, %v575_v34  ;;  %v561_v53 = vld [vmem:[#allocation5 + $0x310] sm:$0xff]  ;;  %v562_v54 = vld [vmem:[#allocation5 + $0x318] sm:$0xff]  ;;  %v584_v30 = vld [vmem:[#allocation5 + $0x3c8] sm:$0xff] }
 0x113   : > { %1472 = vmatmul.mubr.f32.gmra.mrb[30].mxu1 %v7215_v62  ;;  %5866 = vmatpush3.bf16.msra.mxu0 %v5865_v40  ;;  %v2057_v33 = vld [vmem:[#allocation5 + $0x9c0] sm:$0xff]  ;;  %v2058_v34 = vld [vmem:[#allocation5 + $0x9c8] sm:$0xff]  ;;  %v7254_v39 = vld [vmem:[#allocation2 + $0x52] sm:$0xff] }
 0x114   : > { %1476 = vmatprep.mubr.f32.mxu1 %v7218_v41  ;;  %5898 = vmatpush3.bf16.msra.mxu1 %v5897_v42  ;;  %v2033_v42 = vld [vmem:[#allocation5 + $0x900] sm:$0xff]  ;;  %v5995_v7 = vpack.c.bf16 %v2058_v34, %v2057_v33  ;;  %v569_v5 = vld [vmem:[#allocation5 + $0x350] sm:$0xff]  ;;  %v570_v50 = vld [vmem:[#allocation5 + $0x358] sm:$0xff] }
 0x115   : > { %5868 = vmatprep.subr.bf16.mxu0 %v5867_v46  ;;  %5900 = vmatprep.subr.bf16.mxu1 %v5899_v48  ;;  %v578_v46 = vld [vmem:[#allocation5 + $0x398] sm:$0xff]  ;;  %v323_v48 = vld [vmem:[#allocation2 + $0x2] sm:$0xff]  ;;  %v5981_v51 = vpack.c.bf16 %v2034_v43, %v2033_v42 }
 0x116   : > { %5496 = vmatmul.mubr.f32.gmra.mrb[28].mxu0 %v711_v63  ;;  %v2035_v63 = vld [vmem:[#allocation5 + $0x910] sm:$0xff]  ;;  %v586_v42 = vld [vmem:[#allocation5 + $0x3d8] sm:$0xff]  ;;  %v1880_v19 = vld [vmem:[#allocation2 + $0x101] sm:$0xff] }
 0x117   : > { %1477 = vmatmul.mubr.f32.gmra.mrb[32].mxu1 %v7222_v55  ;;  %5870 = vmatpush3.bf16.msra.mxu0 %v5869_v56  ;;  %v5919_v56 = vpack.c.bf16 %v578_v46, %v577_v45  ;;  %v7257_v45 = vld [vmem:[#allocation2 + $0x60] sm:$0xff]  ;;  %v2059_v46 = vld [vmem:[#allocation5 + $0x9d0] sm:$0xff]  ;;  %v2082_v33 = vld [vmem:[#allocation5 + $0xa88] sm:$0xff] }
 0x118   : > { %1481 = vmatprep.mubr.f32.mxu1 %v7224_v57  ;;  %5902 = vmatpush3.bf16.msra.mxu1 %v5901_v58  ;;  %v2036_v58 = vld [vmem:[#allocation5 + $0x918] sm:$0xff] }
 0x119   : > { %5872 = vmatprep.subr.bf16.mxu0 %v5871_v23  ;;  %5904 = vmatprep.subr.bf16.mxu1 %v5903_v20  ;;  %v580_v23 = vld [vmem:[#allocation5 + $0x3a8] sm:$0xff]  ;;  %v5921_v20 = vpack.c.bf16 %v562_v54, %v561_v53  ;;  %v5985_v4 = vpack.c.bf16 %v2036_v58, %v2035_v63  ;;  %v2044_v54 = vld [vmem:[#allocation5 + $0x958] sm:$0xff] }
 0x11a   : > { %1551 = vmatprep.mubr.f32.mxu0 %v7201_v13  ;;  %v2049_v13 = vld [vmem:[#allocation5 + $0x980] sm:$0xff]  ;;  %v588_v63 = vld [vmem:[#allocation5 + $0x3e8] sm:$0xff] }
 0x11b   : > { %1482 = vmatmul.mubr.f32.gmra.mrb[34].mxu1 %v7228_v8  ;;  %5874 = vmatpush3.bf16.msra.mxu0 %v5873_v17  ;;  %v5979_v40 = vpack.c.bf16 %v2050_v36, %v2049_v13  ;;  %v5923_v17 = vpack.c.bf16 %v580_v23, %v579_v61  ;;  %v567_v13 = vld [vmem:[#allocation5 + $0x340] sm:$0xff]  ;;  %v568_v36 = vld [vmem:[#allocation5 + $0x348] sm:$0xff] }
 0x11c   : > { %5906 = vmatpush3.bf16.msra.mxu1 %v5905_v9  ;;  %5876 = vmatprep.subr.bf16.mxu0 %v5875_v10  ;;  %v2037_v9 = vld [vmem:[#allocation5 + $0x920] sm:$0xff]  ;;  %v2038_v10 = vld [vmem:[#allocation5 + $0x928] sm:$0xff]  ;;  %v5933_v43 = vpack.c.bf16 %v568_v36, %v567_v13 }
 0x11d   : > { %5908 = vmatprep.subr.bf16.mxu1 %v5907_v16  ;;  %1646 = vmatprep.mubr.f32.mxu1 %v7232_v44  ;;  %v5925_v16 = vpack.c.bf16 %v564_v6, %v563_v14  ;;  %v5989_v21 = vpack.c.bf16 %v2038_v10, %v2037_v9  ;;  %v7262_v58 = vld [vmem:[#allocation2 + $0x62] sm:$0xff] }
 0x11e   : > { %v2061_v61 = vld [vmem:[#allocation5 + $0x9e0] sm:$0xff]  ;;  %v2062_v23 = vld [vmem:[#allocation5 + $0x9e8] sm:$0xff] }
 0x11f   : > { %5878 = vmatpush3.bf16.msra.mxu0 %v5877_v18  ;;  %v2039_v18 = vld [vmem:[#allocation5 + $0x930] sm:$0xff]  ;;  %v571_v14 = vld [vmem:[#allocation5 + $0x360] sm:$0xff]  ;;  %v572_v6 = vld [vmem:[#allocation5 + $0x368] sm:$0xff]  ;;  %v6003_v9 = vpack.c.bf16 %v2062_v23, %v2061_v61 }
 0x120   : > { %5910 = vmatpush3.bf16.msra.mxu1 %v5909_v24  ;;  %5880 = vmatprep.subr.bf16.mxu0 %v5879_v25  ;;  %v2040_v24 = vld [vmem:[#allocation5 + $0x938] sm:$0xff]  ;;  %v7248_v25 = vld [vmem:[#allocation2 + $0x42] sm:$0xff]  ;;  %v5941_v32 = vpack.c.bf16 %v572_v6, %v571_v14  ;;  %v597_v61 = vld [vmem:[#allocation5 + $0x430] sm:$0xff] }
 0x121   : > { %5912 = vmatprep.subr.bf16.mxu1 %v5911_v31  ;;  %v5929_v31 = vpack.c.bf16 %v566_v22, %v565_v37  ;;  %v5993_v35 = vpack.c.bf16 %v2040_v24, %v2039_v18  ;;  %v2046_v10 = vld [vmem:[#allocation5 + $0x968] sm:$0xff]  ;;  %v573_v22 = vld [vmem:[#allocation5 + $0x370] sm:$0xff]  ;;  %v598_v23 = vld [vmem:[#allocation5 + $0x438] sm:$0xff] }
 0x122   : > { %v2047_v18 = vld [vmem:[#allocation5 + $0x970] sm:$0xff]  ;;  %v2088_v6 = vld [vmem:[#allocation5 + $0xab8] sm:$0xff] }
 0x123   : > { %5882 = vmatpush3.bf16.msra.mxu0 %v5881_v52  ;;  %v5931_v52 = vpack.c.bf16 %v584_v30, %v583_v27  ;;  %v591_v27 = vld [vmem:[#allocation5 + $0x400] sm:$0xff]  ;;  %v592_v30 = vld [vmem:[#allocation5 + $0x408] sm:$0xff]  ;;  %v2087_v14 = vld [vmem:[#allocation5 + $0xab0] sm:$0xff] }
 0x124   : > { %5914 = vmatpush3.bf16.msra.mxu1 %v5913_v59  ;;  %5916 = vmatprep.subr.bf16.mxu0 %v5915_v38  ;;  %v2041_v59 = vld [vmem:[#allocation5 + $0x940] sm:$0xff]  ;;  %v2042_v38 = vld [vmem:[#allocation5 + $0x948] sm:$0xff]  ;;  %v5947_v13 = vpack.c.bf16 %v592_v30, %v591_v27  ;;  %v2091_v27 = vld [vmem:[#allocation5 + $0xad0] sm:$0xff] }
 0x125   : > { %5980 = vmatprep.subr.bf16.mxu1 %v5979_v40  ;;  %v585_v40 = vld [vmem:[#allocation5 + $0x3d0] sm:$0xff]  ;;  %v2092_v30 = vld [vmem:[#allocation5 + $0xad8] sm:$0xff] }
 0x126   : > { %1552 = vmatmul.mubr.f32.vlgmr.msra.gmra.mrb[30].mxu0 %v323_v48  ;;  %v2060_v48 = vld [vmem:[#allocation5 + $0x9d8] sm:$0xff]  ;;  %v5935_v53 = vpack.c.bf16 %v586_v42, %v585_v40 }
 0x127   : > { %5918 = vmatpush3.bf16.msra.mxu0 %v5917_v49  ;;  %1647 = vmatmul.mubr.f32.vlgmr.msra.gmra.mrb[36].mxu1 %v7198_v0  ;;  %v5987_v0 = vpack.c.bf16 %v2054_v3, %v2053_v1  ;;  %v5997_v49 = vpack.c.bf16 %v2042_v38, %v2041_v59  ;;  %v7265_v1 = vld [vmem:[#allocation2 + $0x61] sm:$0xff]  ;;  %v594_v59 = vld [vmem:[#allocation5 + $0x418] sm:$0xff] }
 0x128   : > { %1556 = vmatprep.mubr.f32.mxu0 %v7208_v47  ;;  %5982 = vmatpush3.bf16.msra.mxu1 %v5981_v51  ;;  %v2043_v51 = vld [vmem:[#allocation5 + $0x950] sm:$0xff]  ;;  %v2065_v38 = vld [vmem:[#allocation5 + $0xa00] sm:$0xff]  ;;  %v2084_v40 = vld [vmem:[#allocation5 + $0xa98] sm:$0xff] }
 0x129   : > { %5920 = vmatprep.subr.bf16.mxu0 %v5919_v56  ;;  %1651 = vmatprep.mubr.f32.mxu1 %v7236_v60  ;;  %v587_v56 = vld [vmem:[#allocation5 + $0x3e0] sm:$0xff]  ;;  %v6001_v3 = vpack.c.bf16 %v2044_v54, %v2043_v51  ;;  %v2068_v51 = vld [vmem:[#allocation5 + $0xa18] sm:$0xff] }
 0x12a   : > { %1557 = vmatmul.mubr.f32.gmra.mrb[32].mxu0 %v7232_v44  ;;  %5984 = vmatprep.subr.bf16.mxu1 %v5983_v2  ;;  %v5927_v44 = vpack.c.bf16 %v582_v29, %v581_v12  ;;  %v5999_v2 = vpack.c.bf16 %v2060_v48, %v2059_v46  ;;  %v590_v12 = vld [vmem:[#allocation5 + $0x3f8] sm:$0xff]  ;;  %v2063_v29 = vld [vmem:[#allocation5 + $0x9f0] sm:$0xff]  ;;  %v595_v48 = vld [vmem:[#allocation5 + $0x420] sm:$0xff] }
 0x12b   : > { %5922 = vmatpush3.bf16.msra.mxu0 %v5921_v20  ;;  %1652 = vmatmul.mubr.f32.gmra.mrb[38].mxu1 %v7204_v15  ;;  %v5937_v20 = vpack.c.bf16 %v570_v50, %v569_v5  ;;  %v2067_v50 = vld [vmem:[#allocation5 + $0xa10] sm:$0xff]  ;;  %v2085_v54 = vld [vmem:[#allocation5 + $0xaa0] sm:$0xff] }
 0x12c   : > { %1561 = vmatprep.mubr.f32.mxu0 %v7215_v62  ;;  %5986 = vmatpush3.bf16.msra.mxu1 %v5985_v4  ;;  %v5939_v4 = vpack.c.bf16 %v588_v63, %v587_v56  ;;  %v2086_v56 = vld [vmem:[#allocation5 + $0xaa8] sm:$0xff] }
 0x12d   : > { %5924 = vmatprep.subr.bf16.mxu0 %v5923_v17  ;;  %1656 = vmatprep.mubr.f32.mxu1 %v7242_v11  ;;  %v2045_v17 = vld [vmem:[#allocation5 + $0x960] sm:$0xff] }
 0x12e   : > { %1562 = vmatmul.mubr.f32.gmra.mrb[34].mxu0 %v7236_v60  ;;  %5988 = vmatprep.subr.bf16.mxu1 %v5987_v0  ;;  %v589_v0 = vld [vmem:[#allocation5 + $0x3f0] sm:$0xff] }
 0x12f   : > { %5926 = vmatpush3.bf16.msra.mxu0 %v5925_v16  ;;  %1657 = vmatmul.mubr.f32.gmra.mrb[40].mxu1 %v7211_v28  ;;  %v2064_v16 = vld [vmem:[#allocation5 + $0x9f8] sm:$0xff]  ;;  %v5943_v37 = vpack.c.bf16 %v590_v12, %v589_v0  ;;  %v600_v0 = vld [vmem:[#allocation5 + $0x448] sm:$0xff]  ;;  %v6023_v12 = vpack.c.bf16 %v2088_v6, %v2087_v14 }
 0x130   : > { %1566 = vmatprep.mubr.f32.mxu0 %v7222_v55  ;;  %5990 = vmatpush3.bf16.msra.mxu1 %v5989_v21  ;;  %v6005_v21 = vpack.c.bf16 %v2046_v10, %v2045_v17  ;;  %v6007_v24 = vpack.c.bf16 %v2064_v16, %v2063_v29  ;;  %v5959_v17 = vpack.c.bf16 %v598_v23, %v597_v61  ;;  %v599_v10 = vld [vmem:[#allocation5 + $0x440] sm:$0xff]  ;;  %v2071_v29 = vld [vmem:[#allocation5 + $0xa30] sm:$0xff]  ;;  %v2098_v6 = vld [vmem:[#allocation5 + $0xb08] sm:$0xff] }
 0x131   : > { %5928 = vmatprep.subr.bf16.mxu0 %v5927_v44  ;;  %1661 = vmatprep.mubr.f32.mxu1 %v7248_v25  ;;  %v574_v44 = vld [vmem:[#allocation5 + $0x378] sm:$0xff]  ;;  %v2079_v23 = vld [vmem:[#allocation5 + $0xa70] sm:$0xff] }
 0x132   : > { %1567 = vmatmul.mubr.f32.gmra.mrb[36].mxu0 %v7242_v11  ;;  %5992 = vmatprep.subr.bf16.mxu1 %v5991_v26  ;;  %v2048_v26 = vld [vmem:[#allocation5 + $0x978] sm:$0xff]  ;;  %v5945_v34 = vpack.c.bf16 %v574_v44, %v573_v22  ;;  %v601_v22 = vld [vmem:[#allocation5 + $0x450] sm:$0xff] }
 0x133   : > { %5930 = vmatpush3.bf16.msra.mxu0 %v5929_v31  ;;  %1662 = vmatmul.mubr.f32.gmra.mrb[42].mxu1 %v7218_v41  ;;  %v2081_v31 = vld [vmem:[#allocation5 + $0xa80] sm:$0xff]  ;;  %v7288_v16 = vld [vmem:[#allocation2 + $0x131] sm:$0xff] }
 0x134   : > { %1571 = vmatprep.mubr.f32.mxu0 %v7228_v8  ;;  %5994 = vmatpush3.bf16.msra.mxu1 %v5993_v35  ;;  %v6009_v35 = vpack.c.bf16 %v2048_v26, %v2047_v18  ;;  %v6011_v36 = vpack.c.bf16 %v2082_v33, %v2081_v31  ;;  %v602_v44 = vld [vmem:[#allocation5 + $0x458] sm:$0xff]  ;;  %v7296_v26 = vld [vmem:[#allocation2 + $0x141] sm:$0xff] }
 0x135   : > { %5932 = vmatprep.subr.bf16.mxu0 %v5931_v52  ;;  %1666 = vmatprep.mubr.f32.mxu1 %v7254_v39  ;;  %v593_v52 = vld [vmem:[#allocation5 + $0x410] sm:$0xff]  ;;  %v5967_v33 = vpack.c.bf16 %v602_v44, %v601_v22  ;;  %v1892_v22 = vld [vmem:[#allocation2 + $0x102] sm:$0xff] }
 0x136   : > { %1572 = vmatmul.mubr.f32.gmra.mrb[38].mxu0 %v7248_v25  ;;  %5996 = vmatprep.subr.bf16.mxu1 %v5995_v7  ;;  %v2066_v7 = vld [vmem:[#allocation5 + $0xa08] sm:$0xff]  ;;  %v5951_v42 = vpack.c.bf16 %v594_v59, %v593_v52  ;;  %v390_v31 = vld [vmem:[#allocation2 + $0x71] sm:$0xff] }
 0x137   : > { %5934 = vmatpush3.bf16.msra.mxu0 %v5933_v43  ;;  %1667 = vmatmul.mubr.f32.gmra.mrb[44].mxu1 %v7224_v57  ;;  %v1868_v43 = vld [vmem:[#allocation2 + $0x100] sm:$0xff]  ;;  %v6013_v46 = vpack.c.bf16 %v2066_v7, %v2065_v38  ;;  %v2076_v52 = vld [vmem:[#allocation5 + $0xa58] sm:$0xff]  ;;  %v378_v38 = vld [vmem:[#allocation2 + $0x70] sm:$0xff] }
 0x138   : > { %1576 = vmatprep.mubr.f32.mxu0 %v7257_v45  ;;  %5998 = vmatpush3.bf16.msra.mxu1 %v5997_v49  ;;  %v596_v49 = vld [vmem:[#allocation5 + $0x428] sm:$0xff]  ;;  %v7304_v59 = vld [vmem:[#allocation2 + $0x151] sm:$0xff]  ;;  %v2093_v7 = vld [vmem:[#allocation5 + $0xae0] sm:$0xff] }
 0x139   : > { %5936 = vmatprep.subr.bf16.mxu0 %v5935_v53  ;;  %1671 = vmatprep.mubr.f32.mxu1 %v7262_v58  ;;  %v7273_v53 = vld [vmem:[#allocation2 + $0x111] sm:$0xff]  ;;  %v5955_v63 = vpack.c.bf16 %v596_v49, %v595_v48  ;;  %v2077_v49 = vld [vmem:[#allocation5 + $0xa60] sm:$0xff] }
 0x13a   : > { %1577 = vmatmul.mubr.f32.gmra.mrb[40].mxu0 %v7254_v39  ;;  %6000 = vmatprep.subr.bf16.mxu1 %v5999_v2  ;;  %v6017_v2 = vpack.c.bf16 %v2068_v51, %v2067_v50  ;;  %v2095_v50 = vld [vmem:[#allocation5 + $0xaf0] sm:$0xff]  ;;  %v2096_v51 = vld [vmem:[#allocation5 + $0xaf8] sm:$0xff] }
 0x13b   : > { %5938 = vmatpush3.bf16.msra.mxu0 %v5937_v20  ;;  %1672 = vmatmul.mubr.f32.gmra.mrb[46].mxu1 %v7265_v1  ;;  %v6019_v20 = vpack.c.bf16 %v2086_v56, %v2085_v54  ;;  %v6039_v61 = vpack.c.bf16 %v2096_v51, %v2095_v50  ;;  %v2121_v51 = vld [vmem:[#allocation5 + $0xbc0] sm:$0xff] }
 0x13c   : > { %6002 = vmatpush3.bf16.msra.mxu1 %v6001_v3  ;;  %5940 = vmatprep.subr.bf16.mxu0 %v5939_v4  ;;  %v2069_v3 = vld [vmem:[#allocation5 + $0xa20] sm:$0xff]  ;;  %v2070_v4 = vld [vmem:[#allocation5 + $0xa28] sm:$0xff] }
 0x13d   : > { %6004 = vmatprep.subr.bf16.mxu1 %v6003_v9  ;;  %1741 = vmatprep.mubr.f32.mxu0 %v7204_v15  ;;  %v2083_v15 = vld [vmem:[#allocation5 + $0xa90] sm:$0xff]  ;;  %v6021_v9 = vpack.c.bf16 %v2070_v4, %v2069_v3  ;;  %v2145_v3 = vld [vmem:[#allocation5 + $0xc80] sm:$0xff]  ;;  %v2146_v4 = vld [vmem:[#allocation5 + $0xc88] sm:$0xff] }
 0x13e   : > { %2241 = vmatprep.mubr.f32.mxu1 %v1880_v19  ;;  %v6015_v5 = vpack.c.bf16 %v2084_v40, %v2083_v15  ;;  %v2090_v19 = vld [vmem:[#allocation5 + $0xac8] sm:$0xff] }
 0x13f   : > { %5942 = vmatpush3.bf16.msra.mxu0 %v5941_v32  ;;  %v2089_v32 = vld [vmem:[#allocation5 + $0xac0] sm:$0xff]  ;;  %v2094_v15 = vld [vmem:[#allocation5 + $0xae8] sm:$0xff] }
 0x140   : > { %6006 = vmatpush3.bf16.msra.mxu1 %v6005_v21  ;;  %5944 = vmatprep.subr.bf16.mxu0 %v5943_v37  ;;  %v5963_v21 = vpack.c.bf16 %v600_v0, %v599_v10  ;;  %v6027_v18 = vpack.c.bf16 %v2090_v19, %v2089_v32  ;;  %v6035_v48 = vpack.c.bf16 %v2094_v15, %v2093_v7  ;;  %v2116_v10 = vld [vmem:[#allocation5 + $0xb98] sm:$0xff]  ;;  %v2133_v15 = vld [vmem:[#allocation5 + $0xc20] sm:$0xff] }
 0x141   : > { %6008 = vmatprep.subr.bf16.mxu1 %v6007_v24  ;;  %v2073_v24 = vld [vmem:[#allocation5 + $0xa40] sm:$0xff]  ;;  %v6075_v0 = vpack.c.bf16 %v2146_v4, %v2145_v3  ;;  %v2148_v32 = vld [vmem:[#allocation5 + $0xc98] sm:$0xff]  ;;  %v2106_v4 = vld [vmem:[#allocation5 + $0xb48] sm:$0xff] }
 0x142   : > { %v2105_v3 = vld [vmem:[#allocation5 + $0xb40] sm:$0xff] }
 0x143   : > { %5946 = vmatpush3.bf16.msra.mxu0 %v5945_v34 }
 0x144   : > { %6010 = vmatpush3.bf16.msra.mxu1 %v6009_v35  ;;  %5948 = vmatprep.subr.bf16.mxu0 %v5947_v13  ;;  %v603_v35 = vld [vmem:[#allocation5 + $0x460] sm:$0xff] }
 0x145   : > { %6012 = vmatprep.subr.bf16.mxu1 %v6011_v36  ;;  %v6031_v36 = vpack.c.bf16 %v2092_v30, %v2091_v27  ;;  %v2131_v27 = vld [vmem:[#allocation5 + $0xc10] sm:$0xff]  ;;  %v2132_v30 = vld [vmem:[#allocation5 + $0xc18] sm:$0xff] }
 0x146   : > { %1742 = vmatmul.mubr.f32.vlgmr.msra.gmra.mrb[42].mxu0 %v7208_v47  ;;  %v7277_v47 = vld [vmem:[#allocation2 + $0x110] sm:$0xff] }
 0x147   : > { %5950 = vmatpush3.bf16.msra.mxu0 %v5947_v13  ;;  %1746 = vmatprep.mubr.f32.mxu0 %v7211_v28  ;;  %v7280_v28 = vld [vmem:[#allocation2 + $0x121] sm:$0xff] }
 0x148   : > { %2242 = vmatmul.mubr.f32.vlgmr.msra.gmra.mrb[48].mxu1 %v1868_v43  ;;  %5952 = vmatprep.subr.bf16.mxu0 %v5951_v42  ;;  %v7301_v13 = vld [vmem:[#allocation2 + $0x140] sm:$0xff]  ;;  %v605_v43 = vld [vmem:[#allocation5 + $0x470] sm:$0xff] }
 0x149   : > { %6014 = vmatpush3.bf16.msra.mxu1 %v6013_v46  ;;  %2246 = vmatprep.mubr.f32.mxu1 %v7273_v53  ;;  %v606_v46 = vld [vmem:[#allocation5 + $0x478] sm:$0xff] }
 0x14a   : > { %1747 = vmatmul.mubr.f32.gmra.mrb[44].mxu0 %v7215_v62  ;;  %6016 = vmatprep.subr.bf16.mxu1 %v6015_v5  ;;  %v7285_v62 = vld [vmem:[#allocation2 + $0x120] sm:$0xff]  ;;  %v2078_v5 = vld [vmem:[#allocation5 + $0xa68] sm:$0xff]  ;;  %v5975_v54 = vpack.c.bf16 %v606_v46, %v605_v43  ;;  %v2152_v43 = vld [vmem:[#allocation5 + $0xcb8] sm:$0xff] }
 0x14b   : > { %5954 = vmatpush3.bf16.msra.mxu0 %v5951_v42  ;;  %1751 = vmatprep.mubr.f32.mxu0 %v7218_v41  ;;  %v2072_v41 = vld [vmem:[#allocation5 + $0xa38] sm:$0xff]  ;;  %v6037_v56 = vpack.c.bf16 %v2078_v5, %v2077_v49  ;;  %v2103_v49 = vld [vmem:[#allocation5 + $0xb30] sm:$0xff] }
 0x14c   : > { %5956 = vmatprep.subr.bf16.mxu0 %v5955_v63  ;;  %2247 = vmatmul.mubr.f32.gmra.mrb[50].mxu1 %v7277_v47  ;;  %v6025_v37 = vpack.c.bf16 %v2072_v41, %v2071_v29  ;;  %v2130_v29 = vld [vmem:[#allocation5 + $0xc08] sm:$0xff]  ;;  %v2147_v41 = vld [vmem:[#allocation5 + $0xc90] sm:$0xff]  ;;  %v2104_v5 = vld [vmem:[#allocation5 + $0xb38] sm:$0xff] }
 0x14d   : > { %6018 = vmatpush3.bf16.msra.mxu1 %v6017_v2  ;;  %2251 = vmatprep.mubr.f32.mxu1 %v7280_v28  ;;  %v2114_v2 = vld [vmem:[#allocation5 + $0xb88] sm:$0xff]  ;;  %v402_v46 = vld [vmem:[#allocation2 + $0x72] sm:$0xff] }
 0x14e   : > { %1752 = vmatmul.mubr.f32.gmra.mrb[46].mxu0 %v7222_v55  ;;  %6020 = vmatprep.subr.bf16.mxu1 %v6019_v20  ;;  %v7293_v55 = vld [vmem:[#allocation2 + $0x130] sm:$0xff]  ;;  %v2080_v20 = vld [vmem:[#allocation5 + $0xa78] sm:$0xff] }
 0x14f   : > { %5958 = vmatpush3.bf16.msra.mxu0 %v5955_v63  ;;  %1756 = vmatprep.mubr.f32.mxu0 %v7224_v57  ;;  %v2074_v57 = vld [vmem:[#allocation5 + $0xa48] sm:$0xff]  ;;  %v2113_v63 = vld [vmem:[#allocation5 + $0xb80] sm:$0xff] }
 0x150   : > { %5960 = vmatprep.subr.bf16.mxu0 %v5959_v17  ;;  %2252 = vmatmul.mubr.f32.gmra.mrb[52].mxu1 %v7285_v62  ;;  %v6029_v34 = vpack.c.bf16 %v2074_v57, %v2073_v24  ;;  %v6043_v14 = vpack.c.bf16 %v2114_v2, %v2113_v63  ;;  %v2118_v24 = vld [vmem:[#allocation5 + $0xba8] sm:$0xff]  ;;  %v6079_v57 = vpack.c.bf16 %v2148_v32, %v2147_v41  ;;  %v2135_v63 = vld [vmem:[#allocation5 + $0xc30] sm:$0xff]  ;;  %v2136_v2 = vld [vmem:[#allocation5 + $0xc38] sm:$0xff] }
 0x151   : > { %6022 = vmatpush3.bf16.msra.mxu1 %v6021_v9  ;;  %2256 = vmatprep.mubr.f32.mxu1 %v7288_v16  ;;  %v2115_v9 = vld [vmem:[#allocation5 + $0xb90] sm:$0xff] }
 0x152   : > { %1757 = vmatmul.mubr.f32.gmra.mrb[48].mxu0 %v7228_v8  ;;  %6024 = vmatprep.subr.bf16.mxu1 %v6023_v12  ;;  %v604_v8 = vld [vmem:[#allocation5 + $0x468] sm:$0xff]  ;;  %v2129_v12 = vld [vmem:[#allocation5 + $0xc00] sm:$0xff]  ;;  %v6047_v19 = vpack.c.bf16 %v2116_v10, %v2115_v9  ;;  %v2107_v32 = vld [vmem:[#allocation5 + $0xb50] sm:$0xff] }
 0x153   : > { %5962 = vmatpush3.bf16.msra.mxu0 %v5959_v17  ;;  %1761 = vmatprep.mubr.f32.mxu0 %v7265_v1  ;;  %v2075_v1 = vld [vmem:[#allocation5 + $0xa50] sm:$0xff]  ;;  %v5971_v40 = vpack.c.bf16 %v604_v8, %v603_v35  ;;  %v6041_v17 = vpack.c.bf16 %v2080_v20, %v2079_v23  ;;  %v6077_v44 = vpack.c.bf16 %v2130_v29, %v2129_v12  ;;  %v2101_v8 = vld [vmem:[#allocation5 + $0xb20] sm:$0xff]  ;;  %v2154_v23 = vld [vmem:[#allocation5 + $0xcc8] sm:$0xff] }
 0x154   : > { %5964 = vmatprep.subr.bf16.mxu0 %v5963_v21  ;;  %2257 = vmatmul.mubr.f32.gmra.mrb[54].mxu1 %v7293_v55  ;;  %v6033_v42 = vpack.c.bf16 %v2076_v52, %v2075_v1  ;;  %v6081_v1 = vpack.c.bf16 %v2132_v30, %v2131_v27  ;;  %v2119_v52 = vld [vmem:[#allocation5 + $0xbb0] sm:$0xff]  ;;  %v2137_v10 = vld [vmem:[#allocation5 + $0xc40] sm:$0xff]  ;;  %v6061_v12 = vpack.c.bf16 %v2106_v4, %v2105_v3  ;;  %v2164_v3 = vld [vmem:[#allocation5 + $0xd18] sm:$0xff] }
 0x155   : > { %6026 = vmatpush3.bf16.msra.mxu1 %v6025_v37  ;;  %2261 = vmatprep.mubr.f32.mxu1 %v7296_v26  ;;  %v2100_v37 = vld [vmem:[#allocation5 + $0xb18] sm:$0xff]  ;;  %v2155_v29 = vld [vmem:[#allocation5 + $0xcd0] sm:$0xff]  ;;  %v7329_v27 = vld [vmem:[#allocation2 + $0x160] sm:$0xff] }
 0x156   : > { %1762 = vmatmul.mubr.f32.gmra.mrb[50].mxu0 %v7257_v45  ;;  %6028 = vmatprep.subr.bf16.mxu1 %v6027_v18  ;;  %v7308_v45 = vld [vmem:[#allocation2 + $0x150] sm:$0xff]  ;;  %v2117_v18 = vld [vmem:[#allocation5 + $0xba0] sm:$0xff] }
 0x157   : > { %5966 = vmatpush3.bf16.msra.mxu0 %v5963_v21  ;;  %1766 = vmatprep.mubr.f32.mxu0 %v390_v31  ;;  %v2099_v21 = vld [vmem:[#allocation5 + $0xb10] sm:$0xff]  ;;  %v6051_v35 = vpack.c.bf16 %v2118_v24, %v2117_v18 }
 0x158   : > { %5968 = vmatprep.subr.bf16.mxu0 %v5967_v33  ;;  %2262 = vmatmul.mubr.f32.gmra.mrb[56].mxu1 %v7301_v13  ;;  %v6049_v31 = vpack.c.bf16 %v2100_v37, %v2099_v21  ;;  %v2125_v37 = vld [vmem:[#allocation5 + $0xbe0] sm:$0xff]  ;;  %v2139_v24 = vld [vmem:[#allocation5 + $0xc50] sm:$0xff] }
 0x159   : > { %6030 = vmatpush3.bf16.msra.mxu1 %v6029_v34  ;;  %2266 = vmatprep.mubr.f32.mxu1 %v7304_v59  ;;  %v2150_v34 = vld [vmem:[#allocation5 + $0xca8] sm:$0xff] }
 0x15a   : > { %1767 = vmatmul.mubr.f32.gmra.mrb[52].mxu0 %v378_v38  ;;  %6032 = vmatprep.subr.bf16.mxu1 %v6031_v36  ;;  %v2102_v36 = vld [vmem:[#allocation5 + $0xb28] sm:$0xff]  ;;  %v2120_v38 = vld [vmem:[#allocation5 + $0xbb8] sm:$0xff] }
 0x15b   : > { %5970 = vmatpush3.bf16.msra.mxu0 %v5967_v33  ;;  %5530 = vmatprep.mubr.f32.mxu0 %v7236_v60  ;;  %v2097_v60 = vld [vmem:[#allocation5 + $0xb00] sm:$0xff] }
 0x15c   : > { %5972 = vmatprep.subr.bf16.mxu0 %v5971_v40  ;;  %2267 = vmatmul.mubr.f32.gmra.mrb[58].mxu1 %v7308_v45  ;;  %v2149_v33 = vld [vmem:[#allocation5 + $0xca0] sm:$0xff] }
 0x15d   : > { %6034 = vmatpush3.bf16.msra.mxu1 %v6033_v42  ;;  %2336 = vmatprep.mubr.f32.mxu1 %v7277_v47  ;;  %v6045_v47 = vpack.c.bf16 %v2098_v6, %v2097_v60  ;;  %v6083_v7 = vpack.c.bf16 %v2150_v34, %v2149_v33  ;;  %v2151_v42 = vld [vmem:[#allocation5 + $0xcb0] sm:$0xff]  ;;  %v2124_v6 = vld [vmem:[#allocation5 + $0xbd8] sm:$0xff]  ;;  %v2158_v33 = vld [vmem:[#allocation5 + $0xce8] sm:$0xff] }
 0x15e   : > { %6036 = vmatprep.subr.bf16.mxu1 %v6035_v48  ;;  %v6055_v48 = vpack.c.bf16 %v2120_v38, %v2119_v52  ;;  %v2123_v60 = vld [vmem:[#allocation5 + $0xbd0] sm:$0xff]  ;;  %v2128_v52 = vld [vmem:[#allocation5 + $0xbf8] sm:$0xff] }
 0x15f   : > { %5974 = vmatpush3.bf16.msra.mxu0 %v5971_v40  ;;  %v2134_v40 = vld [vmem:[#allocation5 + $0xc28] sm:$0xff]  ;;  %v6063_v41 = vpack.c.bf16 %v2124_v6, %v2123_v60  ;;  %v7333_v38 = vld [vmem:[#allocation2 + $0x152] sm:$0xff] }
 0x160   : > { %5976 = vmatprep.subr.bf16.mxu0 %v5975_v54  ;;  %v6085_v50 = vpack.c.bf16 %v2134_v40, %v2133_v15  ;;  %v2142_v15 = vld [vmem:[#allocation5 + $0xc68] sm:$0xff]  ;;  %v2842_v6 = vld [vmem:[#allocation5 + $0xe10] sm:$0xff] }
 0x161   : > { %6038 = vmatpush3.bf16.msra.mxu1 %v6037_v56  ;;  %v7319_v56 = vld [vmem:[#allocation2 + $0x122] sm:$0xff] }
 0x162   : > { %6040 = vmatprep.subr.bf16.mxu1 %v6039_v61  ;;  %v2153_v61 = vld [vmem:[#allocation5 + $0xcc0] sm:$0xff]  ;;  %v2825_v60 = vld [vmem:[#allocation5 + $0xd88] sm:$0xff] }
 0x163   : > { %5978 = vmatpush3.bf16.msra.mxu0 %v5975_v54  ;;  %v2122_v54 = vld [vmem:[#allocation5 + $0xbc8] sm:$0xff]  ;;  %v6091_v9 = vpack.c.bf16 %v2154_v23, %v2153_v61 }
 0x164   : > { %6044 = vmatprep.subr.bf16.mxu0 %v6043_v14  ;;  %v6059_v20 = vpack.c.bf16 %v2122_v54, %v2121_v51  ;;  %v6089_v14 = vpack.c.bf16 %v2136_v2, %v2135_v63  ;;  %v2143_v54 = vld [vmem:[#allocation5 + $0xc70] sm:$0xff]  ;;  %v2840_v2 = vld [vmem:[#allocation5 + $0xe00] sm:$0xff] }
 0x165   : > { %6042 = vmatpush3.bf16.msra.mxu1 %v6041_v17  ;;  %v7323_v17 = vld [vmem:[#allocation2 + $0x132] sm:$0xff] }
 0x166   : > { %5531 = vmatmul.mubr.f32.vlgmr.msra.gmra.mrb[24].mxu0 %v7242_v11  ;;  %6076 = vmatprep.subr.bf16.mxu1 %v6075_v0  ;;  %v1893_v11 = vld [vmem:[#allocation2 + $0x112] sm:$0xff]  ;;  %v2138_v0 = vld [vmem:[#allocation5 + $0xc48] sm:$0xff] }
 0x167   : > { %6046 = vmatpush3.bf16.msra.mxu0 %v6045_v47  ;;  %5533 = vmatprep.mubr.f32.mxu0 %v7248_v25  ;;  %v6053_v25 = vpack.c.bf16 %v2102_v36, %v2101_v8  ;;  %v2156_v47 = vld [vmem:[#allocation5 + $0xcd8] sm:$0xff]  ;;  %v6093_v21 = vpack.c.bf16 %v2138_v0, %v2137_v10  ;;  %v2110_v8 = vld [vmem:[#allocation5 + $0xb68] sm:$0xff] }
 0x168   : > { %2337 = vmatmul.mubr.f32.vlgmr.msra.gmra.mrb[60].mxu1 %v1892_v22  ;;  %6048 = vmatprep.subr.bf16.mxu0 %v6047_v19  ;;  %v2108_v19 = vld [vmem:[#allocation5 + $0xb58] sm:$0xff]  ;;  %v2126_v22 = vld [vmem:[#allocation5 + $0xbe8] sm:$0xff]  ;;  %v6095_v18 = vpack.c.bf16 %v2156_v47, %v2155_v29 }
 0x169   : > { %6078 = vmatpush3.bf16.msra.mxu1 %v6077_v44  ;;  %2341 = vmatprep.mubr.f32.mxu1 %v7285_v62  ;;  %v7327_v44 = vld [vmem:[#allocation2 + $0x142] sm:$0xff]  ;;  %v6065_v30 = vpack.c.bf16 %v2108_v19, %v2107_v32  ;;  %v6067_v34 = vpack.c.bf16 %v2126_v22, %v2125_v37  ;;  %v2827_v32 = vld [vmem:[#allocation5 + $0xd98] sm:$0xff] }
 0x16a   : > { %6080 = vmatprep.subr.bf16.mxu1 %v6079_v57  ;;  %5534 = vmatmul.mubr.f32.gmra.mrb[26].mxu0 %v7254_v39  ;;  %v6087_v39 = vpack.c.bf16 %v2152_v43, %v2151_v42  ;;  %v2140_v57 = vld [vmem:[#allocation5 + $0xc58] sm:$0xff]  ;;  %v2166_v29 = vld [vmem:[#allocation5 + $0xd28] sm:$0xff]  ;;  %v2844_v19 = vld [vmem:[#allocation5 + $0xe20] sm:$0xff] }
 0x16b   : > { %6050 = vmatpush3.bf16.msra.mxu0 %v6049_v31  ;;  %5536 = vmatprep.mubr.f32.mxu0 %v7262_v58  ;;  %v6057_v58 = vpack.c.bf16 %v2104_v5, %v2103_v49  ;;  %v2157_v31 = vld [vmem:[#allocation5 + $0xce0] sm:$0xff]  ;;  %v6097_v36 = vpack.c.bf16 %v2140_v57, %v2139_v24  ;;  %v2160_v42 = vld [vmem:[#allocation5 + $0xcf8] sm:$0xff] }
 0x16c   : > { %6052 = vmatprep.subr.bf16.mxu0 %v6051_v35  ;;  %2342 = vmatmul.mubr.f32.gmra.mrb[62].mxu1 %v1893_v11  ;;  %v2109_v35 = vld [vmem:[#allocation5 + $0xb60] sm:$0xff]  ;;  %v2168_v24 = vld [vmem:[#allocation5 + $0xd38] sm:$0xff] }
 0x16d   : > { %6082 = vmatpush3.bf16.msra.mxu1 %v6081_v1  ;;  %2346 = vmatprep.mubr.f32.mxu1 %v7293_v55  ;;  %v2127_v1 = vld [vmem:[#allocation5 + $0xbf0] sm:$0xff]  ;;  %v6069_v40 = vpack.c.bf16 %v2110_v8, %v2109_v35  ;;  %v2161_v5 = vld [vmem:[#allocation5 + $0xd00] sm:$0xff]  ;;  %v2170_v8 = vld [vmem:[#allocation5 + $0xd48] sm:$0xff] }
 0x16e   : > { %6084 = vmatprep.subr.bf16.mxu1 %v6083_v7  ;;  %5537 = vmatmul.mubr.f32.gmra.mrb[28].mxu0 %v402_v46  ;;  %v2141_v7 = vld [vmem:[#allocation5 + $0xc60] sm:$0xff]  ;;  %v6071_v43 = vpack.c.bf16 %v2128_v52, %v2127_v1  ;;  %v2111_v46 = vld [vmem:[#allocation5 + $0xb70] sm:$0xff]  ;;  %v2831_v1 = vld [vmem:[#allocation5 + $0xdb8] sm:$0xff] }
 0x16f   : > { %6054 = vmatpush3.bf16.msra.mxu0 %v6053_v25  ;;  %2431 = vmatprep.mubr.f32.mxu0 %v1893_v11  ;;  %v6099_v11 = vpack.c.bf16 %v2158_v33, %v2157_v31  ;;  %v2159_v25 = vld [vmem:[#allocation5 + $0xcf0] sm:$0xff]  ;;  %v6101_v49 = vpack.c.bf16 %v2142_v15, %v2141_v7  ;;  %v2828_v57 = vld [vmem:[#allocation5 + $0xda0] sm:$0xff]  ;;  %v2847_v33 = vld [vmem:[#allocation5 + $0xe38] sm:$0xff] }
 0x170   : > { %6056 = vmatprep.subr.bf16.mxu0 %v6055_v48  ;;  %2347 = vmatmul.mubr.f32.gmra.mrb[64].mxu1 %v7319_v56  ;;  %v2112_v48 = vld [vmem:[#allocation5 + $0xb78] sm:$0xff]  ;;  %v6103_v51 = vpack.c.bf16 %v2160_v42, %v2159_v25  ;;  %v2846_v31 = vld [vmem:[#allocation5 + $0xe30] sm:$0xff]  ;;  %v2169_v35 = vld [vmem:[#allocation5 + $0xd40] sm:$0xff] }
 0x171   : > { %6086 = vmatpush3.bf16.msra.mxu1 %v6085_v50  ;;  %2351 = vmatprep.mubr.f32.mxu1 %v7301_v13  ;;  %v2162_v50 = vld [vmem:[#allocation5 + $0xd08] sm:$0xff]  ;;  %v6073_v63 = vpack.c.bf16 %v2112_v48, %v2111_v46  ;;  %v2848_v52 = vld [vmem:[#allocation5 + $0xe40] sm:$0xff]  ;;  %v2171_v15 = vld [vmem:[#allocation5 + $0xd50] sm:$0xff] }
 0x172   : > { %6088 = vmatprep.subr.bf16.mxu1 %v6087_v39  ;;  %v2144_v39 = vld [vmem:[#allocation5 + $0xc78] sm:$0xff]  ;;  %v6107_v61 = vpack.c.bf16 %v2162_v50, %v2161_v5  ;;  %v2832_v42 = vld [vmem:[#allocation5 + $0xdc0] sm:$0xff]  ;;  %v2850_v46 = vld [vmem:[#allocation5 + $0xe50] sm:$0xff] }
 0x173   : > { %6058 = vmatpush3.bf16.msra.mxu0 %v6057_v58  ;;  %v2841_v58 = vld [vmem:[#allocation5 + $0xe08] sm:$0xff]  ;;  %v6105_v23 = vpack.c.bf16 %v2144_v39, %v2143_v54  ;;  %v2834_v39 = vld [vmem:[#allocation5 + $0xdd0] sm:$0xff] }
 0x174   : > { %6060 = vmatprep.subr.bf16.mxu0 %v6059_v20  ;;  %2352 = vmatmul.mubr.f32.gmra.mrb[66].mxu1 %v7323_v17  ;;  %v2163_v20 = vld [vmem:[#allocation5 + $0xd10] sm:$0xff]  ;;  %v6139_v4 = vpack.c.bf16 %v2841_v58, %v2840_v2  ;;  %v7352_v48 = vld [vmem:[#allocation2 + $0x162] sm:$0xff] }
 0x175   : > { %6090 = vmatpush3.bf16.msra.mxu1 %v6089_v14  ;;  %2356 = vmatprep.mubr.f32.mxu1 %v7308_v45  ;;  %v2824_v14 = vld [vmem:[#allocation5 + $0xd80] sm:$0xff]  ;;  %v6111_v10 = vpack.c.bf16 %v2164_v3, %v2163_v20  ;;  %v2174_v50 = vld [vmem:[#allocation5 + $0xd68] sm:$0xff]  ;;  %v2176_v3 = vld [vmem:[#allocation5 + $0xd78] sm:$0xff] }
 0x176   : > { %6092 = vmatprep.subr.bf16.mxu1 %v6091_v9  ;;  %v2843_v9 = vld [vmem:[#allocation5 + $0xe18] sm:$0xff]  ;;  %v6141_v0 = vpack.c.bf16 %v2825_v60, %v2824_v14  ;;  %v2853_v2 = vld [vmem:[#allocation5 + $0xe68] sm:$0xff] }
 0x177   : > { %6062 = vmatpush3.bf16.msra.mxu0 %v6061_v12  ;;  %v2165_v12 = vld [vmem:[#allocation5 + $0xd20] sm:$0xff]  ;;  %v6143_v47 = vpack.c.bf16 %v2843_v9, %v2842_v6  ;;  %v2837_v9 = vld [vmem:[#allocation5 + $0xde8] sm:$0xff] }
 0x178   : > { %6064 = vmatprep.subr.bf16.mxu0 %v6063_v41  ;;  %2357 = vmatmul.mubr.f32.gmra.mrb[68].mxu1 %v7327_v44  ;;  %v2826_v41 = vld [vmem:[#allocation5 + $0xd90] sm:$0xff]  ;;  %v6115_v37 = vpack.c.bf16 %v2166_v29, %v2165_v12  ;;  %v2836_v6 = vld [vmem:[#allocation5 + $0xde0] sm:$0xff]  ;;  %v2855_v29 = vld [vmem:[#allocation5 + $0xe78] sm:$0xff] }
 0x179   : > { %6094 = vmatpush3.bf16.msra.mxu1 %v6093_v21  ;;  %2361 = vmatprep.mubr.f32.mxu1 %v7329_v27  ;;  %v2845_v21 = vld [vmem:[#allocation5 + $0xe28] sm:$0xff]  ;;  %v6145_v22 = vpack.c.bf16 %v2827_v32, %v2826_v41  ;;  %v6165_v32 = vpack.c.bf16 %v2837_v9, %v2836_v6  ;;  %v2908_v9 = vld [vmem:[#allocation5 + $0x1020] sm:$0xff] }
 0x17a   : > { %6096 = vmatprep.subr.bf16.mxu1 %v6095_v18  ;;  %v2167_v18 = vld [vmem:[#allocation5 + $0xd30] sm:$0xff] }
 0x17b   : > { %6066 = vmatpush3.bf16.msra.mxu0 %v6065_v30  ;;  %v2829_v30 = vld [vmem:[#allocation5 + $0xda8] sm:$0xff] }
 0x17c   : > { %6068 = vmatprep.subr.bf16.mxu0 %v6067_v34  ;;  %2362 = vmatmul.mubr.f32.gmra.mrb[70].mxu1 %v7333_v38  ;;  %v6149_v34 = vpack.c.bf16 %v2829_v30, %v2828_v57  ;;  %v2839_v57 = vld [vmem:[#allocation5 + $0xdf8] sm:$0xff] }
 0x17d   : > { %6098 = vmatpush3.bf16.msra.mxu1 %v6097_v36  ;;  %2526 = vmatprep.mubr.f32.mxu1 %v7280_v28  ;;  %v2830_v36 = vld [vmem:[#allocation5 + $0xdb0] sm:$0xff] }
 0x17e   : > { %6100 = vmatprep.subr.bf16.mxu1 %v6099_v11  ;;  %v2849_v11 = vld [vmem:[#allocation5 + $0xe48] sm:$0xff]  ;;  %v6153_v7 = vpack.c.bf16 %v2831_v1, %v2830_v36 }
 0x17f   : > { %6070 = vmatpush3.bf16.msra.mxu0 %v6069_v40  ;;  %v2172_v40 = vld [vmem:[#allocation5 + $0xd58] sm:$0xff]  ;;  %v6155_v25 = vpack.c.bf16 %v2849_v11, %v2848_v52  ;;  %v2874_v52 = vld [vmem:[#allocation5 + $0xf10] sm:$0xff] }
 0x180   : > { %6072 = vmatprep.subr.bf16.mxu0 %v6071_v43  ;;  %v2833_v43 = vld [vmem:[#allocation5 + $0xdc8] sm:$0xff]  ;;  %v2875_v11 = vld [vmem:[#allocation5 + $0xf18] sm:$0xff] }
 0x181   : > { %6102 = vmatpush3.bf16.msra.mxu1 %v6101_v49  ;;  %v6127_v49 = vpack.c.bf16 %v2172_v40, %v2171_v15  ;;  %v6157_v5 = vpack.c.bf16 %v2833_v43, %v2832_v42  ;;  %v2888_v40 = vld [vmem:[#allocation5 + $0xf80] sm:$0xff] }
 0x182   : > { %6104 = vmatprep.subr.bf16.mxu1 %v6103_v51  ;;  %v1959_v51 = vld [vmem:[#allocation2 + $0x171] sm:$0xff] }
 0x183   : > { %6074 = vmatpush3.bf16.msra.mxu0 %v6073_v63  ;;  %v2835_v63 = vld [vmem:[#allocation5 + $0xdd8] sm:$0xff] }
 0x184   : > { %6108 = vmatprep.subr.bf16.mxu0 %v6107_v61  ;;  %v6161_v20 = vpack.c.bf16 %v2835_v63, %v2834_v39 }
 0x185   : > { %6106 = vmatpush3.bf16.msra.mxu1 %v6105_v23  ;;  %v1947_v23 = vld [vmem:[#allocation2 + $0x170] sm:$0xff] }
 0x186   : > { %2432 = vmatmul.mubr.f32.vlgmr.msra.gmra.mrb[54].mxu0 %v7273_v53  ;;  %6140 = vmatprep.subr.bf16.mxu1 %v6139_v4  ;;  %v6147_v53 = vpack.c.bf16 %v2845_v21, %v2844_v19  ;;  %v2872_v21 = vld [vmem:[#allocation5 + $0xf00] sm:$0xff] }
 0x187   : > { %6110 = vmatpush3.bf16.msra.mxu0 %v6107_v61  ;;  %2436 = vmatprep.mubr.f32.mxu0 %v7319_v56 }
 0x188   : > { %2527 = vmatmul.mubr.f32.vlgmr.msra.gmra.mrb[72].mxu1 %v7285_v62  ;;  %6112 = vmatprep.subr.bf16.mxu0 %v6111_v10  ;;  %v6119_v62 = vpack.c.bf16 %v2168_v24, %v2167_v18 }
 0x189   : > { %6142 = vmatpush3.bf16.msra.mxu1 %v6141_v0  ;;  %2531 = vmatprep.mubr.f32.mxu1 %v7288_v16 }
 0x18a   : > { %2437 = vmatmul.mubr.f32.gmra.mrb[56].mxu0 %v7280_v28  ;;  %6144 = vmatprep.subr.bf16.mxu1 %v6143_v47  ;;  %v6151_v28 = vpack.c.bf16 %v2847_v33, %v2846_v31  ;;  %v2904_v33 = vld [vmem:[#allocation5 + $0x1000] sm:$0xff] }
 0x18b   : > { %6114 = vmatpush3.bf16.msra.mxu0 %v6111_v10  ;;  %2441 = vmatprep.mubr.f32.mxu0 %v7323_v17  ;;  %v2671_v10 = vld [vmem:[#allocation2 + $0x181] sm:$0xff] }
 0x18c   : > { %2532 = vmatmul.mubr.f32.gmra.mrb[74].mxu1 %v7293_v55  ;;  %6116 = vmatprep.subr.bf16.mxu0 %v6115_v37  ;;  %v6123_v55 = vpack.c.bf16 %v2170_v8, %v2169_v35  ;;  %v2856_v8 = vld [vmem:[#allocation5 + $0xe80] sm:$0xff] }
 0x18d   : > { %6146 = vmatpush3.bf16.msra.mxu1 %v6145_v22  ;;  %2536 = vmatprep.mubr.f32.mxu1 %v7296_v26 }
 0x18e   : > { %2442 = vmatmul.mubr.f32.gmra.mrb[58].mxu0 %v7288_v16  ;;  %6148 = vmatprep.subr.bf16.mxu1 %v6147_v53  ;;  %v1958_v16 = vld [vmem:[#allocation2 + $0x161] sm:$0xff]  ;;  %v2838_v53 = vld [vmem:[#allocation5 + $0xdf0] sm:$0xff] }
 0x18f   : > { %6118 = vmatpush3.bf16.msra.mxu0 %v6115_v37  ;;  %2446 = vmatprep.mubr.f32.mxu0 %v7327_v44  ;;  %v2873_v37 = vld [vmem:[#allocation5 + $0xf08] sm:$0xff]  ;;  %v6169_v36 = vpack.c.bf16 %v2839_v57, %v2838_v53 }
 0x190   : > { %2537 = vmatmul.mubr.f32.gmra.mrb[76].mxu1 %v7301_v13  ;;  %6120 = vmatprep.subr.bf16.mxu0 %v6119_v62  ;;  %v2851_v13 = vld [vmem:[#allocation5 + $0xe58] sm:$0xff]  ;;  %v6171_v35 = vpack.c.bf16 %v2873_v37, %v2872_v21  ;;  %v7371_v57 = vld [vmem:[#allocation2 + $0x1a1] sm:$0xff] }
 0x191   : > { %6150 = vmatpush3.bf16.msra.mxu1 %v6149_v34  ;;  %2541 = vmatprep.mubr.f32.mxu1 %v7304_v59  ;;  %v6159_v54 = vpack.c.bf16 %v2851_v13, %v2850_v46  ;;  %v2906_v13 = vld [vmem:[#allocation5 + $0x1010] sm:$0xff] }
 0x192   : > { %2447 = vmatmul.mubr.f32.gmra.mrb[60].mxu0 %v7296_v26  ;;  %6152 = vmatprep.subr.bf16.mxu1 %v6151_v28  ;;  %v2173_v26 = vld [vmem:[#allocation5 + $0xd60] sm:$0xff]  ;;  %v2857_v28 = vld [vmem:[#allocation5 + $0xe88] sm:$0xff] }
 0x193   : > { %6122 = vmatpush3.bf16.msra.mxu0 %v6119_v62  ;;  %2451 = vmatprep.mubr.f32.mxu0 %v7333_v38  ;;  %v6131_v58 = vpack.c.bf16 %v2174_v50, %v2173_v26  ;;  %v2905_v62 = vld [vmem:[#allocation5 + $0x1008] sm:$0xff]  ;;  %v6173_v42 = vpack.c.bf16 %v2857_v28, %v2856_v8  ;;  %v6175_v26 = vpack.c.bf16 %v2875_v11, %v2874_v52  ;;  %v2858_v50 = vld [vmem:[#allocation5 + $0xe90] sm:$0xff]  ;;  %v2880_v11 = vld [vmem:[#allocation5 + $0xf40] sm:$0xff] }
 0x194   : > { %2542 = vmatmul.mubr.f32.gmra.mrb[78].mxu1 %v7308_v45  ;;  %6124 = vmatprep.subr.bf16.mxu0 %v6123_v55  ;;  %v2852_v45 = vld [vmem:[#allocation5 + $0xe60] sm:$0xff]  ;;  %v2862_v28 = vld [vmem:[#allocation5 + $0xeb0] sm:$0xff] }
 0x195   : > { %6154 = vmatpush3.bf16.msra.mxu1 %v6153_v7  ;;  %2546 = vmatprep.mubr.f32.mxu1 %v1958_v16  ;;  %v6163_v60 = vpack.c.bf16 %v2853_v2, %v2852_v45  ;;  %v6203_v7 = vpack.c.bf16 %v2905_v62, %v2904_v33  ;;  %v2876_v45 = vld [vmem:[#allocation5 + $0xf20] sm:$0xff]  ;;  %v2877_v2 = vld [vmem:[#allocation5 + $0xf28] sm:$0xff]  ;;  %v2910_v33 = vld [vmem:[#allocation5 + $0x1030] sm:$0xff] }
 0x196   : > { %2452 = vmatmul.mubr.f32.gmra.mrb[62].mxu0 %v7304_v59  ;;  %6156 = vmatprep.subr.bf16.mxu1 %v6155_v25  ;;  %v2175_v59 = vld [vmem:[#allocation5 + $0xd70] sm:$0xff]  ;;  %v2911_v62 = vld [vmem:[#allocation5 + $0x1038] sm:$0xff] }
 0x197   : > { %6126 = vmatpush3.bf16.msra.mxu0 %v6123_v55  ;;  %2456 = vmatprep.mubr.f32.mxu0 %v7352_v48  ;;  %v6135_v41 = vpack.c.bf16 %v2176_v3, %v2175_v59  ;;  %v2891_v59 = vld [vmem:[#allocation5 + $0xf98] sm:$0xff] }
 0x198   : > { %2547 = vmatmul.mubr.f32.gmra.mrb[80].mxu1 %v7329_v27  ;;  %6128 = vmatprep.subr.bf16.mxu0 %v6127_v49  ;;  %v2854_v27 = vld [vmem:[#allocation5 + $0xe70] sm:$0xff] }
 0x199   : > { %v4405_v61 = vpop.f32.mrb[0].mxu0  ;;  %6158 = vmatpush3.bf16.msra.mxu1 %v6157_v5  ;;  %2551 = vmatprep.mubr.f32.mxu1 %v1959_v51  ;;  %v6167_v18 = vpack.c.bf16 %v2855_v29, %v2854_v27  ;;  %v2859_v51 = vld [vmem:[#allocation5 + $0xe98] sm:$0xff]  ;;  %v2861_v27 = vld [vmem:[#allocation5 + $0xea8] sm:$0xff] }
 0x19a   : > { %v4455_v4 = vpop.f32.mrb[0].mxu1  ;;  %v4406_v14 = vpop.f32.mrb[1].mxu0  ;;  %2457 = vmatmul.mubr.f32.gmra.mrb[64].mxu0 %v1958_v16  ;;  %6160 = vmatprep.subr.bf16.mxu1 %v6159_v54  ;;  %v2889_v16 = vld [vmem:[#allocation5 + $0xf88] sm:$0xff]  ;;  %v2659_v54 = vld [vmem:[#allocation2 + $0x180] sm:$0xff] }
 0x19b   : > { %v4407_v0 = vadd.f32 %v4406_v14, %v4405_v61  ;;  %v4456_v12 = vpop.f32.mrb[1].mxu1  ;;  %6130 = vmatpush3.bf16.msra.mxu0 %v6127_v49  ;;  %5571 = vmatprep.mubr.f32.mxu0 %v7319_v56  ;;  %v2907_v49 = vld [vmem:[#allocation5 + $0x1018] sm:$0xff]  ;;  %v6205_v39 = vpack.c.bf16 %v2889_v16, %v2888_v40  ;;  %v6177_v14 = vpack.c.bf16 %v2859_v51, %v2858_v50  ;;  %v2894_v16 = vld [vmem:[#allocation5 + $0xfb0] sm:$0xff] }
 0x19c   : > { %v4457_v47 = vadd.f32 %v4456_v12, %v4455_v4  ;;  %2552 = vmatmul.mubr.f32.gmra.mrb[82].mxu1 %v1947_v23  ;;  %6132 = vmatprep.subr.bf16.mxu0 %v6131_v58  ;;  %v6207_v61 = vpack.c.bf16 %v2907_v49, %v2906_v13  ;;  %v7365_v4 = vld [vmem:[#allocation2 + $0x191] sm:$0xff]  ;;  %v2860_v12 = vld [vmem:[#allocation5 + $0xea0] sm:$0xff] }
 0x19d   : > { %6162 = vmatpush3.bf16.msra.mxu1 %v6161_v20  ;;  %v4408_v19 = vpop.f32.mrb[2].mxu0  ;;  %3032 = vmatprep.mubr.f32.mxu1 %v2671_v10  ;;  %v2890_v20 = vld [vmem:[#allocation5 + $0xf90] sm:$0xff]  ;;  %v2909_v10 = vld [vmem:[#allocation5 + $0x1028] sm:$0xff] }
 0x19e   : > { %v7358_v22 = vadd.f32 %v4457_v47, %v4407_v0  ;;  %6164 = vmatprep.subr.bf16.mxu1 %v6163_v60  ;;  %v4458_v24 = vpop.f32.mrb[2].mxu1  ;;  %v4409_v30 = vpop.f32.mrb[3].mxu0  ;;  %v6179_v0 = vpack.c.bf16 %v2877_v2, %v2876_v45  ;;  %v6209_v29 = vpack.c.bf16 %v2891_v59, %v2890_v20  ;;  %v6211_v37 = vpack.c.bf16 %v2909_v10, %v2908_v9  ;;  %v2882_v45 = vld [vmem:[#allocation5 + $0xf50] sm:$0xff]  ;;  %v2883_v2 = vld [vmem:[#allocation5 + $0xf58] sm:$0xff]  ;;  %v2896_v59 = vld [vmem:[#allocation5 + $0xfc0] sm:$0xff] }
 0x19f   : > { %6134 = vmatpush3.bf16.msra.mxu0 %v6131_v58  ;;  %v4410_v56 = vadd.f32 %v4409_v30, %v4408_v19  ;;  %v4459_v31 = vpop.f32.mrb[3].mxu1  ;;  %v2660_v19 = vld [vmem:[#allocation2 + $0x190] sm:$0xff]  ;;  %v6181_v30 = vpack.c.bf16 %v2861_v27, %v2860_v12  ;;  %v2915_v9 = vld [vmem:[#allocation5 + $0x1058] sm:$0xff]  ;;  %v6191_v10 = vpack.c.bf16 %v2883_v2, %v2882_v45  ;;  %v2884_v27 = vld [vmem:[#allocation5 + $0xf60] sm:$0xff] }
 0x1a0   : > { %6136 = vmatprep.subr.bf16.mxu0 %v6135_v41  ;;  %v4460_v34 = vadd.f32 %v4459_v31, %v4458_v24  ;;  %v2893_v24 = vld [vmem:[#allocation5 + $0xfa8] sm:$0xff]  ;;  %v2902_v2 = vld [vmem:[#allocation5 + $0xff0] sm:$0xff] }
 0x1a1   : > { %6166 = vmatpush3.bf16.msra.mxu1 %v6165_v32  ;;  %v4411_v1 = vpop.f32.mrb[4].mxu0  ;;  %v2879_v32 = vld [vmem:[#allocation5 + $0xf38] sm:$0xff] }
 0x1a2   : > { %6168 = vmatprep.subr.bf16.mxu1 %v6167_v18  ;;  %v7360_v55 = vadd.f32 %v4460_v34, %v4410_v56  ;;  %v4461_v15 = vpop.f32.mrb[4].mxu1  ;;  %v4412_v25 = vpop.f32.mrb[5].mxu0  ;;  %v1971_v34 = vld [vmem:[#allocation2 + $0x172] sm:$0xff] }
 0x1a3   : > { %6138 = vmatpush3.bf16.msra.mxu0 %v6135_v41  ;;  %v4413_v43 = vadd.f32 %v4412_v25, %v4411_v1  ;;  %v4462_v46 = vpop.f32.mrb[5].mxu1  ;;  %v2878_v41 = vld [vmem:[#allocation5 + $0xf30] sm:$0xff]  ;;  %v2895_v25 = vld [vmem:[#allocation5 + $0xfb8] sm:$0xff] }
 0x1a4   : > { %6172 = vmatprep.subr.bf16.mxu0 %v6171_v35  ;;  %v4463_v5 = vadd.f32 %v4462_v46, %v4461_v15  ;;  %v6183_v8 = vpack.c.bf16 %v2879_v32, %v2878_v41  ;;  %v2898_v32 = vld [vmem:[#allocation5 + $0xfd0] sm:$0xff] }
 0x1a5   : > { %6170 = vmatpush3.bf16.msra.mxu1 %v6169_v36  ;;  %v4414_v63 = vpop.f32.mrb[6].mxu0  ;;  %v2863_v36 = vld [vmem:[#allocation5 + $0xeb8] sm:$0xff] }
 0x1a6   : > { %5572 = vmatmul.mubr.f32.vlgmr.msra.gmra.mrb[24].mxu0 %v7323_v17  ;;  %6204 = vmatprep.subr.bf16.mxu1 %v6203_v7  ;;  %v7363_v58 = vadd.f32 %v4463_v5, %v4413_v43  ;;  %v4464_v23 = vpop.f32.mrb[6].mxu1  ;;  %v4415_v3 = vpop.f32.mrb[7].mxu0  ;;  %v7376_v7 = vld [vmem:[#allocation2 + $0x1a0] sm:$0xff]  ;;  %v7380_v43 = vld [vmem:[#allocation2 + $0x1b1] sm:$0xff]  ;;  %v6185_v46 = vpack.c.bf16 %v2863_v36, %v2862_v28 }
 0x1a7   : > { %6174 = vmatpush3.bf16.msra.mxu0 %v6173_v42  ;;  %v4416_v60 = vadd.f32 %v4415_v3, %v4414_v63  ;;  %v4465_v6 = vpop.f32.mrb[7].mxu1  ;;  %5574 = vmatprep.mubr.f32.mxu0 %v7327_v44  ;;  %v2892_v44 = vld [vmem:[#allocation5 + $0xfa0] sm:$0xff]  ;;  %v6217_v63 = vpack.c.bf16 %v2895_v25, %v2894_v16  ;;  %v2897_v3 = vld [vmem:[#allocation5 + $0xfc8] sm:$0xff]  ;;  %v2918_v16 = vld [vmem:[#allocation5 + $0x1070] sm:$0xff] }
 0x1a8   : > { %3033 = vmatmul.mubr.f32.vlgmr.msra.gmra.mrb[84].mxu1 %v2659_v54  ;;  %6176 = vmatprep.subr.bf16.mxu0 %v6175_v26  ;;  %v4466_v17 = vadd.f32 %v4465_v6, %v4464_v23  ;;  %v6213_v1 = vpack.c.bf16 %v2893_v24, %v2892_v44  ;;  %v2912_v5 = vld [vmem:[#allocation5 + $0x1040] sm:$0xff]  ;;  %v2913_v26 = vld [vmem:[#allocation5 + $0x1048] sm:$0xff]  ;;  %v2914_v6 = vld [vmem:[#allocation5 + $0x1050] sm:$0xff]  ;;  %v6221_v12 = vpack.c.bf16 %v2897_v3, %v2896_v59 }
 0x1a9   : > { %6206 = vmatpush3.bf16.msra.mxu1 %v6205_v39  ;;  %v4417_v47 = vpop.f32.mrb[8].mxu0  ;;  %3037 = vmatprep.mubr.f32.mxu1 %v7365_v4  ;;  %v2864_v54 = vld [vmem:[#allocation5 + $0xec0] sm:$0xff]  ;;  %v2865_v39 = vld [vmem:[#allocation5 + $0xec8] sm:$0xff]  ;;  %v6219_v20 = vpack.c.bf16 %v2913_v26, %v2912_v5  ;;  %v6223_v41 = vpack.c.bf16 %v2915_v9, %v2914_v6  ;;  %v2919_v25 = vld [vmem:[#allocation5 + $0x1078] sm:$0xff] }
 0x1aa   : > { %6208 = vmatprep.subr.bf16.mxu1 %v6207_v61  ;;  %v7369_v21 = vadd.f32 %v4466_v17, %v4416_v60  ;;  %v4467_v18 = vpop.f32.mrb[8].mxu1  ;;  %v4418_v53 = vpop.f32.mrb[9].mxu0  ;;  %5575 = vmatmul.mubr.f32.gmra.mrb[26].mxu0 %v7333_v38  ;;  %v2881_v38 = vld [vmem:[#allocation5 + $0xf48] sm:$0xff]  ;;  %v7384_v61 = vld [vmem:[#allocation2 + $0x1b0] sm:$0xff]  ;;  %v6189_v60 = vpack.c.bf16 %v2865_v39, %v2864_v54  ;;  %v2916_v44 = vld [vmem:[#allocation5 + $0x1060] sm:$0xff]  ;;  %v6231_v45 = vpack.c.bf16 %v2919_v25, %v2918_v16 }
 0x1ab   : > { %6178 = vmatpush3.bf16.msra.mxu0 %v6177_v14  ;;  %v4419_v56 = vadd.f32 %v4418_v53, %v4417_v47  ;;  %v4468_v31 = vpop.f32.mrb[9].mxu1  ;;  %5577 = vmatprep.mubr.f32.mxu0 %v7352_v48  ;;  %v6215_v48 = vpack.c.bf16 %v2911_v62, %v2910_v33  ;;  %v6187_v51 = vpack.c.bf16 %v2881_v38, %v2880_v11  ;;  %v7388_v14 = vld [vmem:[#allocation2 + $0x1c1] sm:$0xff]  ;;  %v2866_v17 = vld [vmem:[#allocation5 + $0xed0] sm:$0xff] }
 0x1ac   : > { %6180 = vmatprep.subr.bf16.mxu0 %v6179_v0  ;;  %v4469_v35 = vadd.f32 %v4468_v31, %v4467_v18  ;;  %3038 = vmatmul.mubr.f32.gmra.mrb[86].mxu1 %v2660_v19  ;;  %v2867_v0 = vld [vmem:[#allocation5 + $0xed8] sm:$0xff]  ;;  %v7392_v47 = vld [vmem:[#allocation2 + $0x1c0] sm:$0xff]  ;;  %v2917_v24 = vld [vmem:[#allocation5 + $0x1068] sm:$0xff] }
 0x1ad   : > { %6210 = vmatpush3.bf16.msra.mxu1 %v6209_v29  ;;  %v4420_v52 = vpop.f32.mrb[10].mxu0  ;;  %3042 = vmatprep.mubr.f32.mxu1 %v7371_v57  ;;  %v2885_v29 = vld [vmem:[#allocation5 + $0xf68] sm:$0xff]  ;;  %v6193_v18 = vpack.c.bf16 %v2867_v0, %v2866_v17  ;;  %v2886_v62 = vld [vmem:[#allocation5 + $0xf70] sm:$0xff]  ;;  %v6227_v36 = vpack.c.bf16 %v2917_v24, %v2916_v44 }
 0x1ae   : > { %6212 = vmatprep.subr.bf16.mxu1 %v6211_v37  ;;  %v7378_v15 = vadd.f32 %v4469_v35, %v4419_v56  ;;  %v4470_v40 = vpop.f32.mrb[10].mxu1  ;;  %v4421_v42 = vpop.f32.mrb[11].mxu0  ;;  %5578 = vmatmul.mubr.f32.gmra.mrb[28].mxu0 %v1971_v34  ;;  %v7394_v37 = vld [vmem:[#allocation2 + $0x1d1] sm:$0xff]  ;;  %v6195_v53 = vpack.c.bf16 %v2885_v29, %v2884_v27  ;;  %v2869_v56 = vld [vmem:[#allocation5 + $0xee8] sm:$0xff] }
 0x1af   : > { %6182 = vmatpush3.bf16.msra.mxu0 %v6181_v30  ;;  %v4422_v13 = vadd.f32 %v4421_v42, %v4420_v52  ;;  %v4471_v49 = vpop.f32.mrb[11].mxu1  ;;  %3127 = vmatprep.mubr.f32.mxu0 %v2660_v19  ;;  %v2899_v19 = vld [vmem:[#allocation5 + $0xfd8] sm:$0xff]  ;;  %v2868_v30 = vld [vmem:[#allocation5 + $0xee0] sm:$0xff]  ;;  %v7398_v35 = vld [vmem:[#allocation2 + $0x1d0] sm:$0xff] }
 0x1b0   : > { %6184 = vmatprep.subr.bf16.mxu0 %v6183_v8  ;;  %v4472_v50 = vadd.f32 %v4471_v49, %v4470_v40  ;;  %3043 = vmatmul.mubr.f32.gmra.mrb[88].mxu1 %v7376_v7  ;;  %v6225_v33 = vpack.c.bf16 %v2899_v19, %v2898_v32  ;;  %v2887_v34 = vld [vmem:[#allocation5 + $0xf78] sm:$0xff]  ;;  %v2901_v52 = vld [vmem:[#allocation5 + $0xfe8] sm:$0xff]  ;;  %v6197_v40 = vpack.c.bf16 %v2869_v56, %v2868_v30  ;;  %v2938_v29 = vld [vmem:[#allocation5 + $0x1110] sm:$0xff] }
 0x1b1   : > { %6214 = vmatpush3.bf16.msra.mxu1 %v6213_v1  ;;  %3047 = vmatprep.mubr.f32.mxu1 %v7380_v43  ;;  %v2900_v1 = vld [vmem:[#allocation5 + $0xfe0] sm:$0xff]  ;;  %v7400_v11 = vld [vmem:[#allocation2 + $0x192] sm:$0xff]  ;;  %v2937_v54 = vld [vmem:[#allocation5 + $0x1108] sm:$0xff] }
 0x1b2   : > { %6216 = vmatprep.subr.bf16.mxu1 %v6215_v48  ;;  %v7386_v23 = vadd.f32 %v4472_v50, %v4422_v13  ;;  %v2870_v13 = vld [vmem:[#allocation5 + $0xef0] sm:$0xff]  ;;  %v2871_v49 = vld [vmem:[#allocation5 + $0xef8] sm:$0xff]  ;;  %v6229_v50 = vpack.c.bf16 %v2901_v52, %v2900_v1  ;;  %v2921_v17 = vld [vmem:[#allocation5 + $0x1088] sm:$0xff] }
 0x1b3   : > { %6186 = vmatpush3.bf16.msra.mxu0 %v6185_v46  ;;  %v6199_v46 = vpack.c.bf16 %v2887_v34, %v2886_v62  ;;  %v6201_v6 = vpack.c.bf16 %v2871_v49, %v2870_v13  ;;  %v7411_v52 = vld [vmem:[#allocation2 + $0x1a2] sm:$0xff] }
 0x1b4   : > { %6188 = vmatprep.subr.bf16.mxu0 %v6187_v51  ;;  %3048 = vmatmul.mubr.f32.gmra.mrb[90].mxu1 %v7384_v61  ;;  %v2936_v51 = vld [vmem:[#allocation5 + $0x1100] sm:$0xff] }
 0x1b5   : > { %6218 = vmatpush3.bf16.msra.mxu1 %v6217_v63  ;;  %3052 = vmatprep.mubr.f32.mxu1 %v7388_v14  ;;  %v6235_v9 = vpack.c.bf16 %v2937_v54, %v2936_v51  ;;  %v7420_v54 = vld [vmem:[#allocation2 + $0x1b2] sm:$0xff] }
 0x1b6   : > { %6220 = vmatprep.subr.bf16.mxu1 %v6219_v20  ;;  %v2903_v20 = vld [vmem:[#allocation5 + $0xff8] sm:$0xff] }
 0x1b7   : > { %6190 = vmatpush3.bf16.msra.mxu0 %v6189_v60  ;;  %v6233_v27 = vpack.c.bf16 %v2903_v20, %v2902_v2  ;;  %v2926_v20 = vld [vmem:[#allocation5 + $0x10b0] sm:$0xff] }
 0x1b8   : > { %6192 = vmatprep.subr.bf16.mxu0 %v6191_v10  ;;  %3053 = vmatmul.mubr.f32.gmra.mrb[92].mxu1 %v7392_v47  ;;  %v2920_v10 = vld [vmem:[#allocation5 + $0x1080] sm:$0xff] }
 0x1b9   : > { %v4505_v31 = vpop.f32.mrb[12].mxu0  ;;  %6222 = vmatpush3.bf16.msra.mxu1 %v6221_v12  ;;  %3057 = vmatprep.mubr.f32.mxu1 %v7394_v37  ;;  %v6237_v30 = vpack.c.bf16 %v2921_v17, %v2920_v10  ;;  %v7429_v17 = vld [vmem:[#allocation2 + $0x1c2] sm:$0xff] }
 0x1ba   : > { %v4506_v8 = vpop.f32.mrb[13].mxu0  ;;  %v4555_v28 = vpop.f32.mrb[12].mxu1  ;;  %6224 = vmatprep.subr.bf16.mxu1 %v6223_v41  ;;  %v2939_v41 = vld [vmem:[#allocation5 + $0x1118] sm:$0xff] }
 0x1bb   : > { %v4507_v38 = vadd.f32 %v4506_v8, %v4505_v31  ;;  %6194 = vmatpush3.bf16.msra.mxu0 %v6193_v18  ;;  %v4556_v48 = vpop.f32.mrb[13].mxu1  ;;  %v6239_v31 = vpack.c.bf16 %v2939_v41, %v2938_v29  ;;  %v2940_v8 = vld [vmem:[#allocation5 + $0x1120] sm:$0xff] }
 0x1bc   : > { %v4557_v42 = vadd.f32 %v4556_v48, %v4555_v28  ;;  %6196 = vmatprep.subr.bf16.mxu0 %v6195_v53  ;;  %3058 = vmatmul.mubr.f32.gmra.mrb[94].mxu1 %v7398_v35  ;;  %v2683_v53 = vld [vmem:[#allocation2 + $0x182] sm:$0xff] }
 0x1bd   : > { %v1174_v5 = vadd.f32 %v4507_v38, %v7358_v22  ;;  %v4508_v26 = vpop.f32.mrb[14].mxu0  ;;  %6226 = vmatpush3.bf16.msra.mxu1 %v6225_v33  ;;  %3222 = vmatprep.mubr.f32.mxu1 %v7400_v11  ;;  %v2922_v33 = vld [vmem:[#allocation5 + $0x1090] sm:$0xff]  ;;  %v2941_v28 = vld [vmem:[#allocation5 + $0x1128] sm:$0xff] }
 0x1be   : > { %v4509_v39 = vpop.f32.mrb[15].mxu0  ;;  %v4558_v63 = vpop.f32.mrb[14].mxu1  ;;  %6228 = vmatprep.subr.bf16.mxu1 %v6227_v36 }
 0x1bf   : > { %v7405_v59 = vadd.f32 %v4557_v42, %v1174_v5  ;;  %v4510_v3 = vadd.f32 %v4509_v39, %v4508_v26  ;;  %6198 = vmatpush3.bf16.msra.mxu0 %v6197_v40  ;;  %v4559_v60 = vpop.f32.mrb[15].mxu1  ;;  %v2924_v42 = vld [vmem:[#allocation5 + $0x10a0] sm:$0xff]  ;;  %v2942_v5 = vld [vmem:[#allocation5 + $0x1130] sm:$0xff]  ;;  %v2943_v26 = vld [vmem:[#allocation5 + $0x1138] sm:$0xff] }
 0x1c0   : > { %v4560_v22 = vadd.f32 %v4559_v60, %v4558_v63  ;;  %6200 = vmatprep.subr.bf16.mxu0 %v6199_v46  ;;  %v2925_v46 = vld [vmem:[#allocation5 + $0x10a8] sm:$0xff]  ;;  %v6247_v2 = vpack.c.bf16 %v2943_v26, %v2942_v5  ;;  %v2934_v26 = vld [vmem:[#allocation5 + $0x10f0] sm:$0xff] }
 0x1c1   : > { %v1179_v0 = vadd.f32 %v4510_v3, %v7360_v55  ;;  %v4511_v12 = vpop.f32.mrb[16].mxu0  ;;  %6230 = vmatpush3.bf16.msra.mxu1 %v6229_v50  ;;  %v2923_v55 = vld [vmem:[#allocation5 + $0x1098] sm:$0xff] }
 0x1c2   : > { %v4512_v32 = vpop.f32.mrb[17].mxu0  ;;  %v4561_v19 = vpop.f32.mrb[16].mxu1  ;;  %6232 = vmatprep.subr.bf16.mxu1 %v6231_v45  ;;  %v6241_v16 = vpack.c.bf16 %v2923_v55, %v2922_v33  ;;  %v6245_v45 = vpack.c.bf16 %v2925_v46, %v2924_v42  ;;  %v2927_v3 = vld [vmem:[#allocation5 + $0x10b8] sm:$0xff]  ;;  %v2930_v55 = vld [vmem:[#allocation5 + $0x10d0] sm:$0xff] }
 0x1c3   : > { %v7408_v18 = vadd.f32 %v4560_v22, %v1179_v0  ;;  %v4513_v44 = vadd.f32 %v4512_v32, %v4511_v12  ;;  %6202 = vmatpush3.bf16.msra.mxu0 %v6201_v6  ;;  %v4562_v24 = vpop.f32.mrb[17].mxu1  ;;  %v2944_v6 = vld [vmem:[#allocation5 + $0x1140] sm:$0xff]  ;;  %v2945_v22 = vld [vmem:[#allocation5 + $0x1148] sm:$0xff]  ;;  %v6249_v29 = vpack.c.bf16 %v2927_v3, %v2926_v20 }
 0x1c4   : > { %v4563_v56 = vadd.f32 %v4562_v24, %v4561_v19  ;;  %6236 = vmatprep.subr.bf16.mxu0 %v6235_v9  ;;  %v6251_v41 = vpack.c.bf16 %v2945_v22, %v2944_v6  ;;  %v2928_v32 = vld [vmem:[#allocation5 + $0x10c0] sm:$0xff]  ;;  %v2929_v19 = vld [vmem:[#allocation5 + $0x10c8] sm:$0xff]  ;;  %v2946_v24 = vld [vmem:[#allocation5 + $0x1150] sm:$0xff] }
 0x1c5   : > { %v1184_v62 = vadd.f32 %v4513_v44, %v7363_v58  ;;  %v4514_v34 = vpop.f32.mrb[18].mxu0  ;;  %6234 = vmatpush3.bf16.msra.mxu1 %v6233_v27  ;;  %v6243_v58 = vpack.c.bf16 %v2941_v28, %v2940_v8  ;;  %v2949_v8 = vld [vmem:[#allocation5 + $0x1168] sm:$0xff] }
 0x1c6   : > { %v4515_v36 = vpop.f32.mrb[19].mxu0  ;;  %3128 = vmatmul.mubr.f32.vlgmr.msra.gmra.mrb[66].mxu0 %v2683_v53  ;;  %v4564_v1 = vpop.f32.mrb[18].mxu1  ;;  %v2947_v53 = vld [vmem:[#allocation5 + $0x1158] sm:$0xff]  ;;  %v7448_v28 = vld [vmem:[#allocation2 + $0x1e2] sm:$0xff] }
 0x1c7   : > { %v7413_v38 = vadd.f32 %v4563_v56, %v1184_v62  ;;  %v4516_v48 = vadd.f32 %v4515_v36, %v4514_v34  ;;  %6238 = vmatpush3.bf16.msra.mxu0 %v6237_v30  ;;  %v4565_v40 = vpop.f32.mrb[19].mxu1  ;;  %3132 = vmatprep.mubr.f32.mxu0 %v7376_v7  ;;  %v7438_v30 = vld [vmem:[#allocation2 + $0x1d2] sm:$0xff]  ;;  %v6255_v33 = vpack.c.bf16 %v2947_v53, %v2946_v24  ;;  %v2948_v34 = vld [vmem:[#allocation5 + $0x1160] sm:$0xff] }
 0x1c8   : > { %v4566_v25 = vadd.f32 %v4565_v40, %v4564_v1  ;;  %3223 = vmatmul.mubr.f32.vlgmr.msra.gmra.mrb[96].mxu1 %v7365_v4  ;;  %6240 = vmatprep.subr.bf16.mxu0 %v6239_v31  ;;  %v6253_v31 = vpack.c.bf16 %v2929_v19, %v2928_v32  ;;  %v2931_v62 = vld [vmem:[#allocation5 + $0x10d8] sm:$0xff]  ;;  %v6259_v1 = vpack.c.bf16 %v2949_v8, %v2948_v34  ;;  %v2933_v40 = vld [vmem:[#allocation5 + $0x10e8] sm:$0xff]  ;;  %v2958_v32 = vld [vmem:[#allocation5 + $0x11b0] sm:$0xff] }
 0x1c9   : > { %v1189_v13 = vadd.f32 %v4516_v48, %v7369_v21  ;;  %v4517_v49 = vpop.f32.mrb[20].mxu0  ;;  %3227 = vmatprep.mubr.f32.mxu1 %v7411_v52  ;;  %v6257_v36 = vpack.c.bf16 %v2931_v62, %v2930_v55  ;;  %v2932_v48 = vld [vmem:[#allocation5 + $0x10e0] sm:$0xff]  ;;  %v2959_v19 = vld [vmem:[#allocation5 + $0x11b8] sm:$0xff]  ;;  %v2962_v34 = vld [vmem:[#allocation5 + $0x11d0] sm:$0xff] }
 0x1ca   : > { %v4518_v50 = vpop.f32.mrb[21].mxu0  ;;  %v4567_v51 = vpop.f32.mrb[20].mxu1  ;;  %3133 = vmatmul.mubr.f32.gmra.mrb[68].mxu0 %v7400_v11  ;;  %v6279_v53 = vpack.c.bf16 %v2959_v19, %v2958_v32 }
 0x1cb   : > { %v7422_v39 = vadd.f32 %v4566_v25, %v1189_v13  ;;  %v4519_v4 = vadd.f32 %v4518_v50, %v4517_v49  ;;  %6242 = vmatpush3.bf16.msra.mxu0 %v6241_v16  ;;  %v4568_v63 = vpop.f32.mrb[21].mxu1  ;;  %3137 = vmatprep.mubr.f32.mxu0 %v7384_v61  ;;  %v2950_v16 = vld [vmem:[#allocation5 + $0x1170] sm:$0xff]  ;;  %v2951_v25 = vld [vmem:[#allocation5 + $0x1178] sm:$0xff]  ;;  %v6261_v13 = vpack.c.bf16 %v2933_v40, %v2932_v48 }
 0x1cc   : > { %v4569_v21 = vadd.f32 %v4568_v63, %v4567_v51  ;;  %6244 = vmatprep.subr.bf16.mxu0 %v6243_v58  ;;  %3228 = vmatmul.mubr.f32.gmra.mrb[98].mxu1 %v7371_v57  ;;  %v7453_v58 = vld [vmem:[#allocation2 + $0x1e1] sm:$0xff]  ;;  %v6263_v5 = vpack.c.bf16 %v2951_v25, %v2950_v16  ;;  %v2935_v50 = vld [vmem:[#allocation5 + $0x10f8] sm:$0xff] }
 0x1cd   : > { %v1194_v60 = vadd.f32 %v4519_v4, %v7378_v15  ;;  %v4520_v11 = vpop.f32.mrb[22].mxu0  ;;  %3232 = vmatprep.mubr.f32.mxu1 %v7420_v54  ;;  %v2952_v51 = vld [vmem:[#allocation5 + $0x1180] sm:$0xff]  ;;  %v2953_v4 = vld [vmem:[#allocation5 + $0x1188] sm:$0xff]  ;;  %v2967_v16 = vld [vmem:[#allocation5 + $0x11f8] sm:$0xff] }
 0x1ce   : > { %v4521_v9 = vpop.f32.mrb[23].mxu0  ;;  %v4570_v10 = vpop.f32.mrb[22].mxu1  ;;  %3138 = vmatmul.mubr.f32.gmra.mrb[70].mxu0 %v7411_v52  ;;  %v6267_v3 = vpack.c.bf16 %v2953_v4, %v2952_v51 }
 0x1cf   : > { %v7431_v0 = vadd.f32 %v4569_v21, %v1194_v60  ;;  %v4522_v12 = vadd.f32 %v4521_v9, %v4520_v11  ;;  %6246 = vmatpush3.bf16.msra.mxu0 %v6245_v45  ;;  %v4571_v27 = vpop.f32.mrb[23].mxu1  ;;  %3142 = vmatprep.mubr.f32.mxu0 %v7392_v47  ;;  %v2955_v60 = vld [vmem:[#allocation5 + $0x1198] sm:$0xff] }
 0x1d0   : > { %v4572_v15 = vadd.f32 %v4571_v27, %v4570_v10  ;;  %6248 = vmatprep.subr.bf16.mxu0 %v6247_v2  ;;  %3233 = vmatmul.mubr.f32.gmra.mrb[100].mxu1 %v7380_v43  ;;  %v6265_v2 = vpack.c.bf16 %v2935_v50, %v2934_v26 }
 0x1d1   : > { %v1199_v44 = vadd.f32 %v4522_v12, %v7386_v23  ;;  %3237 = vmatprep.mubr.f32.mxu1 %v7429_v17  ;;  %v7444_v23 = vld [vmem:[#allocation2 + $0x1e0] sm:$0xff]  ;;  %v2957_v12 = vld [vmem:[#allocation5 + $0x11a8] sm:$0xff] }
 0x1d2   : > { %3143 = vmatmul.mubr.f32.gmra.mrb[72].mxu0 %v7420_v54 }
 0x1d3   : > { %v7440_v56 = vadd.f32 %v4572_v15, %v1199_v44  ;;  %6250 = vmatpush3.bf16.msra.mxu0 %v6249_v29  ;;  %3147 = vmatprep.mubr.f32.mxu0 %v7398_v35 }
 0x1d4   : > { %6252 = vmatprep.subr.bf16.mxu0 %v6251_v41  ;;  %3238 = vmatmul.mubr.f32.gmra.mrb[102].mxu1 %v7388_v14 }
 0x1d5   : > { %3242 = vmatprep.mubr.f32.mxu1 %v7438_v30 }
 0x1d6   : > { %3148 = vmatmul.mubr.f32.gmra.mrb[74].mxu0 %v7429_v17 }
 0x1d7   : > { %6254 = vmatpush3.bf16.msra.mxu0 %v6253_v31  ;;  %3152 = vmatprep.mubr.f32.mxu0 %v7444_v23  ;;  %v2960_v31 = vld [vmem:[#allocation5 + $0x11c0] sm:$0xff] }
 0x1d8   : > { %6256 = vmatprep.subr.bf16.mxu0 %v6255_v33  ;;  %3243 = vmatmul.mubr.f32.gmra.mrb[104].mxu1 %v7394_v37 }
 0x1d9   : > { %3247 = vmatprep.mubr.f32.mxu1 %v7448_v28 }
 0x1da   : > { %v4627_v42 = vpop.f32.mrb[24].mxu1  ;;  %3153 = vmatmul.mubr.f32.gmra.mrb[76].mxu0 %v7438_v30 }
 0x1db   : > { %v4628_v46 = vpop.f32.mrb[25].mxu1  ;;  %6258 = vmatpush3.bf16.msra.mxu0 %v6257_v36  ;;  %3317 = vmatprep.mubr.f32.mxu0 %v7371_v57  ;;  %v2954_v57 = vld [vmem:[#allocation5 + $0x1190] sm:$0xff]  ;;  %v2964_v36 = vld [vmem:[#allocation5 + $0x11e0] sm:$0xff] }
 0x1dc   : > { %v4629_v49 = vadd.f32 %v4628_v46, %v4627_v42  ;;  %6260 = vmatprep.subr.bf16.mxu0 %v6259_v1  ;;  %3248 = vmatmul.mubr.f32.gmra.mrb[106].mxu1 %v7453_v58  ;;  %v6271_v10 = vpack.c.bf16 %v2955_v60, %v2954_v57  ;;  %v2965_v1 = vld [vmem:[#allocation5 + $0x11e8] sm:$0xff] }
 0x1dd   : > { %v6291_v48 = vpack.c.bf16 %v2965_v1, %v2964_v36 }
 0x1de   : > { %v7459_v63 = vadd.f32 %v4629_v49, %v7405_v59  ;;  %v4630_v45 = vpop.f32.mrb[26].mxu1  ;;  %v2956_v59 = vld [vmem:[#allocation5 + $0x11a0] sm:$0xff] }
 0x1df   : > { %v4631_v21 = vpop.f32.mrb[27].mxu1  ;;  %6262 = vmatpush3.bf16.msra.mxu0 %v6261_v13  ;;  %v6275_v41 = vpack.c.bf16 %v2957_v12, %v2956_v59 }
 0x1e0   : > { %v4632_v20 = vadd.f32 %v4631_v21, %v4630_v45  ;;  %6264 = vmatprep.subr.bf16.mxu0 %v6263_v5 }
 0x1e2   : > { %v7462_v11 = vadd.f32 %v4632_v20, %v7408_v18  ;;  %v4633_v6 = vpop.f32.mrb[28].mxu1 }
 0x1e3   : > { %v4634_v22 = vpop.f32.mrb[29].mxu1  ;;  %6266 = vmatpush3.bf16.msra.mxu0 %v6265_v2 }
 0x1e4   : > { %v4635_v9 = vadd.f32 %v4634_v22, %v4633_v6  ;;  %6268 = vmatprep.subr.bf16.mxu0 %v6267_v3 }
 0x1e6   : > { %v7465_v27 = vadd.f32 %v4635_v9, %v7413_v38  ;;  %v4636_v29 = vpop.f32.mrb[30].mxu1  ;;  %3318 = vmatmul.mubr.f32.vlgmr.msra.gmra.mrb[78].mxu0 %v7376_v7 }
 0x1e7   : > { %v4637_v15 = vpop.f32.mrb[31].mxu1  ;;  %6270 = vmatpush3.bf16.msra.mxu0 %v6267_v3  ;;  %3322 = vmatprep.mubr.f32.mxu0 %v7380_v43  ;;  %v2961_v43 = vld [vmem:[#allocation5 + $0x11c8] sm:$0xff] }
 0x1e8   : > { %v4638_v18 = vadd.f32 %v4637_v15, %v4636_v29  ;;  %6272 = vmatprep.subr.bf16.mxu0 %v6271_v10  ;;  %v6283_v62 = vpack.c.bf16 %v2961_v43, %v2960_v31 }
 0x1ea   : > { %v7470_v44 = vadd.f32 %v4638_v18, %v7422_v39  ;;  %v4639_v24 = vpop.f32.mrb[32].mxu1  ;;  %3323 = vmatmul.mubr.f32.gmra.mrb[80].mxu0 %v7384_v61 }
 0x1eb   : > { %v4640_v38 = vpop.f32.mrb[33].mxu1  ;;  %6274 = vmatpush3.bf16.msra.mxu0 %v6271_v10  ;;  %3327 = vmatprep.mubr.f32.mxu0 %v7388_v14  ;;  %v2963_v14 = vld [vmem:[#allocation5 + $0x11d8] sm:$0xff] }
 0x1ec   : > { %v4641_v7 = vadd.f32 %v4640_v38, %v4639_v24  ;;  %6276 = vmatprep.subr.bf16.mxu0 %v6275_v41 }
 0x1ee   : > { %v7475_v33 = vadd.f32 %v4641_v7, %v7431_v0  ;;  %v4642_v55 = vpop.f32.mrb[34].mxu1  ;;  %3328 = vmatmul.mubr.f32.gmra.mrb[82].mxu0 %v7392_v47  ;;  %v2750_v0 = vld [vmem:[#allocation2 + $0x1f1] sm:$0xff]  ;;  %v6287_v47 = vpack.c.bf16 %v2963_v14, %v2962_v34 }
 0x1ef   : > { %v4643_v39 = vpop.f32.mrb[35].mxu1  ;;  %6278 = vmatpush3.bf16.msra.mxu0 %v6275_v41  ;;  %3332 = vmatprep.mubr.f32.mxu0 %v7394_v37  ;;  %v2738_v37 = vld [vmem:[#allocation2 + $0x1f0] sm:$0xff] }
 0x1f0   : > { %v4644_v61 = vadd.f32 %v4643_v39, %v4642_v55  ;;  %6280 = vmatprep.subr.bf16.mxu0 %v6279_v53 }
 0x1f2   : > { %v7480_v8 = vadd.f32 %v4644_v61, %v7440_v56  ;;  %3333 = vmatmul.mubr.f32.gmra.mrb[84].mxu0 %v7398_v35  ;;  %v2966_v56 = vld [vmem:[#allocation5 + $0x11f0] sm:$0xff] }
 0x1f3   : > { %6282 = vmatpush3.bf16.msra.mxu0 %v6279_v53  ;;  %3337 = vmatprep.mubr.f32.mxu0 %v7453_v58  ;;  %v6295_v13 = vpack.c.bf16 %v2967_v16, %v2966_v56 }
 0x1f4   : > { %6284 = vmatprep.subr.bf16.mxu0 %v6283_v62 }
 0x1f6   : > { %3338 = vmatmul.mubr.f32.gmra.mrb[86].mxu0 %v7444_v23 }
 0x1f7   : > { %6286 = vmatpush3.bf16.msra.mxu0 %v6283_v62  ;;  %3342 = vmatprep.mubr.f32.mxu0 %v2750_v0 }
 0x1f8   : > { %6288 = vmatprep.subr.bf16.mxu0 %v6287_v47 }
 0x1f9   : > { %v4677_v40 = vpop.f32.mrb[30].mxu0 }
 0x1fa   : > { %v4678_v25 = vpop.f32.mrb[31].mxu0  ;;  %3343 = vmatmul.mubr.f32.gmra.mrb[88].mxu0 %v2738_v37  ;;  %v4727_v35 = vpop.f32.mrb[36].mxu1 }
 0x1fb   : > { %v4679_v42 = vadd.f32 %v4678_v25, %v4677_v40  ;;  %6290 = vmatpush3.bf16.msra.mxu0 %v6287_v47  ;;  %v4728_v58 = vpop.f32.mrb[37].mxu1  ;;  %5612 = vmatprep.mubr.f32.mxu0 %v7411_v52 }
 0x1fc   : > { %v4729_v46 = vadd.f32 %v4728_v58, %v4727_v35  ;;  %6292 = vmatprep.subr.bf16.mxu0 %v6291_v48 }
 0x1fd   : > { %v6483_v23 = vadd.f32 %v7459_v63, %v4679_v42  ;;  %v4680_v49 = vpop.f32.mrb[32].mxu0 }
 0x1fe   : > { %v4681_v5 = vpop.f32.mrb[33].mxu0  ;;  %v4730_v26 = vpop.f32.mrb[38].mxu1 }
 0x1ff   : > { %v6484_v50 = vadd.f32 %v6483_v23, %v4729_v46  ;;  %v4682_v51 = vadd.f32 %v4681_v5, %v4680_v49  ;;  %6294 = vmatpush3.bf16.msra.mxu0 %v6291_v48  ;;  %v4731_v4 = vpop.f32.mrb[39].mxu1 }
 0x200   : > { %v4732_v45 = vadd.f32 %v4731_v4, %v4730_v26  ;;  %6296 = vmatprep.subr.bf16.mxu0 %v6295_v13 }
 0x201   : > { %v6476_v21 = vadd.f32 %v7462_v11, %v4682_v51  ;;  %v4683_v2 = vpop.f32.mrb[34].mxu0 }
 0x202   : > { %v4684_v20 = vpop.f32.mrb[35].mxu0  ;;  %v4733_v3 = vpop.f32.mrb[40].mxu1 }
 0x203   : > { %v6477_v52 = vadd.f32 %v6476_v21, %v4732_v45  ;;  %v4685_v57 = vadd.f32 %v4684_v20, %v4683_v2  ;;  %6298 = vmatpush3.bf16.msra.mxu0 %v6295_v13  ;;  %v4734_v60 = vpop.f32.mrb[41].mxu1 }
 0x204   : > { %v4735_v6 = vadd.f32 %v4734_v60, %v4733_v3 }
 0x205   : > { %v6497_v63 = vadd.f32 %v7465_v27, %v4685_v57  ;;  %v4686_v22 = vpop.f32.mrb[36].mxu0 }
 0x206   : > { %v4687_v9 = vpop.f32.mrb[37].mxu0  ;;  %5613 = vmatmul.mubr.f32.vlgmr.msra.gmra.mrb[24].mxu0 %v7420_v54  ;;  %v4736_v10 = vpop.f32.mrb[42].mxu1  ;;  %v2762_v54 = vld [vmem:[#allocation2 + $0x1f2] sm:$0xff] }
 0x207   : > { %v6498_v59 = vadd.f32 %v6497_v63, %v4735_v6  ;;  %v4688_v12 = vadd.f32 %v4687_v9, %v4686_v22  ;;  %v4737_v29 = vpop.f32.mrb[43].mxu1  ;;  %5615 = vmatprep.mubr.f32.mxu0 %v7429_v17 }
 0x208   : > { %v4738_v11 = vadd.f32 %v4737_v29, %v4736_v10 }
 0x209   : > { %v6490_v15 = vadd.f32 %v7470_v44, %v4688_v12  ;;  %v4689_v18 = vpop.f32.mrb[38].mxu0 }
 0x20a   : > { %v4690_v41 = vpop.f32.mrb[39].mxu0  ;;  %5616 = vmatmul.mubr.f32.gmra.mrb[26].mxu0 %v7438_v30  ;;  %v4739_v32 = vpop.f32.mrb[44].mxu1 }
 0x20b   : > { %v6491_v19 = vadd.f32 %v6490_v15, %v4738_v11  ;;  %v4691_v27 = vadd.f32 %v4690_v41, %v4689_v18  ;;  %v4740_v24 = vpop.f32.mrb[45].mxu1  ;;  %5618 = vmatprep.mubr.f32.mxu0 %v7448_v28 }
 0x20c   : > { %v4741_v38 = vadd.f32 %v4740_v24, %v4739_v32 }
 0x20d   : > { %v6511_v7 = vadd.f32 %v7475_v33, %v4691_v27  ;;  %v4692_v53 = vpop.f32.mrb[40].mxu0 }
 0x20e   : > { %v4693_v31 = vpop.f32.mrb[41].mxu0  ;;  %5619 = vmatmul.mubr.f32.gmra.mrb[28].mxu0 %v2762_v54  ;;  %v4742_v17 = vpop.f32.mrb[46].mxu1 }
 0x20f   : > { %v6512_v43 = vadd.f32 %v6511_v7, %v4741_v38  ;;  %v4694_v44 = vadd.f32 %v4693_v31, %v4692_v53  ;;  %v4743_v55 = vpop.f32.mrb[47].mxu1 }
 0x210   : > { %v4744_v39 = vadd.f32 %v4743_v55, %v4742_v17 }
 0x211   : > { %v6504_v30 = vadd.f32 %v7480_v8, %v4694_v44 }
 0x213   : > { %v6505_v61 = vadd.f32 %v6504_v30, %v4744_v39 }
 0x219   : > { %v4777_v62 = vpop.f32.mrb[42].mxu0 }
 0x21a   : > { %v4778_v34 = vpop.f32.mrb[43].mxu0 }
 0x21b   : > { %v4779_v14 = vadd.f32 %v4778_v34, %v4777_v62  ;;  %v4849_v0 = vpop.f32.mrb[48].mxu1 }
 0x21c   : > { %v4850_v28 = vpop.f32.mrb[49].mxu1 }
 0x21d   : > { %v7496_v47 = vadd.f32 %v6484_v50, %v4779_v14  ;;  %v4780_v36 = vpop.f32.mrb[44].mxu0  ;;  %v4851_v33 = vadd.f32 %v4850_v28, %v4849_v0 }
 0x21e   : > { %v4781_v1 = vpop.f32.mrb[45].mxu0 }
 0x21f   : > { %v4782_v37 = vadd.f32 %v4781_v1, %v4780_v36  ;;  %v4852_v48 = vpop.f32.mrb[50].mxu1 }
 0x220   : > { %v4853_v40 = vpop.f32.mrb[51].mxu1 }
 0x221   : > { %v7498_v56 = vadd.f32 %v6477_v52, %v4782_v37  ;;  %v4783_v16 = vpop.f32.mrb[46].mxu0  ;;  %v4854_v25 = vadd.f32 %v4853_v40, %v4852_v48 }
 0x222   : > { %v4784_v35 = vpop.f32.mrb[47].mxu0 }
 0x223   : > { %v4785_v8 = vadd.f32 %v4784_v35, %v4783_v16  ;;  %v4855_v42 = vpop.f32.mrb[52].mxu1 }
 0x224   : > { %v4856_v58 = vpop.f32.mrb[53].mxu1 }
 0x225   : > { %v7500_v46 = vadd.f32 %v6498_v59, %v4785_v8  ;;  %v4786_v13 = vpop.f32.mrb[48].mxu0  ;;  %v4857_v23 = vadd.f32 %v4856_v58, %v4855_v42 }
 0x226   : > { %v4787_v49 = vpop.f32.mrb[49].mxu0 }
 0x227   : > { %v4788_v5 = vadd.f32 %v4787_v49, %v4786_v13  ;;  %v4858_v26 = vpop.f32.mrb[54].mxu1 }
 0x228   : > { %v4859_v50 = vpop.f32.mrb[55].mxu1 }
 0x229   : > { %v7502_v51 = vadd.f32 %v6491_v19, %v4788_v5  ;;  %v4789_v4 = vpop.f32.mrb[50].mxu0  ;;  %v4860_v45 = vadd.f32 %v4859_v50, %v4858_v26 }
 0x22a   : > { %v4790_v21 = vpop.f32.mrb[51].mxu0 }
 0x22b   : > { %v4791_v2 = vadd.f32 %v4790_v21, %v4789_v4  ;;  %v4861_v20 = vpop.f32.mrb[56].mxu1 }
 0x22c   : > { %v4862_v3 = vpop.f32.mrb[57].mxu1 }
 0x22d   : > { %v7504_v52 = vadd.f32 %v6512_v43, %v4791_v2  ;;  %v4792_v57 = vpop.f32.mrb[52].mxu0  ;;  %v4863_v60 = vadd.f32 %v4862_v3, %v4861_v20 }
 0x22e   : > { %v4793_v6 = vpop.f32.mrb[53].mxu0 }
 0x22f   : > { %v4794_v63 = vadd.f32 %v4793_v6, %v4792_v57  ;;  %v4864_v22 = vpop.f32.mrb[58].mxu1 }
 0x230   : > { %v4865_v9 = vpop.f32.mrb[59].mxu1 }
 0x231   : > { %v7506_v10 = vadd.f32 %v6505_v61, %v4794_v63  ;;  %v4866_v59 = vadd.f32 %v4865_v9, %v4864_v22 }
 0x23b   : > { %v4899_v12 = vpop.f32.mrb[60].mxu1 }
 0x23c   : > { %v4900_v29 = vpop.f32.mrb[61].mxu1 }
 0x23d   : > { %v4901_v11 = vadd.f32 %v4900_v29, %v4899_v12 }
 0x23f   : > { %v2339_v15 = vadd.f32 %v4901_v11, %v4851_v33  ;;  %v4902_v18 = vpop.f32.mrb[62].mxu1 }
 0x240   : > { %v4903_v41 = vpop.f32.mrb[63].mxu1 }
 0x241   : > { %v4904_v32 = vadd.f32 %v4903_v41, %v4902_v18 }
 0x243   : > { %v2344_v19 = vadd.f32 %v4904_v32, %v4854_v25  ;;  %v4905_v27 = vpop.f32.mrb[64].mxu1 }
 0x244   : > { %v4906_v24 = vpop.f32.mrb[65].mxu1 }
 0x245   : > { %v4907_v54 = vadd.f32 %v4906_v24, %v4905_v27 }
 0x247   : > { %v2349_v38 = vadd.f32 %v4907_v54, %v4857_v23  ;;  %v4908_v7 = vpop.f32.mrb[66].mxu1 }
 0x248   : > { %v4909_v53 = vpop.f32.mrb[67].mxu1 }
 0x249   : > { %v4910_v31 = vadd.f32 %v4909_v53, %v4908_v7 }
 0x24b   : > { %v2354_v17 = vadd.f32 %v4910_v31, %v4860_v45  ;;  %v4911_v43 = vpop.f32.mrb[68].mxu1 }
 0x24c   : > { %v4912_v44 = vpop.f32.mrb[69].mxu1 }
 0x24d   : > { %v4913_v55 = vadd.f32 %v4912_v44, %v4911_v43 }
 0x24f   : > { %v2359_v39 = vadd.f32 %v4913_v55, %v4863_v60  ;;  %v4914_v30 = vpop.f32.mrb[70].mxu1 }
 0x250   : > { %v4915_v61 = vpop.f32.mrb[71].mxu1 }
 0x251   : > { %v4916_v62 = vadd.f32 %v4915_v61, %v4914_v30 }
 0x253   : > { %v2364_v34 = vadd.f32 %v4916_v62, %v4866_v59 }
 0x259   : > { %v4949_v14 = vpop.f32.mrb[54].mxu0 }
 0x25a   : > { %v4950_v0 = vpop.f32.mrb[55].mxu0 }
 0x25b   : > { %v4951_v28 = vadd.f32 %v4950_v0, %v4949_v14  ;;  %v4999_v36 = vpop.f32.mrb[72].mxu1 }
 0x25c   : > { %v5000_v33 = vpop.f32.mrb[73].mxu1 }
 0x25d   : > { %v2434_v1 = vadd.f32 %v4951_v28, %v2339_v15  ;;  %v5001_v37 = vadd.f32 %v5000_v33, %v4999_v36  ;;  %v4952_v48 = vpop.f32.mrb[56].mxu0 }
 0x25e   : > { %v4953_v40 = vpop.f32.mrb[57].mxu0 }
 0x25f   : > { %v2529_v16 = vadd.f32 %v5001_v37, %v2434_v1  ;;  %v4954_v25 = vadd.f32 %v4953_v40, %v4952_v48  ;;  %v5002_v35 = vpop.f32.mrb[74].mxu1 }
 0x260   : > { %v5003_v8 = vpop.f32.mrb[75].mxu1 }
 0x261   : > { %v2439_v42 = vadd.f32 %v4954_v25, %v2344_v19  ;;  %v5004_v58 = vadd.f32 %v5003_v8, %v5002_v35  ;;  %v4955_v13 = vpop.f32.mrb[58].mxu0  ;;  %v7509_v23 = vadd.f32 %v7496_v47, %v2529_v16 }
 0x262   : > { %v4956_v49 = vpop.f32.mrb[59].mxu0 }
 0x263   : > { %v2534_v5 = vadd.f32 %v5004_v58, %v2439_v42  ;;  %v4957_v26 = vadd.f32 %v4956_v49, %v4955_v13  ;;  %v5005_v50 = vpop.f32.mrb[76].mxu1 }
 0x264   : > { %v5006_v4 = vpop.f32.mrb[77].mxu1 }
 0x265   : > { %v2444_v45 = vadd.f32 %v4957_v26, %v2349_v38  ;;  %v5007_v21 = vadd.f32 %v5006_v4, %v5005_v50  ;;  %v4958_v2 = vpop.f32.mrb[60].mxu0  ;;  %v7512_v20 = vadd.f32 %v7498_v56, %v2534_v5 }
 0x266   : > { %v4959_v3 = vpop.f32.mrb[61].mxu0 }
 0x267   : > { %v2539_v57 = vadd.f32 %v5007_v21, %v2444_v45  ;;  %v4960_v60 = vadd.f32 %v4959_v3, %v4958_v2  ;;  %v5008_v6 = vpop.f32.mrb[78].mxu1 }
 0x268   : > { %v5009_v63 = vpop.f32.mrb[79].mxu1 }
 0x269   : > { %v2449_v22 = vadd.f32 %v4960_v60, %v2354_v17  ;;  %v5010_v9 = vadd.f32 %v5009_v63, %v5008_v6  ;;  %v4961_v47 = vpop.f32.mrb[62].mxu0  ;;  %v7515_v59 = vadd.f32 %v7500_v46, %v2539_v57 }
 0x26a   : > { %v4962_v12 = vpop.f32.mrb[63].mxu0 }
 0x26b   : > { %v2544_v29 = vadd.f32 %v5010_v9, %v2449_v22  ;;  %v4963_v11 = vadd.f32 %v4962_v12, %v4961_v47  ;;  %v5011_v15 = vpop.f32.mrb[80].mxu1 }
 0x26c   : > { %v5012_v18 = vpop.f32.mrb[81].mxu1 }
 0x26d   : > { %v2454_v41 = vadd.f32 %v4963_v11, %v2359_v39  ;;  %v5013_v32 = vadd.f32 %v5012_v18, %v5011_v15  ;;  %v4964_v56 = vpop.f32.mrb[64].mxu0  ;;  %v7518_v19 = vadd.f32 %v7502_v51, %v2544_v29 }
 0x26e   : > { %v4965_v27 = vpop.f32.mrb[65].mxu0 }
 0x26f   : > { %v2549_v24 = vadd.f32 %v5013_v32, %v2454_v41  ;;  %v4966_v54 = vadd.f32 %v4965_v27, %v4964_v56  ;;  %v5014_v38 = vpop.f32.mrb[82].mxu1 }
 0x270   : > { %v5015_v7 = vpop.f32.mrb[83].mxu1 }
 0x271   : > { %v2459_v53 = vadd.f32 %v4966_v54, %v2364_v34  ;;  %v5016_v31 = vadd.f32 %v5015_v7, %v5014_v38  ;;  %v7521_v46 = vadd.f32 %v7504_v52, %v2549_v24 }
 0x273   : > { %v2554_v17 = vadd.f32 %v5016_v31, %v2459_v53 }
 0x275   : > { %v7524_v43 = vadd.f32 %v7506_v10, %v2554_v17 }
 0x27b   : > { %v5071_v44 = vpop.f32.mrb[84].mxu1 }
 0x27c   : > { %v5072_v55 = vpop.f32.mrb[85].mxu1 }
 0x27d   : > { %v5073_v39 = vadd.f32 %v5072_v55, %v5071_v44 }
 0x27f   : > { %v5074_v30 = vpop.f32.mrb[86].mxu1 }
 0x280   : > { %v5075_v51 = vpop.f32.mrb[87].mxu1 }
 0x281   : > { %v5076_v61 = vadd.f32 %v5075_v51, %v5074_v30 }
 0x283   : > { %v5077_v62 = vpop.f32.mrb[88].mxu1 }
 0x284   : > { %v5078_v14 = vpop.f32.mrb[89].mxu1 }
 0x285   : > { %v5079_v0 = vadd.f32 %v5078_v14, %v5077_v62 }
 0x287   : > { %v5080_v28 = vpop.f32.mrb[90].mxu1 }
 0x288   : > { %v5081_v36 = vpop.f32.mrb[91].mxu1 }
 0x289   : > { %v5082_v34 = vadd.f32 %v5081_v36, %v5080_v28 }
 0x28b   : > { %v5083_v33 = vpop.f32.mrb[92].mxu1 }
 0x28c   : > { %v5084_v1 = vpop.f32.mrb[93].mxu1 }
 0x28d   : > { %v5085_v52 = vadd.f32 %v5084_v1, %v5083_v33 }
 0x28f   : > { %v5086_v37 = vpop.f32.mrb[94].mxu1 }
 0x290   : > { %v5087_v48 = vpop.f32.mrb[95].mxu1 }
 0x291   : > { %v5088_v40 = vadd.f32 %v5087_v48, %v5086_v37 }
 0x299   : > { %v5121_v10 = vpop.f32.mrb[66].mxu0 }
 0x29a   : > { %v5122_v16 = vpop.f32.mrb[67].mxu0 }
 0x29b   : > { %v5123_v25 = vadd.f32 %v5122_v16, %v5121_v10  ;;  %v5171_v35 = vpop.f32.mrb[96].mxu1 }
 0x29c   : > { %v5172_v8 = vpop.f32.mrb[97].mxu1 }
 0x29d   : > { %v3130_v42 = vadd.f32 %v5123_v25, %v5073_v39  ;;  %v5173_v58 = vadd.f32 %v5172_v8, %v5171_v35  ;;  %v5124_v13 = vpop.f32.mrb[68].mxu0 }
 0x29e   : > { %v5125_v49 = vpop.f32.mrb[69].mxu0 }
 0x29f   : > { %v3225_v5 = vadd.f32 %v5173_v58, %v3130_v42  ;;  %v5126_v26 = vadd.f32 %v5125_v49, %v5124_v13  ;;  %v5174_v50 = vpop.f32.mrb[98].mxu1 }
 0x2a0   : > { %v5175_v4 = vpop.f32.mrb[99].mxu1 }
 0x2a1   : > { %v3135_v45 = vadd.f32 %v5126_v26, %v5076_v61  ;;  %v5176_v21 = vadd.f32 %v5175_v4, %v5174_v50  ;;  %v5127_v2 = vpop.f32.mrb[70].mxu0 }
 0x2a2   : > { %v5128_v3 = vpop.f32.mrb[71].mxu0 }
 0x2a3   : > { %v3230_v57 = vadd.f32 %v5176_v21, %v3135_v45  ;;  %v5129_v60 = vadd.f32 %v5128_v3, %v5127_v2  ;;  %v5177_v6 = vpop.f32.mrb[100].mxu1 }
 0x2a4   : > { %v5178_v63 = vpop.f32.mrb[101].mxu1 }
 0x2a5   : > { %v3140_v22 = vadd.f32 %v5129_v60, %v5079_v0  ;;  %v5179_v9 = vadd.f32 %v5178_v63, %v5177_v6  ;;  %v5130_v47 = vpop.f32.mrb[72].mxu0  ;;  %v4361_v6 = vld [vmem:[#allocation8] ss:$0 sm:$0xff] }
 0x2a6   : > { %v5131_v12 = vpop.f32.mrb[73].mxu0 }
 0x2a7   : > { %v3235_v29 = vadd.f32 %v5179_v9, %v3140_v22  ;;  %v5132_v11 = vadd.f32 %v5131_v12, %v5130_v47  ;;  %v5180_v15 = vpop.f32.mrb[102].mxu1 }
 0x2a8   : > { %v5181_v18 = vpop.f32.mrb[103].mxu1 }
 0x2a9   : > { %v3145_v41 = vadd.f32 %v5132_v11, %v5082_v34  ;;  %v5182_v32 = vadd.f32 %v5181_v18, %v5180_v15  ;;  %v5133_v56 = vpop.f32.mrb[74].mxu0 }
 0x2aa   : > { %v5134_v27 = vpop.f32.mrb[75].mxu0 }
 0x2ab   : > { %v3240_v24 = vadd.f32 %v5182_v32, %v3145_v41  ;;  %v5135_v54 = vadd.f32 %v5134_v27, %v5133_v56  ;;  %v5183_v38 = vpop.f32.mrb[104].mxu1 }
 0x2ac   : > { %v5184_v7 = vpop.f32.mrb[105].mxu1 }
 0x2ad   : > { %v3150_v53 = vadd.f32 %v5135_v54, %v5085_v52  ;;  %v5185_v31 = vadd.f32 %v5184_v7, %v5183_v38  ;;  %v5136_v17 = vpop.f32.mrb[76].mxu0 }
 0x2ae   : > { %v5137_v44 = vpop.f32.mrb[77].mxu0 }
 0x2af   : > { %v3245_v55 = vadd.f32 %v5185_v31, %v3150_v53  ;;  %v5138_v39 = vadd.f32 %v5137_v44, %v5136_v17  ;;  %v5186_v30 = vpop.f32.mrb[106].mxu1 }
 0x2b0   : > { %v5187_v51 = vpop.f32.mrb[107].mxu1 }
 0x2b1   : > { %v3155_v61 = vadd.f32 %v5138_v39, %v5088_v40  ;;  %v5188_v62 = vadd.f32 %v5187_v51, %v5186_v30 }
 0x2b3   : > { %v3250_v14 = vadd.f32 %v5188_v62, %v3155_v61 }
 0x2b9   : > { %v5221_v0 = vpop.f32.mrb[78].mxu0 }
 0x2ba   : > { %v5222_v28 = vpop.f32.mrb[79].mxu0 }
 0x2bb   : > { %v5223_v36 = vadd.f32 %v5222_v28, %v5221_v0 }
 0x2bd   : > { %v3320_v34 = vadd.f32 %v5223_v36, %v3225_v5  ;;  %v5224_v33 = vpop.f32.mrb[80].mxu0 }
 0x2be   : > { %v5225_v1 = vpop.f32.mrb[81].mxu0 }
 0x2bf   : > { %v5226_v37 = vadd.f32 %v5225_v1, %v5224_v33  ;;  %v6487_v48 = vadd.f32 %v7509_v23, %v3320_v34  ;;  %v6898_v34 = vmov (!%p4362_p0), 0.0  }
 0x2c1   : > { %v3325_v52 = vadd.f32 %v5226_v37, %v3230_v57  ;;  %v5227_v10 = vpop.f32.mrb[82].mxu0 }
 0x2c2   : > { %v5228_v16 = vpop.f32.mrb[83].mxu0 }
 0x2c3   : > { %v5229_v25 = vadd.f32 %v5228_v16, %v5227_v10  ;;  %v6480_v35 = vadd.f32 %v7512_v20, %v3325_v52 }
 0x2c5   : > { %v3330_v8 = vadd.f32 %v5229_v25, %v3235_v29  ;;  %v5230_v42 = vpop.f32.mrb[84].mxu0 }
 0x2c6   : > { %v5231_v40 = vpop.f32.mrb[85].mxu0 }
 0x2c7   : > { %v5232_v58 = vadd.f32 %v5231_v40, %v5230_v42  ;;  %v6501_v13 = vadd.f32 %v7515_v59, %v3330_v8 }
 0x2c9   : > { %v3335_v49 = vadd.f32 %v5232_v58, %v3240_v24  ;;  %v5233_v26 = vpop.f32.mrb[86].mxu0 }
 0x2ca   : > { %v5234_v5 = vpop.f32.mrb[87].mxu0 }
 0x2cb   : > { %v5235_v50 = vadd.f32 %v5234_v5, %v5233_v26  ;;  %v6494_v4 = vadd.f32 %v7518_v19, %v3335_v49 }
 0x2cd   : > { %v3340_v45 = vadd.f32 %v5235_v50, %v3245_v55  ;;  %v5236_v23 = vpop.f32.mrb[88].mxu0 }
 0x2ce   : > { %v5237_v21 = vpop.f32.mrb[89].mxu0 }
 0x2cf   : > { %v5238_v2 = vadd.f32 %v5237_v21, %v5236_v23  ;;  %v6515_v3 = vadd.f32 %v7521_v46, %v3340_v45 }
 0x2d1   : > { %v3345_v57 = vadd.f32 %v5238_v2, %v3250_v14 }
 0x2d3   : > { %v6508_v20 = vadd.f32 %v7524_v43, %v3345_v57 }
 0x2d9   : > { %v5614_v60 = vpop.f32.mrb[24].mxu0 }
 0x2da   : > { %v6481_v63 = vadd.f32 %v6480_v35, %v5614_v60  ;;  %v3414_v22 = vpop.f32.mrb[25].mxu0 }
 0x2db   : > { %v6488_v59 = vadd.f32 %v6487_v48, %v3414_v22 }
 0x2dc   : > { %v3457_v9 = vadd.f32 %v6481_v63, %v4361_v6 }
 0x2dd   : > { %v3456_v47 = vadd.f32 %v6488_v59, %v4361_v6  ;;  %v5617_v12 = vpop.f32.mrb[26].mxu0 }
 0x2de   : > { %vm3463_vm0 = vcmp.ge.f32.partialorder %v3457_v9, 0.0  ;;  %v3469_v29 = vmul.f32 0.2, %v3457_v9  ;;  %v6495_v19 = vadd.f32 %v6494_v4, %v5617_v12  ;;  %v3424_v11 = vpop.f32.mrb[27].mxu0 }
 0x2df   : > { %vm3462_vm1 = vcmp.ge.f32.partialorder %v3456_v47, 0.0  ;;  %v3468_v15 = vmul.f32 0.2, %v3456_v47  ;;  %v6502_v18 = vadd.f32 %v6501_v13, %v3424_v11 }
 0x2e0   : > { %v3475_v41 = vsel %vm3463_vm0, %v3457_v9, %v3469_v29  ;;  %v3459_v46 = vadd.f32 %v6495_v19, %v4361_v6 }
 0x2e1   : > { %v3481_v32 = vmul.f32 1.4142135, %v3475_v41  ;;  %v3474_v56 = vsel %vm3462_vm1, %v3456_v47, %v3468_v15  ;;  %v3458_v43 = vadd.f32 %v6502_v18, %v4361_v6  ;;  %v5620_v27 = vpop.f32.mrb[28].mxu0 }
 0x2e2   : > { %v3480_v24 = vmul.f32 1.4142135, %v3474_v56  ;;  %vm3465_vm2 = vcmp.ge.f32.partialorder %v3459_v46, 0.0  ;;  %v3471_v54 = vmul.f32 0.2, %v3459_v46  ;;  %v6509_v38 = vadd.f32 %v6508_v20, %v5620_v27  ;;  %v3434_v7 = vpop.f32.mrb[29].mxu0 }
 0x2e3   : > { %3487 = vst [vmem:[#allocation3 + $0x11] sm:$0xff] %v3481_v32  ;;  %vm3464_vm3 = vcmp.ge.f32.partialorder %v3458_v43, 0.0  ;;  %v3470_v53 = vmul.f32 0.2, %v3458_v43  ;;  %v6516_v31 = vadd.f32 %v6515_v3, %v3434_v7 }
 0x2e4   : > { %3486 = vst [vmem:[#allocation3 + $0x1] sm:$0xff] %v3480_v24  ;;  %v3477_v17 = vsel %vm3465_vm2, %v3459_v46, %v3471_v54  ;;  %v3461_v44 = vadd.f32 %v6509_v38, %v4361_v6 }
 0x2e5   : > { %v3483_v55 = vmul.f32 1.4142135, %v3477_v17  ;;  %v3476_v39 = vsel %vm3464_vm3, %v3458_v43, %v3470_v53  ;;  %v3460_v30 = vadd.f32 %v6516_v31, %v4361_v6  ;;  %3496 = vst [vmem:[#allocation3] sm:$0xff] (!%p4362_p0), %v6898_v34  ;;  %3497 = vst [vmem:[#allocation3 + $0x8] sm:$0x3] (!%p4362_p0), %v6898_v34 }
 0x2e6   : > { %v3482_v51 = vmul.f32 1.4142135, %v3476_v39  ;;  %vm3467_vm4 = vcmp.ge.f32.partialorder %v3461_v44, 0.0  ;;  %v3473_v61 = vmul.f32 0.2, %v3461_v44  ;;  %3495 = sbr.rel (%p4362_p0) target bundleno = 749 (0x2ed), region = 57 }
 0x2e7   : > { %3489 = vst [vmem:[#allocation3 + $0x31] sm:$0xff] %v3483_v55  ;;  %vm3466_vm5 = vcmp.ge.f32.partialorder %v3460_v30, 0.0  ;;  %v3472_v62 = vmul.f32 0.2, %v3460_v30 }
 0x2e8   : > { %3488 = vst [vmem:[#allocation3 + $0x21] sm:$0xff] %v3482_v51  ;;  %v3479_v14 = vsel %vm3467_vm4, %v3461_v44, %v3473_v61 }
 0x2e9   : > { %v3485_v0 = vmul.f32 1.4142135, %v3479_v14  ;;  %v3478_v28 = vsel %vm3466_vm5, %v3460_v30, %v3472_v62 }
 0x2ea   : > { %v3484_v36 = vmul.f32 1.4142135, %v3478_v28 }
 0x2eb   : > { %3491 = vst [vmem:[#allocation3 + $0x51] sm:$0xff] %v3485_v0 }
 0x2ec   : > { %3490 = vst [vmem:[#allocation3 + $0x41] sm:$0xff] %v3484_v36 }
 0x2ed PF: > { %p4363_p2 = scmp.ne.s32.totalorder %s6865_s21, 1 }
 0x2ee   : > { %v6899_v33 = vmov (!%p4363_p2), 0.0  }
 0x2ef   : > { %3501 = sbr.rel (%p4363_p2) target bundleno = 758 (0x2f6), region = 61  ;;  %3503 = vst [vmem:[#allocation3 + $0x50] sm:$0xff] (!%p4363_p2), %v6899_v33  ;;  %3504 = vst [vmem:[#allocation3 + $0x58] sm:$0x3] (!%p4363_p2), %v6899_v33 }
 0x2f6 PF: > { %v3631_v1 = vld [vmem:[#allocation10 + $0x80] sm:$0xff]  ;;  %v3632_v37 = vld [vmem:[#allocation10 + $0x88] sm:$0xff]  ;;  %v3633_v16 = vld [vmem:[#allocation10 + $0x90] sm:$0xff]  ;;  %s4366_s30 = sshll.u32 %s6865_s21, 2  ;;  %s4367_s16 = sshll.u32 %s6869_s22, 3 }
 0x2f7   : > { %v3615_v48 = vld [vmem:[#allocation10] sm:$0xff]  ;;  %v6299_v52 = vpack.c.bf16 %v3632_v37, %v3631_v1  ;;  %v3616_v10 = vld [vmem:[#allocation10 + $0x8] sm:$0xff]  ;;  %v3634_v25 = vld [vmem:[#allocation10 + $0x98] sm:$0xff]  ;;  %s4227_s2 = sshll.u32 %s7120_s11, 4  ;;  %s4224_s12 = sadd.s32 %s4367_s16, %s4366_s30  ;;  %s7635_s2 = int_to_ptr.vmem [resolvable:$true] %s4227_s2 }
 0x2f8   : > { %v6301_v35 = vpack.c.bf16 %v3616_v10, %v3615_v48  ;;  %v6303_v8 = vpack.c.bf16 %v3634_v25, %v3633_v16  ;;  %v3617_v42 = vld [vmem:[#allocation10 + $0x10] sm:$0xff]  ;;  %v3618_v40 = vld [vmem:[#allocation10 + $0x18] sm:$0xff]  ;;  %v3635_v58 = vld [vmem:[#allocation10 + $0xa0] sm:$0xff]  ;;  %s4368_s13 = sshll.u32 %s4224_s12, 7  ;;  %s7644_s28 = scalar_lea.sflag [#allocation7], %s243_s10 }
 0x2f9   : > { %6300 = vmatprep.subr.bf16.mxu1 %v6299_v52  ;;  %v3636_v13 = vld [vmem:[#allocation10 + $0xa8] sm:$0xff]  ;;  %v6305_v49 = vpack.c.bf16 %v3618_v40, %v3617_v42  ;;  %v3619_v5 = vld [vmem:[#allocation10 + $0x20] sm:$0xff]  ;;  %v3637_v4 = vld [vmem:[#allocation10 + $0xb0] sm:$0xff]  ;;  %s7640_s29 = scalar_lea.hbm %s7702_s5, %s4368_s13  ;;  %s6773_s6 = scalar_lea.vmem %s7635_s2, 512 }
 0x2fa   : > { %6302 = vmatpush3.bf16.msra.mxu1 %v6301_v35  ;;  %v6307_v26 = vpack.c.bf16 %v3636_v13, %v3635_v58  ;;  %v3620_v50 = vld [vmem:[#allocation10 + $0x28] sm:$0xff]  ;;  %v3638_v45 = vld [vmem:[#allocation10 + $0xb8] sm:$0xff]  ;;  %v3621_v2 = vld [vmem:[#allocation10 + $0x30] sm:$0xff]  ;;  %p6774_p10 = scmp.ne.s32.totalorder %s7635_s2, %s6773_s6  ;;  %p7730_p12 = scmp.ne.s32.totalorder %s7718_s7, 0 }
 0x2fb   : > { %6304 = vmatprep.subr.bf16.mxu1 %v6303_v8  ;;  %v6309_v23 = vpack.c.bf16 %v3620_v50, %v3619_v5  ;;  %v6311_v21 = vpack.c.bf16 %v3638_v45, %v3637_v4  ;;  %v3622_v3 = vld [vmem:[#allocation10 + $0x38] sm:$0xff]  ;;  %v3639_v57 = vld [vmem:[#allocation10 + $0xc0] sm:$0xff]  ;;  %v3640_v20 = vld [vmem:[#allocation10 + $0xc8] sm:$0xff]  ;;  %s6900_s21 = smov [#allocation13]  }
 0x2fc   : > { %v3513_v60 = vld [vmem:[#allocation3 + $0x1] sm:$0xff]  ;;  %v6313_v6 = vpack.c.bf16 %v3622_v3, %v3621_v2  ;;  %v3624_v22 = vld [vmem:[#allocation10 + $0x48] sm:$0xff]  ;;  %v6315_v9 = vpack.c.bf16 %v3640_v20, %v3639_v57  ;;  %v3641_v19 = vld [vmem:[#allocation10 + $0xd0] sm:$0xff]  ;;  %p6775_p1 = pnand %p6774_p10, %p7730_p12  ;;  %s6777_s22 = sshll.u32 %s6900_s21, 4  ;;  %s6778_s22 = int_to_ptr.vmem [resolvable:$false] %s6777_s22 }
 0x2fd   : > { %3830 = vmatprep.mubr.f32.mxu1 %v3513_v60  ;;  %v3623_v63 = vld [vmem:[#allocation10 + $0x40] sm:$0xff]  ;;  %v3696_v47 = vld [vmem:[#allocation10 + $0x288] sm:$0xff]  ;;  %v3642_v11 = vld [vmem:[#allocation10 + $0xd8] sm:$0xff]  ;;  %s6779_s26 = scalar_lea.vmem %s6778_s22, 1024  ;;  %p6780_p5 = scmp.lt.s32.totalorder %s7635_s2, %s6778_s22 }
 0x2fe   : > { %6306 = vmatpush3.bf16.msra.mxu1 %v6305_v49  ;;  %v3695_v59 = vld [vmem:[#allocation10 + $0x280] sm:$0xff]  ;;  %v3680_v29 = vld [vmem:[#allocation10 + $0x208] sm:$0xff]  ;;  %v3697_v41 = vld [vmem:[#allocation10 + $0x290] sm:$0xff]  ;;  %v6317_v32 = vpack.c.bf16 %v3624_v22, %v3623_v63  ;;  %v6319_v54 = vpack.c.bf16 %v3642_v11, %v3641_v19  ;;  %p6776_p4 = pneg %p6775_p1  ;;  %p6781_p6 = scmp.lt.s32.totalorder %s6779_s26, %s6773_s6 }
 0x2ff   : > { %6308 = vmatprep.subr.bf16.mxu1 %v6307_v26  ;;  %v3679_v12 = vld [vmem:[#allocation10 + $0x200] sm:$0xff]  ;;  %v6363_v15 = vpack.c.bf16 %v3696_v47, %v3695_v59  ;;  %v3698_v46 = vld [vmem:[#allocation10 + $0x298] sm:$0xff]  ;;  %v3625_v56 = vld [vmem:[#allocation10 + $0x50] sm:$0xff] }
 0x300   : > { %v6365_v18 = vpack.c.bf16 %v3680_v29, %v3679_v12  ;;  %v6367_v43 = vpack.c.bf16 %v3698_v46, %v3697_v41  ;;  %v3681_v27 = vld [vmem:[#allocation10 + $0x210] sm:$0xff]  ;;  %v3682_v24 = vld [vmem:[#allocation10 + $0x218] sm:$0xff]  ;;  %v3643_v7 = vld [vmem:[#allocation10 + $0xe0] sm:$0xff]  ;;  %p6782_p7 = por %p6781_p6, %p6780_p5 }
 0x301   : > { %6364 = vmatprep.subr.bf16.mxu0 %v6363_v15  ;;  %v3626_v38 = vld [vmem:[#allocation10 + $0x58] sm:$0xff]  ;;  %v3644_v53 = vld [vmem:[#allocation10 + $0xe8] sm:$0xff]  ;;  %v6369_v31 = vpack.c.bf16 %v3682_v24, %v3681_v27  ;;  %v3699_v17 = vld [vmem:[#allocation10 + $0x2a0] sm:$0xff] }
 0x302   : > { %6310 = vmatpush3.bf16.msra.mxu1 %v6309_v23  ;;  %6366 = vmatpush3.bf16.msra.mxu0 %v6365_v18  ;;  %v3700_v44 = vld [vmem:[#allocation10 + $0x2a8] sm:$0xff]  ;;  %v3683_v55 = vld [vmem:[#allocation10 + $0x220] sm:$0xff]  ;;  %v6321_v51 = vpack.c.bf16 %v3626_v38, %v3625_v56  ;;  %v3701_v62 = vld [vmem:[#allocation10 + $0x2b0] sm:$0xff]  ;;  %v6323_v14 = vpack.c.bf16 %v3644_v53, %v3643_v7  ;;  %p6783_p9 = pnand %p6782_p7, %p6776_p4 }
 0x303   : > { %6312 = vmatprep.subr.bf16.mxu1 %v6311_v21  ;;  %6368 = vmatprep.subr.bf16.mxu0 %v6367_v43  ;;  %v6371_v39 = vpack.c.bf16 %v3700_v44, %v3699_v17  ;;  %v3684_v30 = vld [vmem:[#allocation10 + $0x228] sm:$0xff]  ;;  %v3627_v61 = vld [vmem:[#allocation10 + $0x60] sm:$0xff]  ;;  %v3645_v28 = vld [vmem:[#allocation10 + $0xf0] sm:$0xff] }
 0x304   : > { %v3628_v0 = vld [vmem:[#allocation10 + $0x68] sm:$0xff]  ;;  %v6373_v36 = vpack.c.bf16 %v3684_v30, %v3683_v55  ;;  %v3702_v34 = vld [vmem:[#allocation10 + $0x2b8] sm:$0xff]  ;;  %v3685_v37 = vld [vmem:[#allocation10 + $0x230] sm:$0xff] }
 0x305   : > { %v3646_v33 = vld [vmem:[#allocation10 + $0xf8] sm:$0xff]  ;;  %v6375_v1 = vpack.c.bf16 %v3702_v34, %v3701_v62  ;;  %v3703_v52 = vld [vmem:[#allocation10 + $0x2c0] sm:$0xff]  ;;  %v3704_v10 = vld [vmem:[#allocation10 + $0x2c8] sm:$0xff]  ;;  %v6325_v16 = vpack.c.bf16 %v3628_v0, %v3627_v61 }
 0x306   : > { %6314 = vmatpush3.bf16.msra.mxu1 %v6313_v6  ;;  %6370 = vmatpush3.bf16.msra.mxu0 %v6369_v31  ;;  %v3686_v48 = vld [vmem:[#allocation10 + $0x238] sm:$0xff]  ;;  %v6327_v25 = vpack.c.bf16 %v3646_v33, %v3645_v28  ;;  %v3629_v35 = vld [vmem:[#allocation10 + $0x70] sm:$0xff]  ;;  %v3663_v42 = vld [vmem:[#allocation10 + $0x180] sm:$0xff]  ;;  %v6379_v13 = vpack.c.bf16 %v3704_v10, %v3703_v52 }
 0x307   : > { %6316 = vmatprep.subr.bf16.mxu1 %v6315_v9  ;;  %6372 = vmatprep.subr.bf16.mxu0 %v6371_v39  ;;  %v3630_v8 = vld [vmem:[#allocation10 + $0x78] sm:$0xff]  ;;  %v6377_v40 = vpack.c.bf16 %v3686_v48, %v3685_v37  ;;  %v3664_v58 = vld [vmem:[#allocation10 + $0x188] sm:$0xff]  ;;  %v3687_v49 = vld [vmem:[#allocation10 + $0x240] sm:$0xff] }
 0x308   : > { %v3688_v26 = vld [vmem:[#allocation10 + $0x248] sm:$0xff]  ;;  %v3705_v5 = vld [vmem:[#allocation10 + $0x2d0] sm:$0xff]  ;;  %v3706_v50 = vld [vmem:[#allocation10 + $0x2d8] sm:$0xff]  ;;  %v6329_v4 = vpack.c.bf16 %v3630_v8, %v3629_v35  ;;  %v6331_v45 = vpack.c.bf16 %v3664_v58, %v3663_v42 }
 0x309   : > { %v3647_v23 = vld [vmem:[#allocation10 + $0x100] sm:$0xff]  ;;  %v3648_v21 = vld [vmem:[#allocation10 + $0x108] sm:$0xff]  ;;  %v3665_v2 = vld [vmem:[#allocation10 + $0x190] sm:$0xff]  ;;  %v6381_v3 = vpack.c.bf16 %v3688_v26, %v3687_v49  ;;  %v6383_v20 = vpack.c.bf16 %v3706_v50, %v3705_v5 }
 0x30a   : > { %6318 = vmatpush3.bf16.msra.mxu1 %v6317_v32  ;;  %6374 = vmatpush3.bf16.msra.mxu0 %v6373_v36  ;;  %v3666_v57 = vld [vmem:[#allocation10 + $0x198] sm:$0xff]  ;;  %v3689_v60 = vld [vmem:[#allocation10 + $0x250] sm:$0xff]  ;;  %v3707_v63 = vld [vmem:[#allocation10 + $0x2e0] sm:$0xff]  ;;  %v6333_v9 = vpack.c.bf16 %v3648_v21, %v3647_v23 }
 0x30b   : > { %6320 = vmatprep.subr.bf16.mxu1 %v6319_v54  ;;  %6376 = vmatprep.subr.bf16.mxu0 %v6375_v1  ;;  %v3690_v6 = vld [vmem:[#allocation10 + $0x258] sm:$0xff]  ;;  %v3708_v22 = vld [vmem:[#allocation10 + $0x2e8] sm:$0xff]  ;;  %v3649_v47 = vld [vmem:[#allocation10 + $0x110] sm:$0xff]  ;;  %v6335_v12 = vpack.c.bf16 %v3666_v57, %v3665_v2 }
 0x30c   : > { %v3505_v59 = vld [vmem:[#allocation3] sm:$0xff]  ;;  %v7534_v11 = vld [vmem:[#allocation3 + $0x11] sm:$0xff]  ;;  %v6385_v15 = vpack.c.bf16 %v3690_v6, %v3689_v60  ;;  %v6387_v41 = vpack.c.bf16 %v3708_v22, %v3707_v63 }
 0x30d   : > { %v3650_v29 = vld [vmem:[#allocation10 + $0x118] sm:$0xff]  ;;  %v3667_v19 = vld [vmem:[#allocation10 + $0x1a0] sm:$0xff]  ;;  %v3668_v18 = vld [vmem:[#allocation10 + $0x1a8] sm:$0xff] }
 0x30e   : > { %6322 = vmatpush3.bf16.msra.mxu1 %v6321_v51  ;;  %6378 = vmatpush3.bf16.msra.mxu0 %v6377_v40  ;;  %v3691_v46 = vld [vmem:[#allocation10 + $0x260] sm:$0xff]  ;;  %v3692_v32 = vld [vmem:[#allocation10 + $0x268] sm:$0xff]  ;;  %v3709_v56 = vld [vmem:[#allocation10 + $0x2f0] sm:$0xff]  ;;  %v6337_v24 = vpack.c.bf16 %v3650_v29, %v3649_v47  ;;  %v6339_v7 = vpack.c.bf16 %v3668_v18, %v3667_v19 }
 0x30f   : > { %6324 = vmatprep.subr.bf16.mxu1 %v6323_v14  ;;  %6380 = vmatprep.subr.bf16.mxu0 %v6379_v13  ;;  %v3710_v43 = vld [vmem:[#allocation10 + $0x2f8] sm:$0xff]  ;;  %v7536_v27 = vld [vmem:[#allocation3 + $0x12] sm:$0xff]  ;;  %v3651_v54 = vld [vmem:[#allocation10 + $0x120] sm:$0xff]  ;;  %v6389_v44 = vpack.c.bf16 %v3692_v32, %v3691_v46 }
 0x310   : > { %v3506_v38 = vld [vmem:[#allocation3 + $0x10] sm:$0xff]  ;;  %v7539_v17 = vld [vmem:[#allocation3 + $0x21] sm:$0xff]  ;;  %v6391_v39 = vpack.c.bf16 %v3710_v43, %v3709_v56  ;;  %4000 = vmatprep.mubr.f32.mxu0 %v7536_v27 }
 0x311   : > { %v3652_v53 = vld [vmem:[#allocation10 + $0x128] sm:$0xff]  ;;  %v3669_v31 = vld [vmem:[#allocation10 + $0x1b0] sm:$0xff]  ;;  %v3670_v55 = vld [vmem:[#allocation10 + $0x1b8] sm:$0xff] }
 0x312   : > { %6326 = vmatpush3.bf16.msra.mxu1 %v6325_v16  ;;  %6382 = vmatpush3.bf16.msra.mxu0 %v6381_v3  ;;  %v3693_v30 = vld [vmem:[#allocation10 + $0x270] sm:$0xff]  ;;  %v3694_v51 = vld [vmem:[#allocation10 + $0x278] sm:$0xff]  ;;  %v3743_v61 = vld [vmem:[#allocation10 + $0x400] sm:$0xff]  ;;  %v6341_v14 = vpack.c.bf16 %v3652_v53, %v3651_v54  ;;  %v6343_v28 = vpack.c.bf16 %v3670_v55, %v3669_v31 }
 0x313   : > { %6328 = vmatprep.subr.bf16.mxu1 %v6327_v25  ;;  %6384 = vmatprep.subr.bf16.mxu0 %v6383_v20  ;;  %v3744_v62 = vld [vmem:[#allocation10 + $0x408] sm:$0xff]  ;;  %v7543_v0 = vld [vmem:[#allocation3 + $0x20] sm:$0xff]  ;;  %v3653_v36 = vld [vmem:[#allocation10 + $0x130] sm:$0xff]  ;;  %v6393_v1 = vpack.c.bf16 %v3694_v51, %v3693_v30 }
 0x314   : > { %v3654_v34 = vld [vmem:[#allocation10 + $0x138] sm:$0xff]  ;;  %v7545_v33 = vld [vmem:[#allocation3 + $0x31] sm:$0xff]  ;;  %v3671_v37 = vld [vmem:[#allocation10 + $0x1c0] sm:$0xff]  ;;  %v7547_v52 = vpack.c.bf16 %v3744_v62, %v3743_v61 }
 0x315   : > { %v3672_v48 = vld [vmem:[#allocation10 + $0x1c8] sm:$0xff]  ;;  %v6345_v10 = vpack.c.bf16 %v3654_v34, %v3653_v36  ;;  %v3745_v25 = vld [vmem:[#allocation10 + $0x410] sm:$0xff]  ;;  %v3746_v35 = vld [vmem:[#allocation10 + $0x418] sm:$0xff] }
 0x316   : > { %6330 = vmatpush3.bf16.msra.mxu1 %v6329_v4  ;;  %6386 = vmatpush3.bf16.msra.mxu0 %v6385_v15  ;;  %v7551_v16 = vld [vmem:[#allocation3 + $0x30] sm:$0xff]  ;;  %v6347_v8 = vpack.c.bf16 %v3672_v48, %v3671_v37  ;;  %v3655_v42 = vld [vmem:[#allocation10 + $0x140] sm:$0xff]  ;;  %v3674_v13 = vld [vmem:[#allocation10 + $0x1d8] sm:$0xff]  ;;  %v7557_v26 = vpack.c.bf16 %v3746_v35, %v3745_v25 }
 0x317   : > { %6332 = vmatprep.subr.bf16.mxu1 %v6331_v45  ;;  %6388 = vmatprep.subr.bf16.mxu0 %v6387_v41  ;;  %v3656_v40 = vld [vmem:[#allocation10 + $0x148] sm:$0xff]  ;;  %v3673_v58 = vld [vmem:[#allocation10 + $0x1d0] sm:$0xff]  ;;  %v7555_v49 = vld [vmem:[#allocation3 + $0x22] sm:$0xff] }
 0x318   : > { %v6349_v5 = vpack.c.bf16 %v3656_v40, %v3655_v42  ;;  %v3747_v50 = vld [vmem:[#allocation10 + $0x420] sm:$0xff]  ;;  %v3748_v4 = vld [vmem:[#allocation10 + $0x428] sm:$0xff]  ;;  %v6351_v45 = vpack.c.bf16 %v3674_v13, %v3673_v58  ;;  %v3657_v23 = vld [vmem:[#allocation10 + $0x150] sm:$0xff] }
 0x319   : > { %3831 = vmatmul.mubr.f32.vlgmr.msra.gmra.mrb[108].mxu1 %v3505_v59  ;;  %v3658_v21 = vld [vmem:[#allocation10 + $0x158] sm:$0xff]  ;;  %v3675_v2 = vld [vmem:[#allocation10 + $0x1e0] sm:$0xff]  ;;  %v3676_v3 = vld [vmem:[#allocation10 + $0x1e8] sm:$0xff]  ;;  %v7565_v20 = vpack.c.bf16 %v3748_v4, %v3747_v50 }
 0x31a   : > { %6334 = vmatpush3.bf16.msra.mxu1 %v6333_v9  ;;  %3835 = vmatprep.mubr.f32.mxu1 %v7534_v11  ;;  %v7563_v57 = vld [vmem:[#allocation3 + $0x32] sm:$0xff]  ;;  %v6353_v60 = vpack.c.bf16 %v3658_v21, %v3657_v23  ;;  %v3750_v63 = vld [vmem:[#allocation10 + $0x438] sm:$0xff]  ;;  %v6355_v22 = vpack.c.bf16 %v3676_v3, %v3675_v2  ;;  %v3659_v59 = vld [vmem:[#allocation10 + $0x160] sm:$0xff] }
 0x31b   : > { %6336 = vmatprep.subr.bf16.mxu1 %v6335_v12  ;;  %6390 = vmatpush3.bf16.msra.mxu0 %v6389_v44  ;;  %v3749_v6 = vld [vmem:[#allocation10 + $0x430] sm:$0xff]  ;;  %v3660_v9 = vld [vmem:[#allocation10 + $0x168] sm:$0xff]  ;;  %v3678_v12 = vld [vmem:[#allocation10 + $0x1f8] sm:$0xff] }
 0x31c   : > { %6392 = vmatprep.subr.bf16.mxu0 %v6391_v39  ;;  %v3677_v47 = vld [vmem:[#allocation10 + $0x1f0] sm:$0xff]  ;;  %v7571_v29 = vld [vmem:[#allocation3 + $0x42] sm:$0xff]  ;;  %v7573_v19 = vpack.c.bf16 %v3750_v63, %v3749_v6  ;;  %v3752_v18 = vld [vmem:[#allocation10 + $0x448] sm:$0xff] }
 0x31d   : > { %3836 = vmatmul.mubr.f32.gmra.mrb[110].mxu1 %v3506_v38  ;;  %v3751_v15 = vld [vmem:[#allocation10 + $0x440] sm:$0xff]  ;;  %v6359_v41 = vpack.c.bf16 %v3678_v12, %v3677_v47  ;;  %v3661_v46 = vld [vmem:[#allocation10 + $0x170] sm:$0xff]  ;;  %v3662_v32 = vld [vmem:[#allocation10 + $0x178] sm:$0xff] }
 0x31e   : > { %6338 = vmatpush3.bf16.msra.mxu1 %v6337_v24  ;;  %3840 = vmatprep.mubr.f32.mxu1 %v7539_v17  ;;  %v3727_v56 = vld [vmem:[#allocation10 + $0x380] sm:$0xff]  ;;  %v3728_v43 = vld [vmem:[#allocation10 + $0x388] sm:$0xff]  ;;  %v7581_v54 = vpack.c.bf16 %v3752_v18, %v3751_v15  ;;  %v3754_v53 = vld [vmem:[#allocation10 + $0x458] sm:$0xff] }
 0x31f   : > { %6340 = vmatprep.subr.bf16.mxu1 %v6339_v7  ;;  %6394 = vmatpush3.bf16.msra.mxu0 %v6393_v1  ;;  %v7578_v24 = vld [vmem:[#allocation3 + $0x41] sm:$0xff]  ;;  %v3753_v7 = vld [vmem:[#allocation10 + $0x450] sm:$0xff]  ;;  %v6395_v31 = vpack.c.bf16 %v3728_v43, %v3727_v56  ;;  %v3712_v55 = vld [vmem:[#allocation10 + $0x308] sm:$0xff] }
 0x320   : > { %6428 = vmatprep.subr.bf16.mxu0 %v7547_v52  ;;  %v3711_v44 = vld [vmem:[#allocation10 + $0x300] sm:$0xff]  ;;  %v3729_v39 = vld [vmem:[#allocation10 + $0x390] sm:$0xff]  ;;  %v3730_v30 = vld [vmem:[#allocation10 + $0x398] sm:$0xff]  ;;  %v7587_v51 = vpack.c.bf16 %v3754_v53, %v3753_v7 }
 0x321   : > { %3841 = vmatmul.mubr.f32.gmra.mrb[112].mxu1 %v7543_v0  ;;  %v3521_v61 = vld [vmem:[#allocation3 + $0x2] sm:$0xff]  ;;  %v6397_v62 = vpack.c.bf16 %v3712_v55, %v3711_v44  ;;  %v6399_v36 = vpack.c.bf16 %v3730_v30, %v3729_v39  ;;  %v3713_v34 = vld [vmem:[#allocation10 + $0x310] sm:$0xff]  ;;  %v3714_v1 = vld [vmem:[#allocation10 + $0x318] sm:$0xff] }
 0x322   : > { %6342 = vmatpush3.bf16.msra.mxu1 %v6341_v14  ;;  %3845 = vmatprep.mubr.f32.mxu1 %v7545_v33  ;;  %v3755_v14 = vld [vmem:[#allocation10 + $0x460] sm:$0xff]  ;;  %v3732_v48 = vld [vmem:[#allocation10 + $0x3a8] sm:$0xff]  ;;  %v6401_v25 = vpack.c.bf16 %v3714_v1, %v3713_v34  ;;  %v3757_v35 = vld [vmem:[#allocation10 + $0x470] sm:$0xff] }
 0x323   : > { %6344 = vmatprep.subr.bf16.mxu1 %v6343_v28  ;;  %4001 = vmatmul.mubr.f32.vlgmr.msra.gmra.mrb[90].mxu0 %v7534_v11  ;;  %v6357_v11 = vpack.c.bf16 %v3660_v9, %v3659_v59  ;;  %v3756_v28 = vld [vmem:[#allocation10 + $0x468] sm:$0xff]  ;;  %v3731_v37 = vld [vmem:[#allocation10 + $0x3a0] sm:$0xff]  ;;  %v3733_v13 = vld [vmem:[#allocation10 + $0x3b0] sm:$0xff] }
 0x324   : > { %4005 = vmatprep.mubr.f32.mxu0 %v7555_v49  ;;  %6430 = vmatpush3.bf16.msra.mxu0 %v7547_v52  ;;  %v6403_v42 = vpack.c.bf16 %v3732_v48, %v3731_v37  ;;  %v3715_v40 = vld [vmem:[#allocation10 + $0x320] sm:$0xff]  ;;  %v3716_v58 = vld [vmem:[#allocation10 + $0x328] sm:$0xff]  ;;  %v3717_v21 = vld [vmem:[#allocation10 + $0x330] sm:$0xff] }
 0x325   : > { %3846 = vmatmul.mubr.f32.gmra.mrb[114].mxu1 %v7551_v16  ;;  %6432 = vmatprep.subr.bf16.mxu0 %v7557_v26  ;;  %v6405_v4 = vpack.c.bf16 %v3716_v58, %v3715_v40  ;;  %v3718_v2 = vld [vmem:[#allocation10 + $0x338] sm:$0xff]  ;;  %v3735_v3 = vld [vmem:[#allocation10 + $0x3c0] sm:$0xff]  ;;  %v3737_v59 = vld [vmem:[#allocation10 + $0x3d0] sm:$0xff] }
 0x326   : > { %6346 = vmatpush3.bf16.msra.mxu1 %v6345_v10  ;;  %3915 = vmatprep.mubr.f32.mxu1 %v3506_v38  ;;  %v6361_v38 = vpack.c.bf16 %v3662_v32, %v3661_v46  ;;  %v7591_v10 = vpack.c.bf16 %v3756_v28, %v3755_v14  ;;  %v3719_v63 = vld [vmem:[#allocation10 + $0x340] sm:$0xff]  ;;  %v3738_v9 = vld [vmem:[#allocation10 + $0x3d8] sm:$0xff]  ;;  %v3721_v12 = vld [vmem:[#allocation10 + $0x350] sm:$0xff] }
 0x327   : > { %6348 = vmatprep.subr.bf16.mxu1 %v6347_v8  ;;  %4006 = vmatmul.mubr.f32.gmra.mrb[92].mxu0 %v7539_v17  ;;  %v3758_v8 = vld [vmem:[#allocation10 + $0x478] sm:$0xff]  ;;  %v3739_v15 = vld [vmem:[#allocation10 + $0x3e0] sm:$0xff]  ;;  %v3740_v18 = vld [vmem:[#allocation10 + $0x3e8] sm:$0xff] }
 0x328   : > { %4010 = vmatprep.mubr.f32.mxu0 %v7563_v57  ;;  %6434 = vmatpush3.bf16.msra.mxu0 %v7557_v26  ;;  %v7597_v50 = vpack.c.bf16 %v3758_v8, %v3757_v35  ;;  %v6419_v46 = vpack.c.bf16 %v3740_v18, %v3739_v15  ;;  %v3723_v32 = vld [vmem:[#allocation10 + $0x360] sm:$0xff]  ;;  %v3724_v56 = vld [vmem:[#allocation10 + $0x368] sm:$0xff]  ;;  %v3741_v43 = vld [vmem:[#allocation10 + $0x3f0] sm:$0xff] }
 0x329   : > { %6436 = vmatprep.subr.bf16.mxu0 %v7565_v20  ;;  %v6421_v7 = vpack.c.bf16 %v3724_v56, %v3723_v32  ;;  %v3725_v53 = vld [vmem:[#allocation10 + $0x370] sm:$0xff]  ;;  %v4364_v8 = vld [vmem:[#allocation11] ss:$0 sm:$0xff] }
 0x32a   : > { %6350 = vmatpush3.bf16.msra.mxu1 %v6349_v5  ;;  %v3734_v5 = vld [vmem:[#allocation10 + $0x3b8] sm:$0xff] }
 0x32b   : > { %6352 = vmatprep.subr.bf16.mxu1 %v6351_v45  ;;  %4011 = vmatmul.mubr.f32.gmra.mrb[94].mxu0 %v7545_v33  ;;  %v3533_v45 = vld [vmem:[#allocation3 + $0x40] sm:$0xff]  ;;  %v6407_v23 = vpack.c.bf16 %v3734_v5, %v3733_v13 }
 0x32c   : > { %4015 = vmatprep.mubr.f32.mxu0 %v7571_v29  ;;  %6438 = vmatpush3.bf16.msra.mxu0 %v7565_v20 }
 0x32d   : > { %6440 = vmatprep.subr.bf16.mxu0 %v7573_v19 }
 0x32e   : > { %6354 = vmatpush3.bf16.msra.mxu1 %v6353_v60  ;;  %v3736_v60 = vld [vmem:[#allocation10 + $0x3c8] sm:$0xff] }
 0x32f   : > { %6356 = vmatprep.subr.bf16.mxu1 %v6355_v22  ;;  %4016 = vmatmul.mubr.f32.gmra.mrb[96].mxu0 %v7578_v24  ;;  %v6411_v6 = vpack.c.bf16 %v3736_v60, %v3735_v3  ;;  %v3720_v22 = vld [vmem:[#allocation10 + $0x348] sm:$0xff] }
 0x330   : > { %6442 = vmatpush3.bf16.msra.mxu0 %v7573_v19  ;;  %5653 = vmatprep.mubr.f32.mxu0 %v7555_v49  ;;  %v6413_v47 = vpack.c.bf16 %v3720_v22, %v3719_v63 }
 0x331   : > { %6444 = vmatprep.subr.bf16.mxu0 %v7581_v54 }
 0x332   : > { %6358 = vmatpush3.bf16.msra.mxu1 %v6357_v11  ;;  %v3722_v11 = vld [vmem:[#allocation10 + $0x358] sm:$0xff] }
 0x333   : > { %6360 = vmatprep.subr.bf16.mxu1 %v6359_v41  ;;  %v6417_v41 = vpack.c.bf16 %v3722_v11, %v3721_v12 }
 0x334   : > { %6446 = vmatpush3.bf16.msra.mxu0 %v7581_v54 }
 0x335   : > { %6448 = vmatprep.subr.bf16.mxu0 %v7587_v51 }
 0x336   : > { %6362 = vmatpush3.bf16.msra.mxu1 %v6361_v38  ;;  %v3742_v38 = vld [vmem:[#allocation10 + $0x3f8] sm:$0xff] }
 0x337   : > { %6396 = vmatprep.subr.bf16.mxu1 %v6395_v31  ;;  %v3726_v31 = vld [vmem:[#allocation10 + $0x378] sm:$0xff] }
 0x338   : > { %6450 = vmatpush3.bf16.msra.mxu0 %v7587_v51  ;;  %v6425_v44 = vpack.c.bf16 %v3726_v31, %v3725_v53 }
 0x339   : > { %3916 = vmatmul.mubr.f32.vlgmr.msra.gmra.mrb[116].mxu1 %v3521_v61  ;;  %6452 = vmatprep.subr.bf16.mxu0 %v7591_v10 }
 0x33a   : > { %6398 = vmatpush3.bf16.msra.mxu1 %v6397_v62  ;;  %3920 = vmatprep.mubr.f32.mxu1 %v7543_v0 }
 0x33b   : > { %6400 = vmatprep.subr.bf16.mxu1 %v6399_v36 }
 0x33c   : > { %6454 = vmatpush3.bf16.msra.mxu0 %v7591_v10 }
 0x33d   : > { %3921 = vmatmul.mubr.f32.gmra.mrb[118].mxu1 %v7536_v27  ;;  %6456 = vmatprep.subr.bf16.mxu0 %v7597_v50  ;;  %v6409_v27 = vpack.c.bf16 %v3718_v2, %v3717_v21 }
 0x33e   : > { %6402 = vmatpush3.bf16.msra.mxu1 %v6401_v25  ;;  %3925 = vmatprep.mubr.f32.mxu1 %v7551_v16 }
 0x33f   : > { %6404 = vmatprep.subr.bf16.mxu1 %v6403_v42 }
 0x340   : > { %6458 = vmatpush3.bf16.msra.mxu0 %v7597_v50 }
 0x341   : > { %3926 = vmatmul.mubr.f32.gmra.mrb[120].mxu1 %v7555_v49  ;;  %v6415_v49 = vpack.c.bf16 %v3738_v9, %v3737_v59 }
 0x342   : > { %6406 = vmatpush3.bf16.msra.mxu1 %v6405_v4  ;;  %3930 = vmatprep.mubr.f32.mxu1 %v3533_v45 }
 0x343   : > { %6408 = vmatprep.subr.bf16.mxu1 %v6407_v23  ;;  %5654 = vmatmul.mubr.f32.vlgmr.msra.gmra.mrb[98].mxu0 %v7563_v57 }
 0x345   : > { %3931 = vmatmul.mubr.f32.gmra.mrb[122].mxu1 %v7563_v57  ;;  %v3566_v57 = vld [vmem:[#allocation3 + $0x51] sm:$0xff] }
 0x346   : > { %6410 = vmatpush3.bf16.msra.mxu1 %v6409_v27  ;;  %4085 = vmatprep.mubr.f32.mxu1 %v7539_v17  ;;  %v6423_v17 = vpack.c.bf16 %v3742_v38, %v3741_v43 }
 0x347   : > { %6412 = vmatprep.subr.bf16.mxu1 %v6411_v6 }
 0x34a   : > { %6414 = vmatpush3.bf16.msra.mxu1 %v6413_v47 }
 0x34b   : > { %6416 = vmatprep.subr.bf16.mxu1 %v6415_v49 }
 0x34e   : > { %6418 = vmatpush3.bf16.msra.mxu1 %v6417_v41 }
 0x34f   : > { %6420 = vmatprep.subr.bf16.mxu1 %v6419_v46 }
 0x352   : > { %6422 = vmatpush3.bf16.msra.mxu1 %v6421_v7 }
 0x353   : > { %6424 = vmatprep.subr.bf16.mxu1 %v6423_v17 }
 0x356   : > { %6426 = vmatpush3.bf16.msra.mxu1 %v6425_v44 }
 0x357   : > { %6459 = vmatprep.subr.bf16.mxu1 %v7547_v52 }
 0x359   : > { %4086 = vmatmul.mubr.f32.vlgmr.msra.gmra.mrb[124].mxu1 %v7543_v0  ;;  %v3558_v0 = vld [vmem:[#allocation3 + $0x50] sm:$0xff] }
 0x35a   : > { %6467 = vmatpush3.bf16.msra.mxu1 %v7547_v52  ;;  %4090 = vmatprep.mubr.f32.mxu1 %v7545_v33  ;;  %v3574_v33 = vld [vmem:[#allocation3 + $0x52] sm:$0xff] }
 0x35b   : > { %6460 = vmatprep.subr.bf16.mxu1 %v7557_v26 }
 0x35d   : > { %4091 = vmatmul.mubr.f32.gmra.mrb[126].mxu1 %v7551_v16 }
 0x35e   : > { %6468 = vmatpush3.bf16.msra.mxu1 %v7557_v26  ;;  %4095 = vmatprep.mubr.f32.mxu1 %v7578_v24 }
 0x35f   : > { %6461 = vmatprep.subr.bf16.mxu1 %v7565_v20 }
 0x361   : > { %4096 = vmatmul.mubr.f32.gmra.mrb[128].mxu1 %v3533_v45 }
 0x362   : > { %6469 = vmatpush3.bf16.msra.mxu1 %v7565_v20  ;;  %4100 = vmatprep.mubr.f32.mxu1 %v3566_v57 }
 0x363   : > { %6462 = vmatprep.subr.bf16.mxu1 %v7573_v19 }
 0x365   : > { %4101 = vmatmul.mubr.f32.gmra.mrb[130].mxu1 %v3558_v0 }
 0x366   : > { %6470 = vmatpush3.bf16.msra.mxu1 %v7573_v19  ;;  %5656 = vmatprep.mubr.f32.mxu1 %v7571_v29 }
 0x367   : > { %6463 = vmatprep.subr.bf16.mxu1 %v7581_v54 }
 0x36a   : > { %6471 = vmatpush3.bf16.msra.mxu1 %v7581_v54 }
 0x36b   : > { %6464 = vmatprep.subr.bf16.mxu1 %v7587_v51 }
 0x36e   : > { %6472 = vmatpush3.bf16.msra.mxu1 %v7587_v51 }
 0x36f   : > { %6465 = vmatprep.subr.bf16.mxu1 %v7591_v10 }
 0x372   : > { %6473 = vmatpush3.bf16.msra.mxu1 %v7591_v10 }
 0x373   : > { %6466 = vmatprep.subr.bf16.mxu1 %v7597_v50 }
 0x376   : > { %6474 = vmatpush3.bf16.msra.mxu1 %v7597_v50 }
 0x379   : > { %5657 = vmatmul.mubr.f32.vlgmr.msra.gmra.mrb[132].mxu1 %v3574_v33 }
 0x3ec   : > { %v5293_v52 = vpop.f32.mrb[108].mxu1 }
 0x3ed   : > { %v5294_v16 = vpop.f32.mrb[109].mxu1 }
 0x3ee   : > { %v5295_v26 = vadd.f32 %v5294_v16, %v5293_v52 }
 0x3f0   : > { %v5296_v20 = vpop.f32.mrb[110].mxu1  ;;  %v3833_v58 = vadd.f32 %v5295_v26, %v4364_v8 }
 0x3f1   : > { %v5297_v29 = vpop.f32.mrb[111].mxu1 }
 0x3f2   : > { %v5298_v19 = vadd.f32 %v5297_v29, %v5296_v20 }
 0x3f4   : > { %v5299_v24 = vpop.f32.mrb[112].mxu1  ;;  %v3838_v45 = vadd.f32 %v5298_v19, %v4364_v8 }
 0x3f5   : > { %v5300_v54 = vpop.f32.mrb[113].mxu1 }
 0x3f6   : > { %v5301_v55 = vadd.f32 %v5300_v54, %v5299_v24  ;;  %v5381_v61 = vpop.f32.mrb[90].mxu0 }
 0x3f7   : > { %v5382_v62 = vpop.f32.mrb[91].mxu0 }
 0x3f8   : > { %v5302_v39 = vpop.f32.mrb[114].mxu1  ;;  %v5383_v14 = vadd.f32 %v5382_v62, %v5381_v61  ;;  %v3843_v27 = vadd.f32 %v5301_v55, %v4364_v8 }
 0x3f9   : > { %v5303_v30 = vpop.f32.mrb[115].mxu1 }
 0x3fa   : > { %v5304_v51 = vadd.f32 %v5303_v30, %v5302_v39  ;;  %v5384_v28 = vpop.f32.mrb[92].mxu0 }
 0x3fb   : > { %v5385_v36 = vpop.f32.mrb[93].mxu0 }
 0x3fc   : > { %v5386_v34 = vadd.f32 %v5385_v36, %v5384_v28  ;;  %v3848_v47 = vadd.f32 %v5304_v51, %v4364_v8 }
 0x3fe   : > { %v5387_v1 = vpop.f32.mrb[94].mxu0 }
 0x3ff   : > { %v5388_v37 = vpop.f32.mrb[95].mxu0 }
 0x400   : > { %v5389_v48 = vadd.f32 %v5388_v37, %v5387_v1 }
 0x402   : > { %v5390_v10 = vpop.f32.mrb[96].mxu0 }
 0x403   : > { %v5391_v25 = vpop.f32.mrb[97].mxu0 }
 0x404   : > { %v5392_v35 = vadd.f32 %v5391_v25, %v5390_v10 }
 0x40c   : > { %v5337_v42 = vpop.f32.mrb[116].mxu1 }
 0x40d   : > { %v5338_v40 = vpop.f32.mrb[117].mxu1 }
 0x40e   : > { %v5339_v13 = vadd.f32 %v5338_v40, %v5337_v42 }
 0x410   : > { %v3918_v5 = vadd.f32 %v5339_v13, %v3833_v58  ;;  %v5340_v50 = vpop.f32.mrb[118].mxu1 }
 0x411   : > { %v5341_v4 = vpop.f32.mrb[119].mxu1 }
 0x412   : > { %v4003_v23 = vadd.f32 %v5383_v14, %v3918_v5  ;;  %v5342_v21 = vadd.f32 %v5341_v4, %v5340_v50 }
 0x414   : > { %v3923_v2 = vadd.f32 %v5342_v21, %v3838_v45  ;;  %v5343_v3 = vpop.f32.mrb[120].mxu1 }
 0x415   : > { %v5344_v60 = vpop.f32.mrb[121].mxu1 }
 0x416   : > { %v4008_v6 = vadd.f32 %v5386_v34, %v3923_v2  ;;  %v5345_v63 = vadd.f32 %v5344_v60, %v5343_v3  ;;  %v5655_v11 = vpop.f32.mrb[98].mxu0 }
 0x417   : > { %v4172_v15 = vpop.f32.mrb[99].mxu0 }
 0x418   : > { %v3928_v22 = vadd.f32 %v5345_v63, %v3843_v27  ;;  %v5346_v59 = vpop.f32.mrb[122].mxu1 }
 0x419   : > { %v5347_v9 = vpop.f32.mrb[123].mxu1 }
 0x41a   : > { %v4013_v49 = vadd.f32 %v5389_v48, %v3928_v22  ;;  %v5348_v12 = vadd.f32 %v5347_v9, %v5346_v59 }
 0x41c   : > { %v3933_v18 = vadd.f32 %v5348_v12, %v3848_v47 }
 0x41e   : > { %v4018_v41 = vadd.f32 %v5392_v35, %v3933_v18 }
 0x42c   : > { %v5425_v46 = vpop.f32.mrb[124].mxu1 }
 0x42d   : > { %v5426_v32 = vpop.f32.mrb[125].mxu1 }
 0x42e   : > { %v5427_v56 = vadd.f32 %v5426_v32, %v5425_v46 }
 0x430   : > { %v5428_v43 = vpop.f32.mrb[126].mxu1  ;;  %v4088_v38 = vadd.f32 %v5427_v56, %v4003_v23 }
 0x431   : > { %v5429_v7 = vpop.f32.mrb[127].mxu1 }
 0x432   : > { %v5430_v17 = vadd.f32 %v5429_v7, %v5428_v43  ;;  %v4173_v53 = vadd.f32 %v4172_v15, %v4088_v38 }
 0x434   : > { %v4093_v31 = vadd.f32 %v5430_v17, %v4008_v6  ;;  %vm4191_vm6 = vcmp.ge.f32.partialorder %v4173_v53, 0.0  ;;  %v4195_v44 = vmul.f32 0.2, %v4173_v53  ;;  %v5431_v57 = vpop.f32.mrb[128].mxu1 }
 0x435   : > { %v5432_v0 = vpop.f32.mrb[129].mxu1 }
 0x436   : > { %v4178_v33 = vadd.f32 %v5655_v11, %v4093_v31  ;;  %v4199_v52 = vsel %vm4191_vm6, %v4173_v53, %v4195_v44  ;;  %v5433_v16 = vadd.f32 %v5432_v0, %v5431_v57 }
 0x437   : > { %v4203_v26 = vmul.f32 1.4142135, %v4199_v52 }
 0x438   : > { %vm4192_vm7 = vcmp.ge.f32.partialorder %v4178_v33, 0.0  ;;  %v4196_v20 = vmul.f32 0.2, %v4178_v33  ;;  %v5434_v29 = vpop.f32.mrb[130].mxu1  ;;  %v4098_v19 = vadd.f32 %v5433_v16, %v4013_v49 }
 0x439   : > { %4207 = vst [vmem:[%s7120_s11] sm:$0xff] %v4203_v26  ;;  %v5435_v24 = vpop.f32.mrb[131].mxu1 }
 0x43a   : > { %v4200_v54 = vsel %vm4192_vm7, %v4178_v33, %v4196_v20  ;;  %v5436_v55 = vadd.f32 %v5435_v24, %v5434_v29 }
 0x43b   : > { %v4204_v39 = vmul.f32 1.4142135, %v4200_v54 }
 0x43c   : > { %v4103_v30 = vadd.f32 %v5436_v55, %v4018_v41 }
 0x43d   : > { %4208 = vst [vmem:[%s7120_s11 + $0x8] sm:$0xff] %v4204_v39 }
 0x44c   : > { %v5658_v51 = vpop.f32.mrb[132].mxu1 }
 0x44d   : > { %v4188_v61 = vadd.f32 %v5658_v51, %v4103_v30  ;;  %v4182_v62 = vpop.f32.mrb[133].mxu1 }
 0x44e   : > { %v4183_v14 = vadd.f32 %v4182_v62, %v4098_v19 }
 0x44f   : > { %vm4194_vm8 = vcmp.ge.f32.partialorder %v4188_v61, 0.0  ;;  %v4198_v28 = vmul.f32 0.2, %v4188_v61 }
 0x450   : > { %vm4193_vm9 = vcmp.ge.f32.partialorder %v4183_v14, 0.0  ;;  %v4197_v36 = vmul.f32 0.2, %v4183_v14 }
 0x451   : > { %v4202_v34 = vsel %vm4194_vm8, %v4188_v61, %v4198_v28 }
 0x452   : > { %v4206_v1 = vmul.f32 1.4142135, %v4202_v34  ;;  %v4201_v37 = vsel %vm4193_vm9, %v4183_v14, %v4197_v36 }
 0x453   : > { %v4205_v48 = vmul.f32 1.4142135, %v4201_v37 }
 0x454   : > { %4210 = vst [vmem:[%s7120_s11 + $0x18] sm:$0xff] %v4206_v1 }
 0x455   : > { %4209 = vst [vmem:[%s7120_s11 + $0x10] sm:$0xff] %v4205_v48 }
 0x456   : > { %6786 = shalt.err (!%p6783_p9)
}
 0x457   : > { %s6787_s10 = scalar_lea.hbm %s7640_s29, 512  ;;  %s6791_s23 = scalar_lea.hbm %s7702_s5, 2048 }
 0x458   : > { %p6788_p11 = scmp.ne.s32.totalorder %s7640_s29, %s6787_s10  ;;  %p6792_p8 = scmp.lt.u32.totalorder %s7640_s29, %s7702_s5 }
 0x459   : > { %p6793_p0 = scmp.lt.u32.totalorder %s6791_s23, %s6787_s10  ;;  %p6795_p10 = scmp.lt.u32.totalorder %s6787_s10, %s7640_s29 }
 0x45a   : > { %p6789_p13 = pnand %p6788_p11, %p7730_p12 }
 0x45b   : > { %p6794_p2 = por %p6793_p0, %p6792_p8 }
 0x45c   : > { %p6790_p3 = pneg %p6789_p13 }
 0x45d   : > { %p6796_p1 = por %p6795_p10, %p6794_p2 }
 0x45f   : > { %p6797_p4 = pnand %p6796_p1, %p6790_p3 }
 0x461   : > { %6800 = shalt.err (!%p6797_p4)
}
 0x462   : > { %s6901_s14 = smov 128  }
 0x463   : > { %6551 = dma.vmem_to_hbm [thread:$0]  (%p7730_p12), %s7635_s2, 512, %s7640_s29, %s7644_s28, %s6901_s14, %s6901_s14, %s6891_s15  }
 0x464 PF: > { %s7731_s11 = sld [smem:[#allocation28_spill]]  ;;  %p6578_p5 = scmp.ge.s32.totalorder %s6881_s25, 2 }
 0x465   : > { %s4242_s30 = sand.u32 1, %s6853_s18  }
 0x466   : > { %s4243_s16 = scalar_lea.sflag [#allocation7], %s4242_s30 }
 0x46a   : > { %p7732_p6 = scmp.ne.s32.totalorder %s7731_s11, 0 }
 0x46c   : > { %p6567_p7 = pnand %p6578_p5, %p7732_p6 }
 0x46e   : > { %6848 = dma.done.wait (!%p6567_p7), %s4243_s16, 512  }
 0x46f   : > { %6850 = vsyncadd (!%p6567_p7), %s4243_s16, 4294966784  ;;  %s21_s25 = sadd.s32 1, %s6881_s25   ;;  %s7733_s7 = sld [smem:[#allocation23_spill]] }
 0x470   : > { %p18_p9 = scmp.ge.s32.totalorder %s21_s25, 6   ;;  %s7734_s20 = sld [smem:[#allocation29_spill]] }
 0x471   : > { %s7735_s21 = sld [smem:[#allocation24_spill]]  ;;  %s7736_s22 = sld [smem:[#allocation25_spill]] }
 0x472   : > { %s7737_s23 = sld [smem:[#allocation26_spill]]  ;;  %s7738_s24 = sld [smem:[#allocation27_spill]] }
 0x473   : > { %s7739_s18 = smov %s6857_s19  ;;  %20 = sbr.rel (!%p18_p9) target bundleno = 10 (0xa), region = 118 }
 0x475   : > { %s7740_s19 = smov %s7733_s7 }
 0x47a   :  { %4248 = vsyncpa [#allocation6], 1 }
 0x47b   :  { %4250 = vsyncpa [#allocation6 + $0x1], 1 }
 0x47c   :  { %4251 = vsyncpa [#allocation9], 1 }
 0x47d   :  { %4252 = vsyncpa [#allocation12], 1 }
 0x47e   :  { %4253 = vsyncpa [#allocation7], 1 }
 0x47f   :  { %4255 = vsyncpa [#allocation7 + $0x1], 1 }
 0x480   :  { %4256 = vsyncmov [#allocation4] }
 0x483   :  { %s4257_s15 = vpop.sfrf %4256 }
 0x484   :  { %p4371_p12 = scmp.ne.s32.totalorder %s4257_s15, 0 }
 0x486   :  { %4261 = shalt.err (%p4371_p12)  }

</bundles_post_ra>
